<compile_context>
chip_gen: v7x
topology: tpu7x:2x2x1
jax: 0.10.0
libtpu: 0.0.40
codegen_flags: <defaults>
</compile_context>

<pallas_src>
import jax
import jax.numpy as jnp
from jax.experimental import pallas as pl
from jax.experimental.pallas import tpu as pltpu

EPS = 1e-5   # PyTorch GroupNorm default eps
G = 16       # GroupNorm(16, C)


def _round_up(x, m):
    return ((x + m - 1) // m) * m


# ---------------- Kernel 1: GroupNorm(16) + SiLU ----------------

def _gn_silu_kernel(x_ref, g_ref, b_ref, o_ref):
    # x_ref: (TR, L) input rows, one row per (batch, group).
    # g_ref/b_ref: (G, L) group-periodic affine (row g applies to rows r with r % G == g).
    TR, L = x_ref.shape
    x = x_ref[...].astype(jnp.float32).reshape(TR // G, G, L)
    mean = jnp.mean(x, axis=2, keepdims=True)
    xc = x - mean
    var = jnp.mean(xc * xc, axis=2, keepdims=True)       # two-pass (no cancellation)
    rstd = jax.lax.rsqrt(var + EPS)
    y = xc * rstd * g_ref[...][None] + b_ref[...][None]
    y = y * jax.nn.sigmoid(y)                             # SiLU
    o_ref[...] = y.reshape(TR, L).astype(o_ref.dtype)


def _pick_gn_rows(NG, L, block_budget_bytes=2 << 20):
    """Largest multiple of G dividing NG whose (rows, L) f32 block fits the budget,
    capped so the grid keeps >= 2 steps (megacore / v7x dual-TC splitting)."""
    max_rows = max(G, (block_budget_bytes // (4 * L)) // G * G)
    if NG >= 2 * G:
        max_rows = min(max_rows, (NG // 2) // G * G)
    tr = G
    cand = G
    while cand <= min(NG, max_rows):
        if NG % cand == 0:
            tr = cand
        cand += G
    return tr


def group_norm_silu(x, gamma, beta):
    N, C, D, H, W = x.shape
    assert C % G == 0
    Cg = C // G
    S = D * H * W
    L = Cg * S
    NG = N * G
    TR = _pick_gn_rows(NG, L)

    # TODO(synk): for very large volumes (a single (G, L) f32 row block no longer fits VMEM,
    # esp. v7x 64 MiB) split the row reduction onto an 'arbitrary' grid axis with sum/sumsq
    # scratch and a finalize pass.
    x_rows = x.reshape(NG, L)

    # One group-period of the affine params, channel-major within the row layout (Cg, S).
    gamma_rows = jnp.broadcast_to(gamma.reshape(G, Cg, 1), (G, Cg, S)).reshape(G, L)
    beta_rows = jnp.broadcast_to(beta.reshape(G, Cg, 1), (G, Cg, S)).reshape(G, L)
    gamma_rows = gamma_rows.astype(jnp.float32)
    beta_rows = beta_rows.astype(jnp.float32)

    elems = NG * L
    ce = pl.CostEstimate(flops=12 * elems, transcendentals=elems,
                         bytes_accessed=4 * elems + 2 * elems + 2 * 4 * G * L)

    y_rows = pl.pallas_call(
        _gn_silu_kernel,
        out_shape=jax.ShapeDtypeStruct((NG, L), jnp.bfloat16),   # bf16 store: half traffic
        grid=(NG // TR,),
        in_specs=[pl.BlockSpec((TR, L), lambda i: (i, 0)),
                  pl.BlockSpec((G, L), lambda i: (0, 0)),        # resident, DMA'd once
                  pl.BlockSpec((G, L), lambda i: (0, 0))],       # resident, DMA'd once
        out_specs=pl.BlockSpec((TR, L), lambda i: (i, 0)),
        compiler_params=pltpu.CompilerParams(
            dimension_semantics=("parallel",),
            vmem_limit_bytes=48 * 1024 * 1024),
        cost_estimate=ce,
    )(x_rows, gamma_rows, beta_rows)
    return y_rows.reshape(N, C, D, H, W)


# ---------------- Kernel 2a: Conv3d k=3 p=1 stride=1 (implicit GEMM, no im2col) -------------

def _conv_s1_kernel(w_ref, b_ref, p0_ref, p1_ref, p2_ref, o_ref):
    # w_ref : (27, C, Coutp) bf16 resident weights, tap-major / channel-minor.
    # b_ref : (1, Coutp) f32 resident bias.
    # p*_ref: (1, 1, Hp, Wp, C) bf16 padded activation planes at depths d+0, d+1, d+2.
    # o_ref : (1, 1, Ho, Wo, Coutp) bf16 output block.
    _, _, Hp, Wp, C = p0_ref.shape
    _, _, Ho, Wo, Coutp = o_ref.shape
    planes = (p0_ref, p1_ref, p2_ref)
    acc = jnp.zeros((Ho * Wo, Coutp), jnp.float32)
    for kd in range(3):
        p_ref = planes[kd]
        for kh in range(3):
            for kw in range(3):
                t = kd * 9 + kh * 3 + kw
                lhs = p_ref[:, :, kh:kh + Ho, kw:kw + Wo, :].reshape(Ho * Wo, C)
                acc = acc + jnp.dot(lhs, w_ref[t], preferred_element_type=jnp.float32)
    out = acc + b_ref[...]
    o_ref[...] = out.reshape(1, 1, Ho, Wo, Coutp).astype(o_ref.dtype)


def _conv3d_s1(y, conv_w, conv_b):
    N, C, D, H, W = y.shape
    Cout = conv_w.shape[0]
    Do, Ho, Wo = D, H, W
    Hp, Wp = H + 2, W + 2
    Coutp = _round_up(max(Cout, 128), 128)                 # lane-dense output

    # Channels-last + spatial pad, in bf16 (the only HBM-resident conv activation).
    y_cl = jnp.transpose(y, (0, 2, 3, 4, 1))               # (N, D, H, W, C)
    y_pad = jnp.pad(y_cl, ((0, 0), (1, 1), (1, 1), (1, 1), (0, 0)))

    # Weights in (kd, kh, kw, cin, cout) order, Cout zero-padded to 128 lanes.
    w_mat = jnp.transpose(conv_w, (2, 3, 4, 1, 0)).reshape(27, C, Cout)
    w_mat = jnp.pad(w_mat, ((0, 0), (0, 0), (0, Coutp - Cout))).astype(jnp.bfloat16)
    b_p = jnp.pad(conv_b, (0, Coutp - Cout)).reshape(1, Coutp).astype(jnp.float32)

    # TODO(synk): for very large Hp*Wp*C planes (VMEM pressure, esp. v7x), add an Ho block
    # axis to the grid instead of taking the full plane per step.
    def plane_spec(kd):
        return pl.BlockSpec((1, 1, Hp, Wp, C), lambda n, d: (n, d + kd, 0, 0, 0))

    M = N * Do * Ho * Wo
    Kc = 27 * C
    ce = pl.CostEstimate(
        flops=2 * M * Kc * Coutp, transcendentals=0,
        bytes_accessed=2 * (N * Do * 3 * Hp * Wp * C + 27 * C * Coutp + M * Coutp))

    out = pl.pallas_call(
        _conv_s1_kernel,
        out_shape=jax.ShapeDtypeStruct((N, Do, Ho, Wo, Coutp), jnp.bfloat16),
        grid=(N, Do),
        in_specs=[pl.BlockSpec((27, C, Coutp), lambda n, d: (0, 0, 0)),   # resident weights
                  pl.BlockSpec((1, Coutp), lambda n, d: (0, 0)),          # resident bias
                  plane_spec(0), plane_spec(1), plane_spec(2)],
        out_specs=pl.BlockSpec((1, 1, Ho, Wo, Coutp), lambda n, d: (n, d, 0, 0, 0)),
        compiler_params=pltpu.CompilerParams(
            dimension_semantics=("parallel", "parallel"),
            vmem_limit_bytes=32 * 1024 * 1024),
        cost_estimate=ce,
    )(w_mat, b_p, y_pad, y_pad, y_pad)

    out = out[..., :Cout]
    return jnp.transpose(out, (0, 4, 1, 2, 3)).astype(jnp.float32)


# ---------------- Kernel 2b: Conv3d k=3 p=1 stride>1 (im2col GEMM) ----------------

def _conv_mm_kernel(p_ref, w_ref, b_ref, o_ref, acc_ref):
    # p_ref: (tm, tk) bf16 patches, w_ref: (tk, tn) bf16 weights, b_ref: (1, tn) f32 bias.
    @pl.when(pl.program_id(2) == 0)
    def _():
        acc_ref[...] = jnp.zeros_like(acc_ref)

    acc_ref[...] += jnp.dot(p_ref[...], w_ref[...], preferred_element_type=jnp.float32)

    @pl.when(pl.program_id(2) == pl.num_programs(2) - 1)
    def _():
        o_ref[...] = (acc_ref[...] + b_ref[...]).astype(o_ref.dtype)


def _conv3d_im2col(y, conv_w, conv_b, stride):
    N, C, D, H, W = y.shape
    Cout = conv_w.shape[0]
    Do = (D - 1) // stride + 1
    Ho = (H - 1) // stride + 1
    Wo = (W - 1) // stride + 1

    # bf16 channels-last + pad; im2col in tap-major / channel-minor K order (lane-dense C).
    y_cl = jnp.transpose(y, (0, 2, 3, 4, 1))
    y_pad = jnp.pad(y_cl, ((0, 0), (1, 1), (1, 1), (1, 1), (0, 0)))
    taps = []
    for kd in range(3):
        for kh in range(3):
            for kw in range(3):
                taps.append(y_pad[:,
                                  kd:kd + stride * (Do - 1) + 1:stride,
                                  kh:kh + stride * (Ho - 1) + 1:stride,
                                  kw:kw + stride * (Wo - 1) + 1:stride, :])
    patches = jnp.stack(taps, axis=4)                              # (N,Do,Ho,Wo,27,C) bf16
    M = N * Do * Ho * Wo
    K = 27 * C
    patches = patches.reshape(M, K)

    w_mat = jnp.transpose(conv_w, (2, 3, 4, 1, 0)).reshape(K, Cout)

    # MXU tiling: bf16 inputs, f32 accumulation, lane-dense 128-padded Cout,
    # tk=128 to minimize K zero-padding, larger tm to cut weight re-streaming.
    tm = min(512, _round_up(M, 8))
    tn = 128
    tk = 128
    Mp = _round_up(M, tm)
    Kp = _round_up(K, tk)
    Np = _round_up(max(Cout, tn), tn)

    p_p = jnp.pad(patches, ((0, Mp - M), (0, Kp - K)))             # bf16 already
    w_p = jnp.pad(w_mat, ((0, Kp - K), (0, Np - Cout))).astype(jnp.bfloat16)
    b_p = jnp.pad(conv_b, (0, Np - Cout)).reshape(1, Np).astype(jnp.float32)

    ce = pl.CostEstimate(
        flops=2 * Mp * Kp * Np, transcendentals=0,
        bytes_accessed=2 * Mp * Kp * (Np // tn) + 2 * (Mp // tm) * Kp * Np + 2 * Mp * Np)

    out_mm = pl.pallas_call(
        _conv_mm_kernel,
        out_shape=jax.ShapeDtypeStruct((Mp, Np), jnp.bfloat16),    # bf16 store
        grid=(Mp // tm, Np // tn, Kp // tk),
        in_specs=[pl.BlockSpec((tm, tk), lambda i, j, k: (i, k)),
                  pl.BlockSpec((tk, tn), lambda i, j, k: (k, j)),
                  pl.BlockSpec((1, tn), lambda i, j, k: (0, j))],
        out_specs=pl.BlockSpec((tm, tn), lambda i, j, k: (i, j)),
        scratch_shapes=[pltpu.VMEM((tm, tn), jnp.float32)],
        compiler_params=pltpu.CompilerParams(
            dimension_semantics=("parallel", "parallel", "arbitrary"),
            vmem_limit_bytes=32 * 1024 * 1024),
        cost_estimate=ce,
    )(p_p, w_p, b_p)

    out = out_mm[:M, :Cout].reshape(N, Do, Ho, Wo, Cout)
    return jnp.transpose(out, (0, 4, 1, 2, 3)).astype(jnp.float32)


# ---------------- full block ----------------

def volume_processor_block(x, gn_gamma, gn_beta, conv_w, conv_b, stride):
    y = group_norm_silu(x, gn_gamma, gn_beta)            # bf16
    if stride == 1:
        out = _conv3d_s1(y, conv_w, conv_b)
    else:
        out = _conv3d_im2col(y, conv_w, conv_b, stride)
    return out.astype(x.dtype)


# ---------------- pure-JAX reference ----------------

def reference(x, gamma, beta, conv_w, conv_b, stride):
    N, C = x.shape[:2]
    xr = x.reshape(N, G, -1)
    mean = xr.mean(axis=2, keepdims=True)
    var = xr.var(axis=2, keepdims=True)
    xn = ((xr - mean) / jnp.sqrt(var + EPS)).reshape(x.shape)
    y = xn * gamma[None, :, None, None, None] + beta[None, :, None, None, None]
    y = y * jax.nn.sigmoid(y)
    # conv in bf16 with f32 accumulation (apples-to-apples with the MXU kernels)
    out = jax.lax.conv_general_dilated(
        y.astype(jnp.bfloat16), conv_w.astype(jnp.bfloat16),
        window_strides=(stride, stride, stride),
        padding=((1, 1), (1, 1), (1, 1)),
        dimension_numbers=('NCDHW', 'OIDHW', 'NCDHW'),
        preferred_element_type=jnp.float32)
    return out + conv_b[None, :, None, None, None]


if __name__ == "__main__":
    key = jax.random.PRNGKey(0)
    kx, kg, kb, kw, kbias = jax.random.split(key, 5)

    # small shapes consistent with the module: GroupNorm(16, C) needs C % 16 == 0
    N, C, D, H, W = 2, 32, 8, 8, 8
    Cout = 16

    x = jax.random.normal(kx, (N, C, D, H, W), jnp.float32)
    gn_gamma = 1.0 + 0.1 * jax.random.normal(kg, (C,), jnp.float32)
    gn_beta = 0.1 * jax.random.normal(kb, (C,), jnp.float32)
    conv_w = 0.1 * jax.random.normal(kw, (Cout, C, 3, 3, 3), jnp.float32)
    conv_b = 0.1 * jax.random.normal(kbias, (Cout,), jnp.float32)

    run = jax.jit(volume_processor_block, static_argnames=("stride",))

    for stride in (1, 2):                      # exercise both conv kernels
        out = run(x, gn_gamma, gn_beta, conv_w, conv_b, stride=stride)
        out = jax.block_until_ready(out)
        ref = reference(x, gn_gamma, gn_beta, conv_w, conv_b, stride)
        Do = (D - 1) // stride + 1
        assert out.shape == (N, Cout, Do, Do, Do), out.shape
        err = float(jnp.max(jnp.abs(out - ref)))
        assert jnp.allclose(out, ref, atol=2e-2, rtol=2e-2), (stride, err)

    print("KERNEL_OK")
</pallas_src>

<mosaic_0001>
module attributes {stable_mosaic.version = 11 : i64} {
  func.func @_gn_silu_kernel(%arg0: i32, %arg1: memref<16x1024xf32, #tpu.memory_space<vmem>>, %arg2: memref<16x1024xf32, #tpu.memory_space<vmem>>, %arg3: memref<16x1024xf32, #tpu.memory_space<vmem>>, %arg4: memref<16x1024xbf16, #tpu.memory_space<vmem>>) attributes {dimension_semantics = [#tpu.dimension_semantics<parallel>], iteration_bounds = array<i64: 2>, scalar_prefetch = 0 : i64, scratch_operands = 0 : i64, tpu.core_type = #tpu.core_type<tc>, window_params = [{transform_indices = @transform_0, window_bounds = array<i64: 16, 1024>}, {pipeline_mode = #tpu.pipeline_mode<synchronous>, transform_indices = @transform_1, window_bounds = array<i64: 16, 1024>}, {pipeline_mode = #tpu.pipeline_mode<synchronous>, transform_indices = @transform_2, window_bounds = array<i64: 16, 1024>}, {transform_indices = @transform_3, window_bounds = array<i64: 16, 1024>}]} {
    %c0 = arith.constant 0 : index
    %c0_0 = arith.constant 0 : index
    %0 = vector.load %arg1[%c0, %c0_0] : memref<16x1024xf32, #tpu.memory_space<vmem>>, vector<16x1024xf32>
    %1 = vector.shape_cast %0 : vector<16x1024xf32> to vector<1x16x1024xf32>
    %cst = arith.constant dense<0.000000e+00> : vector<1x16xf32>
    %2 = vector.multi_reduction <add>, %1, %cst [2] : vector<1x16x1024xf32> to vector<1x16xf32>
    %3 = vector.shape_cast %2 : vector<1x16xf32> to vector<1x16x1xf32>
    %cst_1 = arith.constant 1.024000e+03 : f32
    %4 = vector.broadcast %cst_1 : f32 to vector<1x16x1xf32>
    %5 = arith.divf %3, %4 : vector<1x16x1xf32>
    %6 = vector.broadcast %5 : vector<1x16x1xf32> to vector<1x16x1024xf32>
    %7 = arith.subf %1, %6 : vector<1x16x1024xf32>
    %8 = arith.mulf %7, %7 : vector<1x16x1024xf32>
    %cst_2 = arith.constant dense<0.000000e+00> : vector<1x16xf32>
    %9 = vector.multi_reduction <add>, %8, %cst_2 [2] : vector<1x16x1024xf32> to vector<1x16xf32>
    %10 = vector.shape_cast %9 : vector<1x16xf32> to vector<1x16x1xf32>
    %cst_3 = arith.constant 1.024000e+03 : f32
    %11 = vector.broadcast %cst_3 : f32 to vector<1x16x1xf32>
    %12 = arith.divf %10, %11 : vector<1x16x1xf32>
    %cst_4 = arith.constant 9.99999974E-6 : f32
    %13 = vector.broadcast %cst_4 : f32 to vector<1x16x1xf32>
    %14 = arith.addf %12, %13 : vector<1x16x1xf32>
    %15 = math.rsqrt %14 : vector<1x16x1xf32>
    %16 = vector.broadcast %15 : vector<1x16x1xf32> to vector<1x16x1024xf32>
    %17 = arith.mulf %7, %16 : vector<1x16x1024xf32>
    %c0_5 = arith.constant 0 : index
    %c0_6 = arith.constant 0 : index
    %18 = vector.load %arg2[%c0_5, %c0_6] : memref<16x1024xf32, #tpu.memory_space<vmem>>, vector<16x1024xf32>
    %19 = vector.shape_cast %18 : vector<16x1024xf32> to vector<1x16x1024xf32>
    %20 = arith.mulf %17, %19 : vector<1x16x1024xf32>
    %c0_7 = arith.constant 0 : index
    %c0_8 = arith.constant 0 : index
    %21 = vector.load %arg3[%c0_7, %c0_8] : memref<16x1024xf32, #tpu.memory_space<vmem>>, vector<16x1024xf32>
    %22 = vector.shape_cast %21 : vector<16x1024xf32> to vector<1x16x1024xf32>
    %23 = arith.addf %20, %22 : vector<1x16x1024xf32>
    %24 = arith.negf %23 : vector<1x16x1024xf32>
    %25 = math.exp %24 : vector<1x16x1024xf32>
    %cst_9 = arith.constant 1.000000e+00 : f32
    %26 = vector.broadcast %cst_9 : f32 to vector<1x16x1024xf32>
    %27 = arith.addf %26, %25 : vector<1x16x1024xf32>
    %28 = arith.divf %26, %27 : vector<1x16x1024xf32>
    %29 = arith.mulf %23, %28 : vector<1x16x1024xf32>
    %30 = vector.shape_cast %29 : vector<1x16x1024xf32> to vector<16x1024xf32>
    %31 = arith.truncf %30 : vector<16x1024xf32> to vector<16x1024xbf16>
    %c0_10 = arith.constant 0 : index
    %c0_11 = arith.constant 0 : index
    %32 = vector.load %arg4[%c0_10, %c0_11] : memref<16x1024xbf16, #tpu.memory_space<vmem>>, vector<16x1024xbf16>
    tpu.vector_store %arg4[%c0_10, %c0_11], %31 {strides = array<i32>} : memref<16x1024xbf16, #tpu.memory_space<vmem>>, vector<16x1024xbf16>,
    return
  }
  func.func @transform_0(%arg0: i32) -> (i32, i32) {
    %c0_i32 = arith.constant 0 : i32
    %c0_i32_0 = arith.constant 0 : i32
    return %arg0, %c0_i32 : i32, i32
  }
  func.func @transform_1(%arg0: i32) -> (i32, i32) {
    %c0_i32 = arith.constant 0 : i32
    %c0_i32_0 = arith.constant 0 : i32
    %c0_i32_1 = arith.constant 0 : i32
    return %c0_i32, %c0_i32_0 : i32, i32
  }
  func.func @transform_2(%arg0: i32) -> (i32, i32) {
    %c0_i32 = arith.constant 0 : i32
    %c0_i32_0 = arith.constant 0 : i32
    %c0_i32_1 = arith.constant 0 : i32
    return %c0_i32, %c0_i32_0 : i32, i32
  }
  func.func @transform_3(%arg0: i32) -> (i32, i32) {
    %c0_i32 = arith.constant 0 : i32
    %c0_i32_0 = arith.constant 0 : i32
    return %arg0, %c0_i32 : i32, i32
  }
}

module attributes {stable_mosaic.version = 11 : i64} {
  func.func @_conv_s1_kernel(%arg0: i32, %arg1: i32, %arg2: memref<27x32x128xbf16, #tpu.memory_space<vmem>>, %arg3: memref<1x128xf32, #tpu.memory_space<vmem>>, %arg4: memref<1x1x10x10x32xbf16, #tpu.memory_space<vmem>>, %arg5: memref<1x1x10x10x32xbf16, #tpu.memory_space<vmem>>, %arg6: memref<1x1x10x10x32xbf16, #tpu.memory_space<vmem>>, %arg7: memref<1x1x8x8x128xbf16, #tpu.memory_space<vmem>>) attributes {dimension_semantics = [#tpu.dimension_semantics<parallel>, #tpu.dimension_semantics<parallel>], iteration_bounds = array<i64: 2, 8>, scalar_prefetch = 0 : i64, scratch_operands = 0 : i64, tpu.core_type = #tpu.core_type<tc>, window_params = [{pipeline_mode = #tpu.pipeline_mode<synchronous>, transform_indices = @transform_0, window_bounds = array<i64: 27, 32, 128>}, {pipeline_mode = #tpu.pipeline_mode<synchronous>, transform_indices = @transform_1, window_bounds = array<i64: 1, 128>}, {transform_indices = @transform_2, window_bounds = array<i64: 1, 1, 10, 10, 32>}, {transform_indices = @transform_3, window_bounds = array<i64: 1, 1, 10, 10, 32>}, {transform_indices = @transform_4, window_bounds = array<i64: 1, 1, 10, 10, 32>}, {transform_indices = @transform_5, window_bounds = array<i64: 1, 1, 8, 8, 128>}]} {
    %cst = arith.constant 0.000000e+00 : f32
    %0 = vector.broadcast %cst : f32 to vector<64x128xf32>
    %c0 = arith.constant 0 : index
    %c0_0 = arith.constant 0 : index
    %c0_1 = arith.constant 0 : index
    %c0_2 = arith.constant 0 : index
    %c0_3 = arith.constant 0 : index
    %1 = vector.load %arg4[%c0, %c0_0, %c0_1, %c0_2, %c0_3] : memref<1x1x10x10x32xbf16, #tpu.memory_space<vmem>>, vector<1x1x8x8x32xbf16>
    %2 = vector.shape_cast %1 : vector<1x1x8x8x32xbf16> to vector<64x32xbf16>
    %c0_4 = arith.constant 0 : index
    %c0_5 = arith.constant 0 : index
    %c0_6 = arith.constant 0 : index
    %3 = vector.load %arg2[%c0_4, %c0_5, %c0_6] : memref<27x32x128xbf16, #tpu.memory_space<vmem>>, vector<1x32x128xbf16>
    %4 = vector.shape_cast %3 : vector<1x32x128xbf16> to vector<32x128xbf16>
    %cst_7 = arith.constant dense<0.000000e+00> : vector<64x128xf32>
    %5 = tpu.matmul %2, %4, %cst_7 {dimension_numbers = #tpu.dot_dimension_numbers<[1], [0], [0], [1], [0, 0, 1, 1], [], []>} : vector<64x32xbf16>, vector<32x128xbf16>, vector<64x128xf32> -> vector<64x128xf32>
    %6 = arith.addf %0, %5 : vector<64x128xf32>
    %c0_8 = arith.constant 0 : index
    %c0_9 = arith.constant 0 : index
    %c0_10 = arith.constant 0 : index
    %c1 = arith.constant 1 : index
    %c0_11 = arith.constant 0 : index
    %7 = vector.load %arg4[%c0_8, %c0_9, %c0_10, %c1, %c0_11] : memref<1x1x10x10x32xbf16, #tpu.memory_space<vmem>>, vector<1x1x8x8x32xbf16>
    %8 = vector.shape_cast %7 : vector<1x1x8x8x32xbf16> to vector<64x32xbf16>
    %c1_12 = arith.constant 1 : index
    %c0_13 = arith.constant 0 : index
    %c0_14 = arith.constant 0 : index
    %9 = vector.load %arg2[%c1_12, %c0_13, %c0_14] : memref<27x32x128xbf16, #tpu.memory_space<vmem>>, vector<1x32x128xbf16>
    %10 = vector.shape_cast %9 : vector<1x32x128xbf16> to vector<32x128xbf16>
    %cst_15 = arith.constant dense<0.000000e+00> : vector<64x128xf32>
    %11 = tpu.matmul %8, %10, %cst_15 {dimension_numbers = #tpu.dot_dimension_numbers<[1], [0], [0], [1], [0, 0, 1, 1], [], []>} : vector<64x32xbf16>, vector<32x128xbf16>, vector<64x128xf32> -> vector<64x128xf32>
    %12 = arith.addf %6, %11 : vector<64x128xf32>
    %c0_16 = arith.constant 0 : index
    %c0_17 = arith.constant 0 : index
    %c0_18 = arith.constant 0 : index
    %c2 = arith.constant 2 : index
    %c0_19 = arith.constant 0 : index
    %13 = vector.load %arg4[%c0_16, %c0_17, %c0_18, %c2, %c0_19] : memref<1x1x10x10x32xbf16, #tpu.memory_space<vmem>>, vector<1x1x8x8x32xbf16>
    %14 = vector.shape_cast %13 : vector<1x1x8x8x32xbf16> to vector<64x32xbf16>
    %c2_20 = arith.constant 2 : index
    %c0_21 = arith.constant 0 : index
    %c0_22 = arith.constant 0 : index
    %15 = vector.load %arg2[%c2_20, %c0_21, %c0_22] : memref<27x32x128xbf16, #tpu.memory_space<vmem>>, vector<1x32x128xbf16>
    %16 = vector.shape_cast %15 : vector<1x32x128xbf16> to vector<32x128xbf16>
    %cst_23 = arith.constant dense<0.000000e+00> : vector<64x128xf32>
    %17 = tpu.matmul %14, %16, %cst_23 {dimension_numbers = #tpu.dot_dimension_numbers<[1], [0], [0], [1], [0, 0, 1, 1], [], []>} : vector<64x32xbf16>, vector<32x128xbf16>, vector<64x128xf32> -> vector<64x128xf32>
    %18 = arith.addf %12, %17 : vector<64x128xf32>
    %c0_24 = arith.constant 0 : index
    %c0_25 = arith.constant 0 : index
    %c1_26 = arith.constant 1 : index
    %c0_27 = arith.constant 0 : index
    %c0_28 = arith.constant 0 : index
    %19 = vector.load %arg4[%c0_24, %c0_25, %c1_26, %c0_27, %c0_28] : memref<1x1x10x10x32xbf16, #tpu.memory_space<vmem>>, vector<1x1x8x8x32xbf16>
    %20 = vector.shape_cast %19 : vector<1x1x8x8x32xbf16> to vector<64x32xbf16>
    %c3 = arith.constant 3 : index
    %c0_29 = arith.constant 0 : index
    %c0_30 = arith.constant 0 : index
    %21 = vector.load %arg2[%c3, %c0_29, %c0_30] : memref<27x32x128xbf16, #tpu.memory_space<vmem>>, vector<1x32x128xbf16>
    %22 = vector.shape_cast %21 : vector<1x32x128xbf16> to vector<32x128xbf16>
    %cst_31 = arith.constant dense<0.000000e+00> : vector<64x128xf32>
    %23 = tpu.matmul %20, %22, %cst_31 {dimension_numbers = #tpu.dot_dimension_numbers<[1], [0], [0], [1], [0, 0, 1, 1], [], []>} : vector<64x32xbf16>, vector<32x128xbf16>, vector<64x128xf32> -> vector<64x128xf32>
    %24 = arith.addf %18, %23 : vector<64x128xf32>
    %c0_32 = arith.constant 0 : index
    %c0_33 = arith.constant 0 : index
    %c1_34 = arith.constant 1 : index
    %c1_35 = arith.constant 1 : index
    %c0_36 = arith.constant 0 : index
    %25 = vector.load %arg4[%c0_32, %c0_33, %c1_34, %c1_35, %c0_36] : memref<1x1x10x10x32xbf16, #tpu.memory_space<vmem>>, vector<1x1x8x8x32xbf16>
    %26 = vector.shape_cast %25 : vector<1x1x8x8x32xbf16> to vector<64x32xbf16>
    %c4 = arith.constant 4 : index
    %c0_37 = arith.constant 0 : index
    %c0_38 = arith.constant 0 : index
    %27 = vector.load %arg2[%c4, %c0_37, %c0_38] : memref<27x32x128xbf16, #tpu.memory_space<vmem>>, vector<1x32x128xbf16>
    %28 = vector.shape_cast %27 : vector<1x32x128xbf16> to vector<32x128xbf16>
    %cst_39 = arith.constant dense<0.000000e+00> : vector<64x128xf32>
    %29 = tpu.matmul %26, %28, %cst_39 {dimension_numbers = #tpu.dot_dimension_numbers<[1], [0], [0], [1], [0, 0, 1, 1], [], []>} : vector<64x32xbf16>, vector<32x128xbf16>, vector<64x128xf32> -> vector<64x128xf32>
    %30 = arith.addf %24, %29 : vector<64x128xf32>
    %c0_40 = arith.constant 0 : index
    %c0_41 = arith.constant 0 : index
    %c1_42 = arith.constant 1 : index
    %c2_43 = arith.constant 2 : index
    %c0_44 = arith.constant 0 : index
    %31 = vector.load %arg4[%c0_40, %c0_41, %c1_42, %c2_43, %c0_44] : memref<1x1x10x10x32xbf16, #tpu.memory_space<vmem>>, vector<1x1x8x8x32xbf16>
    %32 = vector.shape_cast %31 : vector<1x1x8x8x32xbf16> to vector<64x32xbf16>
    %c5 = arith.constant 5 : index
    %c0_45 = arith.constant 0 : index
    %c0_46 = arith.constant 0 : index
    %33 = vector.load %arg2[%c5, %c0_45, %c0_46] : memref<27x32x128xbf16, #tpu.memory_space<vmem>>, vector<1x32x128xbf16>
    %34 = vector.shape_cast %33 : vector<1x32x128xbf16> to vector<32x128xbf16>
    %cst_47 = arith.constant dense<0.000000e+00> : vector<64x128xf32>
    %35 = tpu.matmul %32, %34, %cst_47 {dimension_numbers = #tpu.dot_dimension_numbers<[1], [0], [0], [1], [0, 0, 1, 1], [], []>} : vector<64x32xbf16>, vector<32x128xbf16>, vector<64x128xf32> -> vector<64x128xf32>
    %36 = arith.addf %30, %35 : vector<64x128xf32>
    %c0_48 = arith.constant 0 : index
    %c0_49 = arith.constant 0 : index
    %c2_50 = arith.constant 2 : index
    %c0_51 = arith.constant 0 : index
    %c0_52 = arith.constant 0 : index
    %37 = vector.load %arg4[%c0_48, %c0_49, %c2_50, %c0_51, %c0_52] : memref<1x1x10x10x32xbf16, #tpu.memory_space<vmem>>, vector<1x1x8x8x32xbf16>
    %38 = vector.shape_cast %37 : vector<1x1x8x8x32xbf16> to vector<64x32xbf16>
    %c6 = arith.constant 6 : index
    %c0_53 = arith.constant 0 : index
    %c0_54 = arith.constant 0 : index
    %39 = vector.load %arg2[%c6, %c0_53, %c0_54] : memref<27x32x128xbf16, #tpu.memory_space<vmem>>, vector<1x32x128xbf16>
    %40 = vector.shape_cast %39 : vector<1x32x128xbf16> to vector<32x128xbf16>
    %cst_55 = arith.constant dense<0.000000e+00> : vector<64x128xf32>
    %41 = tpu.matmul %38, %40, %cst_55 {dimension_numbers = #tpu.dot_dimension_numbers<[1], [0], [0], [1], [0, 0, 1, 1], [], []>} : vector<64x32xbf16>, vector<32x128xbf16>, vector<64x128xf32> -> vector<64x128xf32>
    %42 = arith.addf %36, %41 : vector<64x128xf32>
    %c0_56 = arith.constant 0 : index
    %c0_57 = arith.constant 0 : index
    %c2_58 = arith.constant 2 : index
    %c1_59 = arith.constant 1 : index
    %c0_60 = arith.constant 0 : index
    %43 = vector.load %arg4[%c0_56, %c0_57, %c2_58, %c1_59, %c0_60] : memref<1x1x10x10x32xbf16, #tpu.memory_space<vmem>>, vector<1x1x8x8x32xbf16>
    %44 = vector.shape_cast %43 : vector<1x1x8x8x32xbf16> to vector<64x32xbf16>
    %c7 = arith.constant 7 : index
    %c0_61 = arith.constant 0 : index
    %c0_62 = arith.constant 0 : index
    %45 = vector.load %arg2[%c7, %c0_61, %c0_62] : memref<27x32x128xbf16, #tpu.memory_space<vmem>>, vector<1x32x128xbf16>
    %46 = vector.shape_cast %45 : vector<1x32x128xbf16> to vector<32x128xbf16>
    %cst_63 = arith.constant dense<0.000000e+00> : vector<64x128xf32>
    %47 = tpu.matmul %44, %46, %cst_63 {dimension_numbers = #tpu.dot_dimension_numbers<[1], [0], [0], [1], [0, 0, 1, 1], [], []>} : vector<64x32xbf16>, vector<32x128xbf16>, vector<64x128xf32> -> vector<64x128xf32>
    %48 = arith.addf %42, %47 : vector<64x128xf32>
    %c0_64 = arith.constant 0 : index
    %c0_65 = arith.constant 0 : index
    %c2_66 = arith.constant 2 : index
    %c2_67 = arith.constant 2 : index
    %c0_68 = arith.constant 0 : index
    %49 = vector.load %arg4[%c0_64, %c0_65, %c2_66, %c2_67, %c0_68] : memref<1x1x10x10x32xbf16, #tpu.memory_space<vmem>>, vector<1x1x8x8x32xbf16>
    %50 = vector.shape_cast %49 : vector<1x1x8x8x32xbf16> to vector<64x32xbf16>
    %c8 = arith.constant 8 : index
    %c0_69 = arith.constant 0 : index
    %c0_70 = arith.constant 0 : index
    %51 = vector.load %arg2[%c8, %c0_69, %c0_70] : memref<27x32x128xbf16, #tpu.memory_space<vmem>>, vector<1x32x128xbf16>
    %52 = vector.shape_cast %51 : vector<1x32x128xbf16> to vector<32x128xbf16>
    %cst_71 = arith.constant dense<0.000000e+00> : vector<64x128xf32>
    %53 = tpu.matmul %50, %52, %cst_71 {dimension_numbers = #tpu.dot_dimension_numbers<[1], [0], [0], [1], [0, 0, 1, 1], [], []>} : vector<64x32xbf16>, vector<32x128xbf16>, vector<64x128xf32> -> vector<64x128xf32>
    %54 = arith.addf %48, %53 : vector<64x128xf32>
    %c0_72 = arith.constant 0 : index
    %c0_73 = arith.constant 0 : index
    %c0_74 = arith.constant 0 : index
    %c0_75 = arith.constant 0 : index
    %c0_76 = arith.constant 0 : index
    %55 = vector.load %arg5[%c0_72, %c0_73, %c0_74, %c0_75, %c0_76] : memref<1x1x10x10x32xbf16, #tpu.memory_space<vmem>>, vector<1x1x8x8x32xbf16>
    %56 = vector.shape_cast %55 : vector<1x1x8x8x32xbf16> to vector<64x32xbf16>
    %c9 = arith.constant 9 : index
    %c0_77 = arith.constant 0 : index
    %c0_78 = arith.constant 0 : index
    %57 = vector.load %arg2[%c9, %c0_77, %c0_78] : memref<27x32x128xbf16, #tpu.memory_space<vmem>>, vector<1x32x128xbf16>
    %58 = vector.shape_cast %57 : vector<1x32x128xbf16> to vector<32x128xbf16>
    %cst_79 = arith.constant dense<0.000000e+00> : vector<64x128xf32>
    %59 = tpu.matmul %56, %58, %cst_79 {dimension_numbers = #tpu.dot_dimension_numbers<[1], [0], [0], [1], [0, 0, 1, 1], [], []>} : vector<64x32xbf16>, vector<32x128xbf16>, vector<64x128xf32> -> vector<64x128xf32>
    %60 = arith.addf %54, %59 : vector<64x128xf32>
    %c0_80 = arith.constant 0 : index
    %c0_81 = arith.constant 0 : index
    %c0_82 = arith.constant 0 : index
    %c1_83 = arith.constant 1 : index
    %c0_84 = arith.constant 0 : index
    %61 = vector.load %arg5[%c0_80, %c0_81, %c0_82, %c1_83, %c0_84] : memref<1x1x10x10x32xbf16, #tpu.memory_space<vmem>>, vector<1x1x8x8x32xbf16>
    %62 = vector.shape_cast %61 : vector<1x1x8x8x32xbf16> to vector<64x32xbf16>
    %c10 = arith.constant 10 : index
    %c0_85 = arith.constant 0 : index
    %c0_86 = arith.constant 0 : index
    %63 = vector.load %arg2[%c10, %c0_85, %c0_86] : memref<27x32x128xbf16, #tpu.memory_space<vmem>>, vector<1x32x128xbf16>
    %64 = vector.shape_cast %63 : vector<1x32x128xbf16> to vector<32x128xbf16>
    %cst_87 = arith.constant dense<0.000000e+00> : vector<64x128xf32>
    %65 = tpu.matmul %62, %64, %cst_87 {dimension_numbers = #tpu.dot_dimension_numbers<[1], [0], [0], [1], [0, 0, 1, 1], [], []>} : vector<64x32xbf16>, vector<32x128xbf16>, vector<64x128xf32> -> vector<64x128xf32>
    %66 = arith.addf %60, %65 : vector<64x128xf32>
    %c0_88 = arith.constant 0 : index
    %c0_89 = arith.constant 0 : index
    %c0_90 = arith.constant 0 : index
    %c2_91 = arith.constant 2 : index
    %c0_92 = arith.constant 0 : index
    %67 = vector.load %arg5[%c0_88, %c0_89, %c0_90, %c2_91, %c0_92] : memref<1x1x10x10x32xbf16, #tpu.memory_space<vmem>>, vector<1x1x8x8x32xbf16>
    %68 = vector.shape_cast %67 : vector<1x1x8x8x32xbf16> to vector<64x32xbf16>
    %c11 = arith.constant 11 : index
    %c0_93 = arith.constant 0 : index
    %c0_94 = arith.constant 0 : index
    %69 = vector.load %arg2[%c11, %c0_93, %c0_94] : memref<27x32x128xbf16, #tpu.memory_space<vmem>>, vector<1x32x128xbf16>
    %70 = vector.shape_cast %69 : vector<1x32x128xbf16> to vector<32x128xbf16>
    %cst_95 = arith.constant dense<0.000000e+00> : vector<64x128xf32>
    %71 = tpu.matmul %68, %70, %cst_95 {dimension_numbers = #tpu.dot_dimension_numbers<[1], [0], [0], [1], [0, 0, 1, 1], [], []>} : vector<64x32xbf16>, vector<32x128xbf16>, vector<64x128xf32> -> vector<64x128xf32>
    %72 = arith.addf %66, %71 : vector<64x128xf32>
    %c0_96 = arith.constant 0 : index
    %c0_97 = arith.constant 0 : index
    %c1_98 = arith.constant 1 : index
    %c0_99 = arith.constant 0 : index
    %c0_100 = arith.constant 0 : index
    %73 = vector.load %arg5[%c0_96, %c0_97, %c1_98, %c0_99, %c0_100] : memref<1x1x10x10x32xbf16, #tpu.memory_space<vmem>>, vector<1x1x8x8x32xbf16>
    %74 = vector.shape_cast %73 : vector<1x1x8x8x32xbf16> to vector<64x32xbf16>
    %c12 = arith.constant 12 : index
    %c0_101 = arith.constant 0 : index
    %c0_102 = arith.constant 0 : index
    %75 = vector.load %arg2[%c12, %c0_101, %c0_102] : memref<27x32x128xbf16, #tpu.memory_space<vmem>>, vector<1x32x128xbf16>
    %76 = vector.shape_cast %75 : vector<1x32x128xbf16> to vector<32x128xbf16>
    %cst_103 = arith.constant dense<0.000000e+00> : vector<64x128xf32>
    %77 = tpu.matmul %74, %76, %cst_103 {dimension_numbers = #tpu.dot_dimension_numbers<[1], [0], [0], [1], [0, 0, 1, 1], [], []>} : vector<64x32xbf16>, vector<32x128xbf16>, vector<64x128xf32> -> vector<64x128xf32>
    %78 = arith.addf %72, %77 : vector<64x128xf32>
    %c0_104 = arith.constant 0 : index
    %c0_105 = arith.constant 0 : index
    %c1_106 = arith.constant 1 : index
    %c1_107 = arith.constant 1 : index
    %c0_108 = arith.constant 0 : index
    %79 = vector.load %arg5[%c0_104, %c0_105, %c1_106, %c1_107, %c0_108] : memref<1x1x10x10x32xbf16, #tpu.memory_space<vmem>>, vector<1x1x8x8x32xbf16>
    %80 = vector.shape_cast %79 : vector<1x1x8x8x32xbf16> to vector<64x32xbf16>
    %c13 = arith.constant 13 : index
    %c0_109 = arith.constant 0 : index
    %c0_110 = arith.constant 0 : index
    %81 = vector.load %arg2[%c13, %c0_109, %c0_110] : memref<27x32x128xbf16, #tpu.memory_space<vmem>>, vector<1x32x128xbf16>
    %82 = vector.shape_cast %81 : vector<1x32x128xbf16> to vector<32x128xbf16>
    %cst_111 = arith.constant dense<0.000000e+00> : vector<64x128xf32>
    %83 = tpu.matmul %80, %82, %cst_111 {dimension_numbers = #tpu.dot_dimension_numbers<[1], [0], [0], [1], [0, 0, 1, 1], [], []>} : vector<64x32xbf16>, vector<32x128xbf16>, vector<64x128xf32> -> vector<64x128xf32>
    %84 = arith.addf %78, %83 : vector<64x128xf32>
    %c0_112 = arith.constant 0 : index
    %c0_113 = arith.constant 0 : index
    %c1_114 = arith.constant 1 : index
    %c2_115 = arith.constant 2 : index
    %c0_116 = arith.constant 0 : index
    %85 = vector.load %arg5[%c0_112, %c0_113, %c1_114, %c2_115, %c0_116] : memref<1x1x10x10x32xbf16, #tpu.memory_space<vmem>>, vector<1x1x8x8x32xbf16>
    %86 = vector.shape_cast %85 : vector<1x1x8x8x32xbf16> to vector<64x32xbf16>
    %c14 = arith.constant 14 : index
    %c0_117 = arith.constant 0 : index
    %c0_118 = arith.constant 0 : index
    %87 = vector.load %arg2[%c14, %c0_117, %c0_118] : memref<27x32x128xbf16, #tpu.memory_space<vmem>>, vector<1x32x128xbf16>
    %88 = vector.shape_cast %87 : vector<1x32x128xbf16> to vector<32x128xbf16>
    %cst_119 = arith.constant dense<0.000000e+00> : vector<64x128xf32>
    %89 = tpu.matmul %86, %88, %cst_119 {dimension_numbers = #tpu.dot_dimension_numbers<[1], [0], [0], [1], [0, 0, 1, 1], [], []>} : vector<64x32xbf16>, vector<32x128xbf16>, vector<64x128xf32> -> vector<64x128xf32>
    %90 = arith.addf %84, %89 : vector<64x128xf32>
    %c0_120 = arith.constant 0 : index
    %c0_121 = arith.constant 0 : index
    %c2_122 = arith.constant 2 : index
    %c0_123 = arith.constant 0 : index
    %c0_124 = arith.constant 0 : index
    %91 = vector.load %arg5[%c0_120, %c0_121, %c2_122, %c0_123, %c0_124] : memref<1x1x10x10x32xbf16, #tpu.memory_space<vmem>>, vector<1x1x8x8x32xbf16>
    %92 = vector.shape_cast %91 : vector<1x1x8x8x32xbf16> to vector<64x32xbf16>
    %c15 = arith.constant 15 : index
    %c0_125 = arith.constant 0 : index
    %c0_126 = arith.constant 0 : index
    %93 = vector.load %arg2[%c15, %c0_125, %c0_126] : memref<27x32x128xbf16, #tpu.memory_space<vmem>>, vector<1x32x128xbf16>
    %94 = vector.shape_cast %93 : vector<1x32x128xbf16> to vector<32x128xbf16>
    %cst_127 = arith.constant dense<0.000000e+00> : vector<64x128xf32>
    %95 = tpu.matmul %92, %94, %cst_127 {dimension_numbers = #tpu.dot_dimension_numbers<[1], [0], [0], [1], [0, 0, 1, 1], [], []>} : vector<64x32xbf16>, vector<32x128xbf16>, vector<64x128xf32> -> vector<64x128xf32>
    %96 = arith.addf %90, %95 : vector<64x128xf32>
    %c0_128 = arith.constant 0 : index
    %c0_129 = arith.constant 0 : index
    %c2_130 = arith.constant 2 : index
    %c1_131 = arith.constant 1 : index
    %c0_132 = arith.constant 0 : index
    %97 = vector.load %arg5[%c0_128, %c0_129, %c2_130, %c1_131, %c0_132] : memref<1x1x10x10x32xbf16, #tpu.memory_space<vmem>>, vector<1x1x8x8x32xbf16>
    %98 = vector.shape_cast %97 : vector<1x1x8x8x32xbf16> to vector<64x32xbf16>
    %c16 = arith.constant 16 : index
    %c0_133 = arith.constant 0 : index
    %c0_134 = arith.constant 0 : index
    %99 = vector.load %arg2[%c16, %c0_133, %c0_134] : memref<27x32x128xbf16, #tpu.memory_space<vmem>>, vector<1x32x128xbf16>
    %100 = vector.shape_cast %99 : vector<1x32x128xbf16> to vector<32x128xbf16>
    %cst_135 = arith.constant dense<0.000000e+00> : vector<64x128xf32>
    %101 = tpu.matmul %98, %100, %cst_135 {dimension_numbers = #tpu.dot_dimension_numbers<[1], [0], [0], [1], [0, 0, 1, 1], [], []>} : vector<64x32xbf16>, vector<32x128xbf16>, vector<64x128xf32> -> vector<64x128xf32>
    %102 = arith.addf %96, %101 : vector<64x128xf32>
    %c0_136 = arith.constant 0 : index
    %c0_137 = arith.constant 0 : index
    %c2_138 = arith.constant 2 : index
    %c2_139 = arith.constant 2 : index
    %c0_140 = arith.constant 0 : index
    %103 = vector.load %arg5[%c0_136, %c0_137, %c2_138, %c2_139, %c0_140] : memref<1x1x10x10x32xbf16, #tpu.memory_space<vmem>>, vector<1x1x8x8x32xbf16>
    %104 = vector.shape_cast %103 : vector<1x1x8x8x32xbf16> to vector<64x32xbf16>
    %c17 = arith.constant 17 : index
    %c0_141 = arith.constant 0 : index
    %c0_142 = arith.constant 0 : index
    %105 = vector.load %arg2[%c17, %c0_141, %c0_142] : memref<27x32x128xbf16, #tpu.memory_space<vmem>>, vector<1x32x128xbf16>
    %106 = vector.shape_cast %105 : vector<1x32x128xbf16> to vector<32x128xbf16>
    %cst_143 = arith.constant dense<0.000000e+00> : vector<64x128xf32>
    %107 = tpu.matmul %104, %106, %cst_143 {dimension_numbers = #tpu.dot_dimension_numbers<[1], [0], [0], [1], [0, 0, 1, 1], [], []>} : vector<64x32xbf16>, vector<32x128xbf16>, vector<64x128xf32> -> vector<64x128xf32>
    %108 = arith.addf %102, %107 : vector<64x128xf32>
    %c0_144 = arith.constant 0 : index
    %c0_145 = arith.constant 0 : index
    %c0_146 = arith.constant 0 : index
    %c0_147 = arith.constant 0 : index
    %c0_148 = arith.constant 0 : index
    %109 = vector.load %arg6[%c0_144, %c0_145, %c0_146, %c0_147, %c0_148] : memref<1x1x10x10x32xbf16, #tpu.memory_space<vmem>>, vector<1x1x8x8x32xbf16>
    %110 = vector.shape_cast %109 : vector<1x1x8x8x32xbf16> to vector<64x32xbf16>
    %c18 = arith.constant 18 : index
    %c0_149 = arith.constant 0 : index
    %c0_150 = arith.constant 0 : index
    %111 = vector.load %arg2[%c18, %c0_149, %c0_150] : memref<27x32x128xbf16, #tpu.memory_space<vmem>>, vector<1x32x128xbf16>
    %112 = vector.shape_cast %111 : vector<1x32x128xbf16> to vector<32x128xbf16>
    %cst_151 = arith.constant dense<0.000000e+00> : vector<64x128xf32>
    %113 = tpu.matmul %110, %112, %cst_151 {dimension_numbers = #tpu.dot_dimension_numbers<[1], [0], [0], [1], [0, 0, 1, 1], [], []>} : vector<64x32xbf16>, vector<32x128xbf16>, vector<64x128xf32> -> vector<64x128xf32>
    %114 = arith.addf %108, %113 : vector<64x128xf32>
    %c0_152 = arith.constant 0 : index
    %c0_153 = arith.constant 0 : index
    %c0_154 = arith.constant 0 : index
    %c1_155 = arith.constant 1 : index
    %c0_156 = arith.constant 0 : index
    %115 = vector.load %arg6[%c0_152, %c0_153, %c0_154, %c1_155, %c0_156] : memref<1x1x10x10x32xbf16, #tpu.memory_space<vmem>>, vector<1x1x8x8x32xbf16>
    %116 = vector.shape_cast %115 : vector<1x1x8x8x32xbf16> to vector<64x32xbf16>
    %c19 = arith.constant 19 : index
    %c0_157 = arith.constant 0 : index
    %c0_158 = arith.constant 0 : index
    %117 = vector.load %arg2[%c19, %c0_157, %c0_158] : memref<27x32x128xbf16, #tpu.memory_space<vmem>>, vector<1x32x128xbf16>
    %118 = vector.shape_cast %117 : vector<1x32x128xbf16> to vector<32x128xbf16>
    %cst_159 = arith.constant dense<0.000000e+00> : vector<64x128xf32>
    %119 = tpu.matmul %116, %118, %cst_159 {dimension_numbers = #tpu.dot_dimension_numbers<[1], [0], [0], [1], [0, 0, 1, 1], [], []>} : vector<64x32xbf16>, vector<32x128xbf16>, vector<64x128xf32> -> vector<64x128xf32>
    %120 = arith.addf %114, %119 : vector<64x128xf32>
    %c0_160 = arith.constant 0 : index
    %c0_161 = arith.constant 0 : index
    %c0_162 = arith.constant 0 : index
    %c2_163 = arith.constant 2 : index
    %c0_164 = arith.constant 0 : index
    %121 = vector.load %arg6[%c0_160, %c0_161, %c0_162, %c2_163, %c0_164] : memref<1x1x10x10x32xbf16, #tpu.memory_space<vmem>>, vector<1x1x8x8x32xbf16>
    %122 = vector.shape_cast %121 : vector<1x1x8x8x32xbf16> to vector<64x32xbf16>
    %c20 = arith.constant 20 : index
    %c0_165 = arith.constant 0 : index
    %c0_166 = arith.constant 0 : index
    %123 = vector.load %arg2[%c20, %c0_165, %c0_166] : memref<27x32x128xbf16, #tpu.memory_space<vmem>>, vector<1x32x128xbf16>
    %124 = vector.shape_cast %123 : vector<1x32x128xbf16> to vector<32x128xbf16>
    %cst_167 = arith.constant dense<0.000000e+00> : vector<64x128xf32>
    %125 = tpu.matmul %122, %124, %cst_167 {dimension_numbers = #tpu.dot_dimension_numbers<[1], [0], [0], [1], [0, 0, 1, 1], [], []>} : vector<64x32xbf16>, vector<32x128xbf16>, vector<64x128xf32> -> vector<64x128xf32>
    %126 = arith.addf %120, %125 : vector<64x128xf32>
    %c0_168 = arith.constant 0 : index
    %c0_169 = arith.constant 0 : index
    %c1_170 = arith.constant 1 : index
    %c0_171 = arith.constant 0 : index
    %c0_172 = arith.constant 0 : index
    %127 = vector.load %arg6[%c0_168, %c0_169, %c1_170, %c0_171, %c0_172] : memref<1x1x10x10x32xbf16, #tpu.memory_space<vmem>>, vector<1x1x8x8x32xbf16>
    %128 = vector.shape_cast %127 : vector<1x1x8x8x32xbf16> to vector<64x32xbf16>
    %c21 = arith.constant 21 : index
    %c0_173 = arith.constant 0 : index
    %c0_174 = arith.constant 0 : index
    %129 = vector.load %arg2[%c21, %c0_173, %c0_174] : memref<27x32x128xbf16, #tpu.memory_space<vmem>>, vector<1x32x128xbf16>
    %130 = vector.shape_cast %129 : vector<1x32x128xbf16> to vector<32x128xbf16>
    %cst_175 = arith.constant dense<0.000000e+00> : vector<64x128xf32>
    %131 = tpu.matmul %128, %130, %cst_175 {dimension_numbers = #tpu.dot_dimension_numbers<[1], [0], [0], [1], [0, 0, 1, 1], [], []>} : vector<64x32xbf16>, vector<32x128xbf16>, vector<64x128xf32> -> vector<64x128xf32>
    %132 = arith.addf %126, %131 : vector<64x128xf32>
    %c0_176 = arith.constant 0 : index
    %c0_177 = arith.constant 0 : index
    %c1_178 = arith.constant 1 : index
    %c1_179 = arith.constant 1 : index
    %c0_180 = arith.constant 0 : index
    %133 = vector.load %arg6[%c0_176, %c0_177, %c1_178, %c1_179, %c0_180] : memref<1x1x10x10x32xbf16, #tpu.memory_space<vmem>>, vector<1x1x8x8x32xbf16>
    %134 = vector.shape_cast %133 : vector<1x1x8x8x32xbf16> to vector<64x32xbf16>
    %c22 = arith.constant 22 : index
    %c0_181 = arith.constant 0 : index
    %c0_182 = arith.constant 0 : index
    %135 = vector.load %arg2[%c22, %c0_181, %c0_182] : memref<27x32x128xbf16, #tpu.memory_space<vmem>>, vector<1x32x128xbf16>
    %136 = vector.shape_cast %135 : vector<1x32x128xbf16> to vector<32x128xbf16>
    %cst_183 = arith.constant dense<0.000000e+00> : vector<64x128xf32>
    %137 = tpu.matmul %134, %136, %cst_183 {dimension_numbers = #tpu.dot_dimension_numbers<[1], [0], [0], [1], [0, 0, 1, 1], [], []>} : vector<64x32xbf16>, vector<32x128xbf16>, vector<64x128xf32> -> vector<64x128xf32>
    %138 = arith.addf %132, %137 : vector<64x128xf32>
    %c0_184 = arith.constant 0 : index
    %c0_185 = arith.constant 0 : index
    %c1_186 = arith.constant 1 : index
    %c2_187 = arith.constant 2 : index
    %c0_188 = arith.constant 0 : index
    %139 = vector.load %arg6[%c0_184, %c0_185, %c1_186, %c2_187, %c0_188] : memref<1x1x10x10x32xbf16, #tpu.memory_space<vmem>>, vector<1x1x8x8x32xbf16>
    %140 = vector.shape_cast %139 : vector<1x1x8x8x32xbf16> to vector<64x32xbf16>
    %c23 = arith.constant 23 : index
    %c0_189 = arith.constant 0 : index
    %c0_190 = arith.constant 0 : index
    %141 = vector.load %arg2[%c23, %c0_189, %c0_190] : memref<27x32x128xbf16, #tpu.memory_space<vmem>>, vector<1x32x128xbf16>
    %142 = vector.shape_cast %141 : vector<1x32x128xbf16> to vector<32x128xbf16>
    %cst_191 = arith.constant dense<0.000000e+00> : vector<64x128xf32>
    %143 = tpu.matmul %140, %142, %cst_191 {dimension_numbers = #tpu.dot_dimension_numbers<[1], [0], [0], [1], [0, 0, 1, 1], [], []>} : vector<64x32xbf16>, vector<32x128xbf16>, vector<64x128xf32> -> vector<64x128xf32>
    %144 = arith.addf %138, %143 : vector<64x128xf32>
    %c0_192 = arith.constant 0 : index
    %c0_193 = arith.constant 0 : index
    %c2_194 = arith.constant 2 : index
    %c0_195 = arith.constant 0 : index
    %c0_196 = arith.constant 0 : index
    %145 = vector.load %arg6[%c0_192, %c0_193, %c2_194, %c0_195, %c0_196] : memref<1x1x10x10x32xbf16, #tpu.memory_space<vmem>>, vector<1x1x8x8x32xbf16>
    %146 = vector.shape_cast %145 : vector<1x1x8x8x32xbf16> to vector<64x32xbf16>
    %c24 = arith.constant 24 : index
    %c0_197 = arith.constant 0 : index
    %c0_198 = arith.constant 0 : index
    %147 = vector.load %arg2[%c24, %c0_197, %c0_198] : memref<27x32x128xbf16, #tpu.memory_space<vmem>>, vector<1x32x128xbf16>
    %148 = vector.shape_cast %147 : vector<1x32x128xbf16> to vector<32x128xbf16>
    %cst_199 = arith.constant dense<0.000000e+00> : vector<64x128xf32>
    %149 = tpu.matmul %146, %148, %cst_199 {dimension_numbers = #tpu.dot_dimension_numbers<[1], [0], [0], [1], [0, 0, 1, 1], [], []>} : vector<64x32xbf16>, vector<32x128xbf16>, vector<64x128xf32> -> vector<64x128xf32>
    %150 = arith.addf %144, %149 : vector<64x128xf32>
    %c0_200 = arith.constant 0 : index
    %c0_201 = arith.constant 0 : index
    %c2_202 = arith.constant 2 : index
    %c1_203 = arith.constant 1 : index
    %c0_204 = arith.constant 0 : index
    %151 = vector.load %arg6[%c0_200, %c0_201, %c2_202, %c1_203, %c0_204] : memref<1x1x10x10x32xbf16, #tpu.memory_space<vmem>>, vector<1x1x8x8x32xbf16>
    %152 = vector.shape_cast %151 : vector<1x1x8x8x32xbf16> to vector<64x32xbf16>
    %c25 = arith.constant 25 : index
    %c0_205 = arith.constant 0 : index
    %c0_206 = arith.constant 0 : index
    %153 = vector.load %arg2[%c25, %c0_205, %c0_206] : memref<27x32x128xbf16, #tpu.memory_space<vmem>>, vector<1x32x128xbf16>
    %154 = vector.shape_cast %153 : vector<1x32x128xbf16> to vector<32x128xbf16>
    %cst_207 = arith.constant dense<0.000000e+00> : vector<64x128xf32>
    %155 = tpu.matmul %152, %154, %cst_207 {dimension_numbers = #tpu.dot_dimension_numbers<[1], [0], [0], [1], [0, 0, 1, 1], [], []>} : vector<64x32xbf16>, vector<32x128xbf16>, vector<64x128xf32> -> vector<64x128xf32>
    %156 = arith.addf %150, %155 : vector<64x128xf32>
    %c0_208 = arith.constant 0 : index
    %c0_209 = arith.constant 0 : index
    %c2_210 = arith.constant 2 : index
    %c2_211 = arith.constant 2 : index
    %c0_212 = arith.constant 0 : index
    %157 = vector.load %arg6[%c0_208, %c0_209, %c2_210, %c2_211, %c0_212] : memref<1x1x10x10x32xbf16, #tpu.memory_space<vmem>>, vector<1x1x8x8x32xbf16>
    %158 = vector.shape_cast %157 : vector<1x1x8x8x32xbf16> to vector<64x32xbf16>
    %c26 = arith.constant 26 : index
    %c0_213 = arith.constant 0 : index
    %c0_214 = arith.constant 0 : index
    %159 = vector.load %arg2[%c26, %c0_213, %c0_214] : memref<27x32x128xbf16, #tpu.memory_space<vmem>>, vector<1x32x128xbf16>
    %160 = vector.shape_cast %159 : vector<1x32x128xbf16> to vector<32x128xbf16>
    %cst_215 = arith.constant dense<0.000000e+00> : vector<64x128xf32>
    %161 = tpu.matmul %158, %160, %cst_215 {dimension_numbers = #tpu.dot_dimension_numbers<[1], [0], [0], [1], [0, 0, 1, 1], [], []>} : vector<64x32xbf16>, vector<32x128xbf16>, vector<64x128xf32> -> vector<64x128xf32>
    %162 = arith.addf %156, %161 : vector<64x128xf32>
    %c0_216 = arith.constant 0 : index
    %c0_217 = arith.constant 0 : index
    %163 = vector.load %arg3[%c0_216, %c0_217] : memref<1x128xf32, #tpu.memory_space<vmem>>, vector<1x128xf32>
    %164 = vector.broadcast %163 : vector<1x128xf32> to vector<64x128xf32>
    %165 = arith.addf %162, %164 : vector<64x128xf32>
    %166 = vector.shape_cast %165 : vector<64x128xf32> to vector<1x1x8x8x128xf32>
    %167 = arith.truncf %166 : vector<1x1x8x8x128xf32> to vector<1x1x8x8x128xbf16>
    %c0_218 = arith.constant 0 : index
    %c0_219 = arith.constant 0 : index
    %c0_220 = arith.constant 0 : index
    %c0_221 = arith.constant 0 : index
    %c0_222 = arith.constant 0 : index
    %168 = vector.load %arg7[%c0_218, %c0_219, %c0_220, %c0_221, %c0_222] : memref<1x1x8x8x128xbf16, #tpu.memory_space<vmem>>, vector<1x1x8x8x128xbf16>
    tpu.vector_store %arg7[%c0_218, %c0_219, %c0_220, %c0_221, %c0_222], %167 {strides = array<i32>} : memref<1x1x8x8x128xbf16, #tpu.memory_space<vmem>>, vector<1x1x8x8x128xbf16>,
    return
  }
  func.func @transform_0(%arg0: i32, %arg1: i32) -> (i32, i32, i32) {
    %c0_i32 = arith.constant 0 : i32
    %c0_i32_0 = arith.constant 0 : i32
    %c0_i32_1 = arith.constant 0 : i32
    %c0_i32_2 = arith.constant 0 : i32
    return %c0_i32, %c0_i32_0, %c0_i32_1 : i32, i32, i32
  }
  func.func @transform_1(%arg0: i32, %arg1: i32) -> (i32, i32) {
    %c0_i32 = arith.constant 0 : i32
    %c0_i32_0 = arith.constant 0 : i32
    %c0_i32_1 = arith.constant 0 : i32
    return %c0_i32, %c0_i32_0 : i32, i32
  }
  func.func @transform_2(%arg0: i32, %arg1: i32) -> (i32, i32, i32, i32, i32) {
    %c0_i32 = arith.constant 0 : i32
    %0 = arith.addi %arg1, %c0_i32 : i32
    %c0_i32_0 = arith.constant 0 : i32
    %c0_i32_1 = arith.constant 0 : i32
    %c0_i32_2 = arith.constant 0 : i32
    %c0_i32_3 = arith.constant 0 : i32
    return %arg0, %0, %c0_i32_0, %c0_i32_1, %c0_i32_2 : i32, i32, i32, i32, i32
  }
  func.func @transform_3(%arg0: i32, %arg1: i32) -> (i32, i32, i32, i32, i32) {
    %c1_i32 = arith.constant 1 : i32
    %0 = arith.addi %arg1, %c1_i32 : i32
    %c0_i32 = arith.constant 0 : i32
    %c0_i32_0 = arith.constant 0 : i32
    %c0_i32_1 = arith.constant 0 : i32
    %c0_i32_2 = arith.constant 0 : i32
    return %arg0, %0, %c0_i32, %c0_i32_0, %c0_i32_1 : i32, i32, i32, i32, i32
  }
  func.func @transform_4(%arg0: i32, %arg1: i32) -> (i32, i32, i32, i32, i32) {
    %c2_i32 = arith.constant 2 : i32
    %0 = arith.addi %arg1, %c2_i32 : i32
    %c0_i32 = arith.constant 0 : i32
    %c0_i32_0 = arith.constant 0 : i32
    %c0_i32_1 = arith.constant 0 : i32
    %c0_i32_2 = arith.constant 0 : i32
    return %arg0, %0, %c0_i32, %c0_i32_0, %c0_i32_1 : i32, i32, i32, i32, i32
  }
  func.func @transform_5(%arg0: i32, %arg1: i32) -> (i32, i32, i32, i32, i32) {
    %c0_i32 = arith.constant 0 : i32
    %c0_i32_0 = arith.constant 0 : i32
    %c0_i32_1 = arith.constant 0 : i32
    %c0_i32_2 = arith.constant 0 : i32
    return %arg0, %arg1, %c0_i32, %c0_i32_0, %c0_i32_1 : i32, i32, i32, i32, i32
  }
}

</mosaic_0001>

<bundles_post_ra>
// kernel: volume_processor_block.2
= control target key start
LH: loop header
LB: loop body
LE: loop exit
PB: predicated region body
PF: predicated region fallthrough
CT: control target
= control target key end

     0   :  { %s729_s12 = smov 0   ;;  %s985_s0 = inlined_call_operand.vmem [shape: f32[32,1024], index: 0, kind: input, shape index: {}]   ;;  %s986_s1 = inlined_call_operand.vmem [shape: f32[16,1024], index: 1, kind: input, shape index: {}]   ;;  %s987_s2 = inlined_call_operand.vmem [shape: f32[16,1024], index: 2, kind: input, shape index: {}]   ;;  %s988_s3 = inlined_call_operand.vmem [shape: bf16[32,1024], index: 3, kind: output, shape index: {}]  }
   0x1 LB: > { %s578_s13 = sadd.s32 4294967295, %s707_s12   ;;  %p582_p0 = scmp.ge.s32.totalorder %s707_s12, 1  ;;  %s707_s12 = sphi %s729_s12, %s13_s12  }
   0x2   : > { %p139_p1 = scmp.lt.s32.totalorder %s707_s12, 3 }
   0x4   : > { %p140_p2 = pnand %p582_p0, %p139_p1 }
   0x5   : > { %s583_s14 = sshll.u32 (!%p140_p2), %s578_s13, 1 }
   0x6   : > { %143 = sbr.rel (%p140_p2) target bundleno = 412 (0x19c), region = 32  ;;  %p166_p3 = scmp.lt.s32.totalorder (!%p140_p2), %s583_s14, 3 }
   0xd   : > { %s990_s14 = smov (!%p166_p3, %s583_s14), 3 }
   0xe   : > { %s615_s15 = sshll.u32 %s990_s14, 6  ;;  %s616_s6 = sshll.u32 %s990_s14, 5 }
   0xf   : > { %s170_s18 = scalar_lea.vmem %s985_s0, %s615_s15  ;;  %s958_s9 = scalar_lea.vmem %s988_s3, %s616_s6 }
  0x10   : > { %v179_v0 = vld [vmem:[%s170_s18] sm:$0xff]  ;;  %v180_v1 = vld [vmem:[%s170_s18 + $0x8] sm:$0xff]  ;;  %v181_v2 = vld [vmem:[%s170_s18 + $0x10] sm:$0xff] }
  0x11   : > { %v195_v3 = vadd.f32 %v180_v1, %v179_v0  ;;  %v182_v4 = vld [vmem:[%s170_s18 + $0x18] sm:$0xff]  ;;  %v187_v5 = vld [vmem:[%s170_s18 + $0x40] sm:$0xff]  ;;  %v188_v7 = vld [vmem:[%s170_s18 + $0x48] sm:$0xff] }
  0x12   : > { %v189_v8 = vld [vmem:[%s170_s18 + $0x50] sm:$0xff]  ;;  %v183_v9 = vld [vmem:[%s170_s18 + $0x20] sm:$0xff]  ;;  %v204_v10 = vadd.f32 %v188_v7, %v187_v5  ;;  %v190_v12 = vld [vmem:[%s170_s18 + $0x58] sm:$0xff] }
  0x13   : > { %v196_v6 = vadd.f32 %v195_v3, %v181_v2  ;;  %v184_v13 = vld [vmem:[%s170_s18 + $0x28] sm:$0xff]  ;;  %v191_v16 = vld [vmem:[%s170_s18 + $0x60] sm:$0xff]  ;;  %v185_v17 = vld [vmem:[%s170_s18 + $0x30] sm:$0xff] }
  0x14   : > { %v205_v14 = vadd.f32 %v204_v10, %v189_v8  ;;  %v192_v20 = vld [vmem:[%s170_s18 + $0x68] sm:$0xff]  ;;  %v186_v21 = vld [vmem:[%s170_s18 + $0x38] sm:$0xff]  ;;  %v193_v24 = vld [vmem:[%s170_s18 + $0x70] sm:$0xff] }
  0x15   : > { %v197_v11 = vadd.f32 %v196_v6, %v182_v4  ;;  %v194_v27 = vld [vmem:[%s170_s18 + $0x78] sm:$0xff] }
  0x16   : > { %v206_v18 = vadd.f32 %v205_v14, %v190_v12 }
  0x17   : > { %v198_v15 = vadd.f32 %v197_v11, %v183_v9 }
  0x18   : > { %v207_v22 = vadd.f32 %v206_v18, %v191_v16 }
  0x19   : > { %v199_v19 = vadd.f32 %v198_v15, %v184_v13 }
  0x1a   : > { %v208_v25 = vadd.f32 %v207_v22, %v192_v20  ;;  %v288_v22 = vld [vmem:[%s986_s1] sm:$0xff] }
  0x1b   : > { %v200_v23 = vadd.f32 %v199_v19, %v185_v17 }
  0x1c   : > { %v209_v28 = vadd.f32 %v208_v25, %v193_v24 }
  0x1d   : > { %v201_v26 = vadd.f32 %v200_v23, %v186_v21  ;;  %v289_v23 = vld [vmem:[%s986_s1 + $0x8] sm:$0xff] }
  0x1e   : > { %v210_v29 = vadd.f32 %v209_v28, %v194_v27  ;;  %v293_v28 = vld [vmem:[%s986_s1 + $0x28] sm:$0xff] }
  0x1f   : > { %202 = vadd.xlane.f32.xlu0 %v201_v26  ;;  %v291_v26 = vld [vmem:[%s986_s1 + $0x18] sm:$0xff] }
  0x23   : > { %211 = vadd.xlane.f32.xlu0 %v210_v29  ;;  %v294_v29 = vld [vmem:[%s986_s1 + $0x30] sm:$0xff] }
  0xac   : > { %v203_v30 = vpop.xlane.xlu0 %202 }
  0xad   : > { %v214_v31 = vmul.f32 0.0009765625, %v203_v30  ;;  %v295_v30 = vld [vmem:[%s986_s1 + $0x38] sm:$0xff] }
  0xaf   : > { %v743_v32 = vsub.f32 %v179_v0, %v214_v31  ;;  %v745_v33 = vsub.f32 %v180_v1, %v214_v31  ;;  %v747_v34 = vsub.f32 %v181_v2, %v214_v31  ;;  %v749_v37 = vsub.f32 %v182_v4, %v214_v31 }
  0xb0   : > { %v212_v35 = vpop.xlane.xlu0 %211  ;;  %v755_v40 = vsub.f32 %v183_v9, %v214_v31  ;;  %v221_v46 = vsub.f32 %v184_v13, %v214_v31  ;;  %v222_v52 = vsub.f32 %v185_v17, %v214_v31  ;;  %v223_v58 = vsub.f32 %v186_v21, %v214_v31  ;;  %v320_v31 = vld [vmem:[%s987_s2] sm:$0xff] }
  0xb1   : > { %v215_v36 = vmul.f32 0.0009765625, %v212_v35  ;;  %v232_v38 = vmul.f32 %v743_v32, %v743_v32  ;;  %v233_v39 = vmul.f32 %v745_v33, %v745_v33  ;;  %v234_v41 = vmul.f32 %v747_v34, %v747_v34 }
  0xb2   : > { %v235_v47 = vmul.f32 %v749_v37, %v749_v37  ;;  %v236_v53 = vmul.f32 %v755_v40, %v755_v40  ;;  %v237_v59 = vmul.f32 %v221_v46, %v221_v46  ;;  %v238_v0 = vmul.f32 %v222_v52, %v222_v52 }
  0xb3   : > { %v248_v42 = vadd.f32 %v233_v39, %v232_v38  ;;  %v759_v43 = vsub.f32 %v187_v5, %v215_v36  ;;  %v761_v44 = vsub.f32 %v188_v7, %v215_v36  ;;  %v763_v45 = vsub.f32 %v189_v8, %v215_v36 }
  0xb4   : > { %v769_v50 = vsub.f32 %v190_v12, %v215_v36  ;;  %v775_v55 = vsub.f32 %v191_v16, %v215_v36  ;;  %v779_v61 = vsub.f32 %v192_v20, %v215_v36  ;;  %v783_v2 = vsub.f32 %v193_v24, %v215_v36  ;;  %v290_v24 = vld [vmem:[%s986_s1 + $0x10] sm:$0xff] }
  0xb5   : > { %v249_v48 = vadd.f32 %v248_v42, %v234_v41  ;;  %v240_v49 = vmul.f32 %v759_v43, %v759_v43  ;;  %v241_v51 = vmul.f32 %v761_v44, %v761_v44  ;;  %v242_v56 = vmul.f32 %v763_v45, %v763_v45  ;;  %v321_v41 = vld [vmem:[%s987_s2 + $0x8] sm:$0xff]  ;;  %v322_v42 = vld [vmem:[%s987_s2 + $0x10] sm:$0xff] }
  0xb6   : > { %v243_v62 = vmul.f32 %v769_v50, %v769_v50  ;;  %v244_v3 = vmul.f32 %v775_v55, %v775_v55  ;;  %v239_v5 = vmul.f32 %v223_v58, %v223_v58  ;;  %v787_v7 = vsub.f32 %v194_v27, %v215_v36  ;;  %v292_v27 = vld [vmem:[%s986_s1 + $0x20] sm:$0xff] }
  0xb7   : > { %v250_v54 = vadd.f32 %v249_v48, %v235_v47  ;;  %v257_v57 = vadd.f32 %v241_v51, %v240_v49  ;;  %v245_v8 = vmul.f32 %v779_v61, %v779_v61  ;;  %v246_v11 = vmul.f32 %v783_v2, %v783_v2  ;;  %v323_v47 = vld [vmem:[%s987_s2 + $0x18] sm:$0xff]  ;;  %v326_v51 = vld [vmem:[%s987_s2 + $0x30] sm:$0xff] }
  0xb8   : > { %v247_v13 = vmul.f32 %v787_v7, %v787_v7 }
  0xb9   : > { %v251_v60 = vadd.f32 %v250_v54, %v236_v53  ;;  %v258_v63 = vadd.f32 %v257_v57, %v242_v56 }
  0xbb   : > { %v252_v1 = vadd.f32 %v251_v60, %v237_v59  ;;  %v259_v4 = vadd.f32 %v258_v63, %v243_v62  ;;  %v327_v60 = vld [vmem:[%s987_s2 + $0x38] sm:$0xff] }
  0xbd   : > { %v253_v6 = vadd.f32 %v252_v1, %v238_v0  ;;  %v260_v9 = vadd.f32 %v259_v4, %v244_v3 }
  0xbf   : > { %v254_v10 = vadd.f32 %v253_v6, %v239_v5  ;;  %v261_v12 = vadd.f32 %v260_v9, %v245_v8 }
  0xc1   : > { %255 = vadd.xlane.f32.xlu1 %v254_v10  ;;  %v262_v14 = vadd.f32 %v261_v12, %v246_v11 }
  0xc3   : > { %v263_v15 = vadd.f32 %v262_v14, %v247_v13  ;;  %v296_v13 = vld [vmem:[%s986_s1 + $0x40] sm:$0xff] }
  0xc5   : > { %264 = vadd.xlane.f32.xlu1 %v263_v15 }
 0x14e   : > { %v256_v16 = vpop.xlane.xlu1 %255 }
 0x14f   : > { %v266_v17 = vmul.f32 0.0009765625, %v256_v16  ;;  %v297_v16 = vld [vmem:[%s986_s1 + $0x48] sm:$0xff] }
 0x151   : > { %v268_v18 = vadd.f32 1e-05, %v266_v17 }
 0x152   : > { %v265_v19 = vpop.xlane.xlu1 %264 }
 0x153   : > { %633 = vrsqrt.f32 %v268_v18  ;;  %v267_v20 = vmul.f32 0.0009765625, %v265_v19 }
 0x155   : > { %v269_v21 = vadd.f32 1e-05, %v267_v20  ;;  %v329_v20 = vld [vmem:[%s987_s2 + $0x48] sm:$0xff] }
 0x157   : > { %635 = vrsqrt.f32 %v269_v21 }
 0x15d   : > { %v634_v25 = vpop.eup %633 }
 0x15e   : > { %v272_v35 = vmul.f32 %v634_v25, %v743_v32  ;;  %v273_v36 = vmul.f32 %v634_v25, %v745_v33  ;;  %v274_v38 = vmul.f32 %v634_v25, %v747_v34  ;;  %v275_v39 = vmul.f32 %v634_v25, %v749_v37  ;;  %v324_v34 = vld [vmem:[%s987_s2 + $0x20] sm:$0xff]  ;;  %v325_v37 = vld [vmem:[%s987_s2 + $0x28] sm:$0xff] }
 0x15f   : > { %v276_v32 = vmul.f32 %v634_v25, %v755_v40  ;;  %v277_v48 = vmul.f32 %v634_v25, %v221_v46  ;;  %v278_v33 = vmul.f32 %v634_v25, %v222_v52  ;;  %v279_v49 = vmul.f32 %v634_v25, %v223_v58 }
 0x160   : > { %v304_v53 = vmul.f32 %v288_v22, %v272_v35  ;;  %v305_v54 = vmul.f32 %v289_v23, %v273_v36  ;;  %v306_v56 = vmul.f32 %v290_v24, %v274_v38  ;;  %v307_v57 = vmul.f32 %v291_v26, %v275_v39 }
 0x161   : > { %v308_v40 = vmul.f32 %v292_v27, %v276_v32  ;;  %v309_v46 = vmul.f32 %v293_v28, %v277_v48  ;;  %v310_v52 = vmul.f32 %v294_v29, %v278_v33  ;;  %v311_v58 = vmul.f32 %v295_v30, %v279_v49  ;;  %v636_v59 = vpop.eup %635  ;;  %v299_v28 = vld [vmem:[%s986_s1 + $0x58] sm:$0xff] }
 0x162   : > { %v848_v62 = vadd.f32 %v320_v31, %v304_v53  ;;  %v850_v63 = vadd.f32 %v321_v41, %v305_v54  ;;  %v852_v0 = vadd.f32 %v322_v42, %v306_v56  ;;  %v854_v1 = vadd.f32 %v323_v47, %v307_v57  ;;  %v300_v31 = vld [vmem:[%s986_s1 + $0x60] sm:$0xff]  ;;  %v302_v41 = vld [vmem:[%s986_s1 + $0x70] sm:$0xff]  ;;  %v333_v53 = vld [vmem:[%s987_s2 + $0x68] sm:$0xff] }
 0x163   : > { %v856_v3 = vadd.f32 %v324_v34, %v308_v40  ;;  %v858_v4 = vadd.f32 %v325_v37, %v309_v46  ;;  %v860_v5 = vadd.f32 %v326_v51, %v310_v52  ;;  %v280_v10 = vmul.f32 %v636_v59, %v759_v43  ;;  %v298_v43 = vld [vmem:[%s986_s1 + $0x50] sm:$0xff]  ;;  %v332_v34 = vld [vmem:[%s987_s2 + $0x60] sm:$0xff] }
 0x164   : > { %v589_v6 = vmul.f32 -1.442695, %v848_v62  ;;  %v590_v8 = vmul.f32 -1.442695, %v850_v63  ;;  %v591_v9 = vmul.f32 -1.442695, %v852_v0  ;;  %v866_v11 = vadd.f32 %v327_v60, %v311_v58 }
 0x165   : > { %v592_v12 = vmul.f32 -1.442695, %v854_v1  ;;  %v281_v14 = vmul.f32 %v636_v59, %v761_v44  ;;  %v593_v15 = vmul.f32 -1.442695, %v856_v3  ;;  %v282_v17 = vmul.f32 %v636_v59, %v763_v45  ;;  %v328_v44 = vld [vmem:[%s987_s2 + $0x40] sm:$0xff]  ;;  %v330_v45 = vld [vmem:[%s987_s2 + $0x50] sm:$0xff] }
 0x166   : > { %637 = vpow2.f32 %v589_v6  ;;  %v594_v18 = vmul.f32 -1.442695, %v858_v4  ;;  %v595_v19 = vmul.f32 -1.442695, %v860_v5  ;;  %v312_v21 = vmul.f32 %v296_v13, %v280_v10  ;;  %v334_v40 = vld [vmem:[%s987_s2 + $0x70] sm:$0xff]  ;;  %v335_v60 = vld [vmem:[%s987_s2 + $0x78] sm:$0xff] }
 0x167   : > { %639 = vpow2.f32 %v590_v8  ;;  %v596_v22 = vmul.f32 -1.442695, %v866_v11  ;;  %v313_v23 = vmul.f32 %v297_v16, %v281_v14  ;;  %v314_v24 = vmul.f32 %v298_v43, %v282_v17 }
 0x168   : > { %641 = vpow2.f32 %v591_v9  ;;  %v283_v25 = vmul.f32 %v636_v59, %v769_v50  ;;  %v894_v26 = vadd.f32 %v328_v44, %v312_v21  ;;  %v284_v29 = vmul.f32 %v636_v59, %v775_v55  ;;  %v301_v50 = vld [vmem:[%s986_s1 + $0x68] sm:$0xff] }
 0x169   : > { %643 = vpow2.f32 %v592_v12  ;;  %v896_v27 = vadd.f32 %v329_v20, %v313_v23  ;;  %v902_v30 = vadd.f32 %v330_v45, %v314_v24  ;;  %v285_v35 = vmul.f32 %v636_v59, %v779_v61  ;;  %v303_v61 = vld [vmem:[%s986_s1 + $0x78] sm:$0xff] }
 0x16a   : > { %645 = vpow2.f32 %v593_v15  ;;  %v286_v36 = vmul.f32 %v636_v59, %v783_v2  ;;  %v597_v38 = vmul.f32 -1.442695, %v894_v26  ;;  %v287_v42 = vmul.f32 %v636_v59, %v787_v7  ;;  %v331_v2 = vld [vmem:[%s987_s2 + $0x58] sm:$0xff] }
 0x16b   : > { %647 = vpow2.f32 %v594_v18  ;;  %v598_v39 = vmul.f32 -1.442695, %v896_v27  ;;  %v599_v55 = vmul.f32 -1.442695, %v902_v30  ;;  %v315_v47 = vmul.f32 %v299_v28, %v283_v25 }
 0x16c   : > { %649 = vpow2.f32 %v595_v19  ;;  %v316_v48 = vmul.f32 %v300_v31, %v284_v29  ;;  %v317_v37 = vmul.f32 %v301_v50, %v285_v35  ;;  %v318_v54 = vmul.f32 %v302_v41, %v286_v36 }
 0x16d   : > { %651 = vpow2.f32 %v596_v22  ;;  %v319_v46 = vmul.f32 %v303_v61, %v287_v42  ;;  %v934_v52 = vadd.f32 %v331_v2, %v315_v47 }
 0x16e   : > { %653 = vpow2.f32 %v597_v38  ;;  %v939_v6 = vadd.f32 %v332_v34, %v316_v48  ;;  %v941_v10 = vadd.f32 %v333_v53, %v317_v37  ;;  %v943_v14 = vadd.f32 %v334_v40, %v318_v54 }
 0x16f   : > { %655 = vpow2.f32 %v598_v39  ;;  %v945_v43 = vadd.f32 %v335_v60, %v319_v46  ;;  %v600_v17 = vmul.f32 -1.442695, %v934_v52 }
 0x170   : > { %v638_v32 = vpop.eup %637  ;;  %657 = vpow2.f32 %v599_v55  ;;  %v601_v19 = vmul.f32 -1.442695, %v939_v6  ;;  %v602_v44 = vmul.f32 -1.442695, %v941_v10  ;;  %v603_v21 = vmul.f32 -1.442695, %v943_v14 }
 0x171   : > { %v640_v33 = vpop.eup %639  ;;  %v400_v49 = vadd.f32 1.0, %v638_v32  ;;  %v604_v45 = vmul.f32 -1.442695, %v945_v43 }
 0x172   : > { %v642_v7 = vpop.eup %641  ;;  %v401_v51 = vadd.f32 1.0, %v640_v33 }
 0x173   : > { %v644_v56 = vpop.eup %643  ;;  %v402_v57 = vadd.f32 1.0, %v642_v7  ;;  %659 = vrcp.f32 %v400_v49 }
 0x174   : > { %v646_v58 = vpop.eup %645  ;;  %v403_v59 = vadd.f32 1.0, %v644_v56  ;;  %661 = vrcp.f32 %v401_v51 }
 0x175   : > { %v648_v8 = vpop.eup %647  ;;  %v404_v9 = vadd.f32 1.0, %v646_v58  ;;  %663 = vrcp.f32 %v402_v57 }
 0x176   : > { %v650_v12 = vpop.eup %649  ;;  %v405_v13 = vadd.f32 1.0, %v648_v8  ;;  %665 = vrcp.f32 %v403_v59 }
 0x177   : > { %v652_v15 = vpop.eup %651  ;;  %v406_v16 = vadd.f32 1.0, %v650_v12  ;;  %667 = vrcp.f32 %v404_v9 }
 0x178   : > { %v407_v18 = vadd.f32 1.0, %v652_v15  ;;  %669 = vrcp.f32 %v405_v13  ;;  %v654_v20 = vpop.eup %653 }
 0x179   : > { %671 = vrcp.f32 %v406_v16  ;;  %v656_v22 = vpop.eup %655  ;;  %v408_v24 = vadd.f32 1.0, %v654_v20 }
 0x17a   : > { %673 = vrcp.f32 %v407_v18  ;;  %v658_v23 = vpop.eup %657  ;;  %v409_v28 = vadd.f32 1.0, %v656_v22 }
 0x17b   : > { %675 = vpow2.f32 %v600_v17  ;;  %v410_v39 = vadd.f32 1.0, %v658_v23 }
 0x17c   : > { %677 = vpow2.f32 %v601_v19 }
 0x17d   : > { %v660_v25 = vpop.eup %659  ;;  %679 = vpow2.f32 %v602_v44 }
 0x17e   : > { %v662_v29 = vpop.eup %661  ;;  %v448_v31 = vmul.f32 %v660_v25, %v848_v62  ;;  %681 = vpow2.f32 %v603_v21 }
 0x17f   : > { %v664_v50 = vpop.eup %663  ;;  %v449_v35 = vmul.f32 %v662_v29, %v850_v63  ;;  %683 = vpow2.f32 %v604_v45 }
 0x180   : > { %v666_v36 = vpop.eup %665  ;;  %v450_v38 = vmul.f32 %v664_v50, %v852_v0  ;;  %685 = vrcp.f32 %v408_v24 }
 0x181   : > { %v668_v55 = vpop.eup %667  ;;  %v451_v62 = vmul.f32 %v666_v36, %v854_v1  ;;  %v617_v41 = vpack.c.bf16 %v449_v35, %v448_v31  ;;  %687 = vrcp.f32 %v409_v28 }
 0x182   : > { %v670_v42 = vpop.eup %669  ;;  %v452_v63 = vmul.f32 %v668_v55, %v856_v3  ;;  %689 = vrcp.f32 %v410_v39 }
 0x183   : > { %v672_v47 = vpop.eup %671  ;;  %v453_v32 = vmul.f32 %v670_v42, %v858_v4  ;;  %v618_v61 = vpack.c.bf16 %v451_v62, %v450_v38  ;;  %512 = vst [vmem:[%s958_s9] sm:$0xff] %v617_v41 }
 0x184   : > { %v674_v2 = vpop.eup %673  ;;  %v454_v0 = vmul.f32 %v672_v47, %v860_v5 }
 0x185   : > { %v676_v48 = vpop.eup %675  ;;  %v455_v33 = vmul.f32 %v674_v2, %v866_v11  ;;  %v619_v1 = vpack.c.bf16 %v453_v32, %v452_v63  ;;  %513 = vst [vmem:[%s958_s9 + $0x8] sm:$0xff] %v618_v61 }
 0x186   : > { %v678_v49 = vpop.eup %677  ;;  %v411_v34 = vadd.f32 1.0, %v676_v48 }
 0x187   : > { %v680_v37 = vpop.eup %679  ;;  %v620_v3 = vpack.c.bf16 %v455_v33, %v454_v0  ;;  %514 = vst [vmem:[%s958_s9 + $0x10] sm:$0xff] %v619_v1  ;;  %v412_v7 = vadd.f32 1.0, %v678_v49 }
 0x188   : > { %v682_v51 = vpop.eup %681  ;;  %v413_v4 = vadd.f32 1.0, %v680_v37  ;;  %691 = vrcp.f32 %v411_v34 }
 0x189   : > { %v684_v53 = vpop.eup %683  ;;  %515 = vst [vmem:[%s958_s9 + $0x18] sm:$0xff] %v620_v3  ;;  %v414_v5 = vadd.f32 1.0, %v682_v51  ;;  %693 = vrcp.f32 %v412_v7 }
 0x18a   : > { %v686_v54 = vpop.eup %685  ;;  %v415_v56 = vadd.f32 1.0, %v684_v53  ;;  %695 = vrcp.f32 %v413_v4 }
 0x18b   : > { %v688_v11 = vpop.eup %687  ;;  %697 = vrcp.f32 %v414_v5  ;;  %v456_v57 = vmul.f32 %v686_v54, %v894_v26 }
 0x18c   : > { %699 = vrcp.f32 %v415_v56  ;;  %v457_v40 = vmul.f32 %v688_v11, %v896_v27  ;;  %v690_v46 = vpop.eup %689 }
 0x18d   : > { %v458_v59 = vmul.f32 %v690_v46, %v902_v30 }
 0x18e   : > { %v621_v58 = vpack.c.bf16 %v457_v40, %v456_v57 }
 0x190   : > { %516 = vst [vmem:[%s958_s9 + $0x20] sm:$0xff] %v621_v58 }
 0x192   : > { %v692_v60 = vpop.eup %691 }
 0x193   : > { %v694_v8 = vpop.eup %693  ;;  %v459_v9 = vmul.f32 %v692_v60, %v934_v52 }
 0x194   : > { %v696_v12 = vpop.eup %695  ;;  %v460_v13 = vmul.f32 %v694_v8, %v939_v6 }
 0x195   : > { %v698_v15 = vpop.eup %697  ;;  %v461_v26 = vmul.f32 %v696_v12, %v941_v10  ;;  %v622_v16 = vpack.c.bf16 %v459_v9, %v458_v59 }
 0x196   : > { %v700_v27 = vpop.eup %699  ;;  %v462_v17 = vmul.f32 %v698_v15, %v943_v14 }
 0x197   : > { %v463_v18 = vmul.f32 %v700_v27, %v945_v43  ;;  %v623_v19 = vpack.c.bf16 %v461_v26, %v460_v13  ;;  %517 = vst [vmem:[%s958_s9 + $0x28] sm:$0xff] %v622_v16 }
 0x199   : > { %v624_v30 = vpack.c.bf16 %v463_v18, %v462_v17  ;;  %518 = vst [vmem:[%s958_s9 + $0x30] sm:$0xff] %v623_v19 }
 0x19b   : > { %519 = vst [vmem:[%s958_s9 + $0x38] sm:$0xff] %v624_v30 }
 0x19c PF: > { %s13_s12 = sadd.s32 1, %s707_s12  }
 0x19d   : > { %p10_p4 = scmp.ge.s32.totalorder %s13_s12, 4  }
 0x19f   :  { %12 = sbr.rel (!%p10_p4) target bundleno = 1 (0x1), region = 62 }

// kernel: volume_processor_block.3
= control target key start
LH: loop header
LB: loop body
LE: loop exit
PB: predicated region body
PF: predicated region fallthrough
CT: control target
= control target key end

     0   :  { %s6959_s18 = smov 0   ;;  %s6961_s19 = smov 0   ;;  %s8388_s0 = inlined_call_operand.vmem [shape: bf16[27,32,128], index: 0, kind: input, shape index: {}]   ;;  %s8389_s1 = inlined_call_operand.vmem [shape: f32[1,128], index: 1, kind: input, shape index: {}]   ;;  %s8390_s2 = inlined_call_operand.vmem [shape: bf16[2,10,10,10,32], index: 2, kind: input, shape index: {}, may-alias: {2,3,4}]   ;;  %s8391_s3 = inlined_call_operand.vmem [shape: bf16[2,10,10,10,32], index: 3, kind: input, shape index: {}, may-alias: {2,3,4}]   ;;  %s8392_s4 = inlined_call_operand.vmem [shape: bf16[2,10,10,10,32], index: 4, kind: input, shape index: {}, may-alias: {2,3,4}]   ;;  %s8393_s5 = inlined_call_operand.vmem [shape: bf16[2,8,8,8,128], index: 5, kind: output, shape index: {}]  }
   0x1   :  { %s6963_s20 = smov 0   ;;  %s6965_s21 = smov 0  }
   0x2   :  { %s6967_s22 = smov 0  }
   0x3 LB: > { %s24_s23 = sadd.s32 1, %s6919_s20  ;;  %s27_s24 = sadd.s32 1, %s6923_s21  ;;  %s6927_s22 = sphi %s6967_s22, %s15_s22   ;;  %s6923_s21 = sphi %s6965_s21, %s8402_s21   ;;  %s6919_s20 = sphi %s6963_s20, %s8401_s20   ;;  %s6915_s19 = sphi %s6961_s19, %s8400_s19   ;;  %s6911_s18 = sphi %s6959_s18, %s8399_s18  }
   0x4   : > { %p25_p0 = scmp.ge.s32.totalorder %s24_s23, 8  ;;  %p5382_p1 = scmp.ge.s32.totalorder %s6927_s22, 1 }
   0x5   : > { %p247_p2 = scmp.lt.s32.totalorder %s6927_s22, 17 }
   0x6   : > { %s8404_s23 = smov (%p25_p0, %s24_s23), 0  ;;  %s8406_s24 = smov (!%p25_p0, %s27_s24), %s6923_s21 }
   0x7   : > { %p248_p3 = pnand %p5382_p1, %p247_p2  ;;  %p29_p4 = scmp.ge.s32.totalorder %s8406_s24, 2 }
   0x8   : > { %v6795_v0 = vld [vmem:[%s8388_s0 + $0x10] sm:$0xff] (!%p248_p3)   ;;  %p303_p5 = scmp.lt.s32.totalorder (!%p248_p3), %s6915_s19, 1  ;;  %p305_p6 = scmp.lt.s32.totalorder (!%p248_p3), %s6911_s18, 9  ;;  %v6797_v2 = vld [vmem:[%s8388_s0 + $0x18] sm:$0xff] (!%p248_p3)   ;;  %v7014_v4 = vld [vmem:[%s8388_s0] sm:$0xff] (!%p248_p3)   ;;  %vm508_vm2 = vcmask (!%p248_p3), 261120  }
   0x9   : > { %s8408_s24 = smov (%p29_p4, %s8406_s24), 0  ;;  %251 = sbr.rel (%p248_p3) target bundleno = 494 (0x1ee), region = 40 }
   0xa   : > { %v6796_v1 = vld [vmem:[%s8388_s0 + $0xd0] sm:$0xff] (!%p248_p3)   ;;  %6215 = vmatprep.subr.bf16.mxu1 (!%p248_p3), %v6795_v0  ;;  %v6798_v3 = vld [vmem:[%s8388_s0 + $0xd8] sm:$0xff] (!%p248_p3)   ;;  %s312_s10 = sadd.s32 (!%p248_p3), 1, %s6911_s18  ;;  %v7019_v5 = vld [vmem:[%s8388_s0 + $0xe0] sm:$0xff] (!%p248_p3)   ;;  %vm364_vm0 = vsmask.f32 (!%p248_p3), 3328 }
   0xb   : > { %6371 = vmatprep.subr.bf16.mxu0 (!%p248_p3), %v6796_v1  ;;  %6216 = vmatpush3.bf16.msra.mxu1 (!%p248_p3), %v6795_v0  ;;  %p315_p7 = scmp.lt.s32.totalorder (!%p248_p3), %s312_s10, 9  ;;  %vm365_vm1 = vsmask.f32 (!%p248_p3), 7440  ;;  %vm719_vm4 = vcmask (!%p248_p3), 1042432   ;;  %vm720_vm5 = vcmask (!%p248_p3), 1046532   ;;  %p336_p9 = scmp.lt.s32.totalorder (!%p248_p3), %s6911_s18, 7 }
   0xc   : > { %6372 = vmatpush3.bf16.msra.mxu0 (!%p248_p3), %v6796_v1  ;;  %6217 = vmatprep.subr.bf16.mxu1 (!%p248_p3), %v6797_v2  ;;  %vm7069_vm3 = vmor (!%p248_p3), %vm364_vm0, %vm365_vm1 }
   0xd   : > { %6373 = vmatprep.subr.bf16.mxu0 (!%p248_p3), %v6798_v3  ;;  %vm7173_vm6 = vmor (!%p248_p3), %vm719_vm4, %vm720_vm5 }
   0xf   : > { %6218 = vmatpush3.bf16.msra.mxu1 (!%p248_p3), %v6797_v2 }
  0x10   : > { %s8410_s19 = smov (!%p303_p5, %s6915_s19), 1  ;;  %6374 = vmatpush3.bf16.msra.mxu0 %v6798_v3  ;;  %6227 = vmatprep.subr.bf16.mxu1 %v7014_v4  ;;  %s8412_s10 = smov (!%p315_p7, %s312_s10), 9 }
  0x11   : > { %s306_s8 = scalar_select %p305_p6, %s6911_s18, 9  ;;  %6383 = vmatprep.subr.bf16.mxu0 %v7019_v5 }
  0x12   : > { %s7008_s9 = smul.u32 200, %s8410_s19 }
  0x13   : > { %s6751_s11 = smul.u32 20, %s306_s8 }
  0x14   : > { %s6753_s28 = smul.u32 20, %s8412_s10 }
  0x15   : > { %s309_s16 = sadd.s32 %s7008_s9, %s6751_s11 }
  0x16   : > { %s5383_s17 = sshll.u32 %s309_s16, 2  ;;  %s319_s29 = sadd.s32 %s6753_s28, %s7008_s9 }
  0x17   : > { %s7026_s27 = scalar_lea.vmem %s8390_s2, %s5383_s17  ;;  %s5384_s30 = sshll.u32 %s319_s29, 2 }
  0x18   : > { %v7030_v6 = vld [vmem:[%s7026_s27] sm:$0xf]  ;;  %v7033_v7 = vld [vmem:[%s7026_s27 + $0x8] sm:$0xf]  ;;  %v7036_v8 = vld [vmem:[%s7026_s27 + $0x4] sm:$0x1]  ;;  %s7060_s8 = scalar_lea.vmem %s8391_s3, %s5384_s30 }
  0x19   : > { %v7039_v9 = vld [vmem:[%s7026_s27 + $0xc] sm:$0x1]  ;;  %v368_v10 = vshrl.u32 %v7030_v6, 16  ;;  %v371_v11 = vshll.u32 %v7030_v6, 16  ;;  %v377_v12 = vshll.u32 %v7036_v8, 16  ;;  %v382_v13 = vshrl.u32 %v7033_v7, 16 }
  0x1a   : > { %v385_v14 = vshll.u32 %v7033_v7, 16  ;;  %v391_v16 = vshll.u32 %v7039_v9, 16  ;;  %v7049_v21 = vld [vmem:[%s7026_s27 + $0x10] sm:$0xf]  ;;  %v7052_v23 = vld [vmem:[%s7026_s27 + $0x18] sm:$0xf] }
  0x1b   : > { %v370_v15 = vrot.slane %v368_v10, 4  ;;  %v373_v17 = vrot.slane %v371_v11, 5  ;;  %v379_v18 = vrot.slane %v377_v12, 5  ;;  %v384_v19 = vrot.slane %v382_v13, 4  ;;  %v7055_v24 = vld [vmem:[%s7026_s27 + $0x14] sm:$0x1] }
  0x1c   : > { %v387_v20 = vrot.slane %v385_v14, 5  ;;  %v393_v22 = vrot.slane %v391_v16, 5  ;;  %v7063_v27 = vld [vmem:[%s7026_s27 + $0x1c] sm:$0x1]  ;;  %v396_v28 = vshrl.u32 %v7049_v21, 16  ;;  %v399_v29 = vshll.u32 %v7049_v21, 16 }
  0x1d   : > { %v374_v25 = vor.u32 %v373_v17, %v370_v15  ;;  %v405_v31 = vshll.u32 %v7055_v24, 16  ;;  %v410_v32 = vshrl.u32 %v7052_v23, 16  ;;  %v413_v33 = vshll.u32 %v7052_v23, 16  ;;  %v5671_v39 = vld [vmem:[%s7060_s8 + $0x8] sm:$0xf]  ;;  %s323_s17 = sadd.s32 2, %s6911_s18 }
  0x1e   : > { %v388_v26 = vor.u32 %v387_v20, %v384_v19  ;;  %v419_v34 = vshll.u32 %v7063_v27, 16  ;;  %v398_v37 = vrot.slane %v396_v28, 4  ;;  %v401_v38 = vrot.slane %v399_v29, 5  ;;  %v7079_v42 = vld [vmem:[%s7060_s8 + $0xc] sm:$0x1]  ;;  %p7425_p8 = scmp.lt.s32.totalorder %s323_s17, 9 }
  0x1f   : > { %v375_v35 = vrot.slane %v374_v25, 4  ;;  %v412_v40 = vrot.slane %v410_v32, 4  ;;  %v415_v41 = vrot.slane %v413_v33, 5  ;;  %v5673_v43 = vld [vmem:[%s7060_s8 + $0x10] sm:$0xf]  ;;  %v407_v47 = vrot.slane %v405_v31, 5 }
  0x20   : > { %v389_v36 = vrot.slane %v388_v26, 4  ;;  %v402_v46 = vor.u32 %v401_v38, %v398_v37  ;;  %v7087_v48 = vld [vmem:[%s7060_s8 + $0x14] sm:$0x1]  ;;  %v421_v51 = vrot.slane %v419_v34, 5  ;;  %v2644_v52 = vshrl.u32 %v5671_v39, 16  ;;  %v6802_v19 = vld [vmem:[%s8388_s0 + $0x8] sm:$0xff]  }
  0x21   : > { %v380_v44 = vsel %vm7069_vm3, %v375_v35, %v379_v18  ;;  %v416_v50 = vor.u32 %v415_v41, %v412_v40  ;;  %v2647_v54 = vshll.u32 %v5671_v39, 16  ;;  %v2653_v55 = vshll.u32 %v7079_v42, 16  ;;  %v5675_v57 = vld [vmem:[%s7060_s8 + $0x18] sm:$0xf]  ;;  %v7094_v62 = vld [vmem:[%s7060_s8 + $0x1c] sm:$0x1] }
  0x22   : > { %v394_v45 = vsel %vm7069_vm3, %v389_v36, %v393_v22  ;;  %v403_v53 = vrot.slane %v402_v46, 4  ;;  %v2658_v56 = vshrl.u32 %v5673_v43, 16  ;;  %v2646_v59 = vrot.slane %v2644_v52, 4  ;;  %v5677_v3 = vld [vmem:[%s7060_s8 + $0x20] sm:$0xf]  ;;  %s8414_s17 = smov (!%p7425_p8, %s323_s17), 9 }
  0x23   : > { %v5393_v49 = vcombine.low %v380_v44, %v394_v45  ;;  %v417_v58 = vrot.slane %v416_v50, 4  ;;  %v2661_v60 = vshll.u32 %v5673_v43, 16  ;;  %v2667_v61 = vshll.u32 %v7087_v48, 16  ;;  %v7103_v14 = vld [vmem:[%s7060_s8 + $0x24] sm:$0x1]  ;;  %s6754_s12 = smul.u32 20, %s8414_s17 }
  0x24   : > { %v408_v63 = vsel %vm7069_vm3, %v403_v53, %v407_v47  ;;  %v2649_v0 = vrot.slane %v2647_v54, 5  ;;  %v2655_v1 = vrot.slane %v2653_v55, 5  ;;  %v2660_v2 = vrot.slane %v2658_v56, 4  ;;  %v7113_v33 = vld [vmem:[%s7026_s27 + $0x20] sm:$0xf]  ;;  %s8416_s18 = smov (!%p336_p9, %s6911_s18), 7 }
  0x25   : > { %6219 = vmatprep.mubr.msk.bf16.mxu1 %vm508_vm2, %v5393_v49  ;;  %v422_v10 = vsel %vm7069_vm3, %v417_v58, %v421_v51  ;;  %v2663_v11 = vrot.slane %v2661_v60, 5  ;;  %v2669_v12 = vrot.slane %v2667_v61, 5  ;;  %v2895_v13 = vrot.slane %v7079_v42, 5  ;;  %v7117_v38 = vld [vmem:[%s7026_s27 + $0x24] sm:$0x1]  ;;  %s7521_s15 = sadd.s32 %s6754_s12, %s7008_s9 }
  0x26   : > { %v5394_v15 = vcombine.low %v408_v63, %v422_v10  ;;  %v2650_v16 = vor.u32 %v2649_v0, %v2646_v59  ;;  %v2899_v17 = vrot.slane %v7087_v48, 5  ;;  %v2672_v18 = vshrl.u32 %v5675_v57, 16  ;;  %v7123_v44 = vld [vmem:[%s7026_s27 + $0x28] sm:$0xf]  ;;  %v7134_v49 = vld [vmem:[%s7026_s27 + $0x2c] sm:$0x1] }
  0x27   : > { %v2664_v20 = vor.u32 %v2663_v11, %v2660_v2  ;;  %v2675_v22 = vshll.u32 %v5675_v57, 16  ;;  %v2681_v25 = vshll.u32 %v7094_v62, 16  ;;  %v2686_v26 = vshrl.u32 %v5677_v3, 16  ;;  %v7140_v55 = vld [vmem:[%s7026_s27 + $0x30] sm:$0xf]  ;;  %v6801_v10 = vld [vmem:[%s8388_s0 + $0xe8] sm:$0xff]  }
  0x28   : > { %6220 = vmatmul.mubr.msk.bf16.vlgmr.msra.gmra.mrb[0].mxu1 %vm508_vm2, %v5394_v15  ;;  %v2651_v28 = vrot.slane %v2650_v16, 4  ;;  %v2674_v29 = vrot.slane %v2672_v18, 4  ;;  %v2689_v31 = vshll.u32 %v5677_v3, 16  ;;  %v2695_v32 = vshll.u32 %v7103_v14, 16  ;;  %v7143_v56 = vld [vmem:[%s7026_s27 + $0x34] sm:$0x1] }
  0x29   : > { %v2665_v34 = vrot.slane %v2664_v20, 4  ;;  %6228 = vmatpush3.bf16.msra.mxu1 %v7014_v4  ;;  %v2677_v35 = vrot.slane %v2675_v22, 5  ;;  %v2683_v36 = vrot.slane %v2681_v25, 5  ;;  %v2688_v37 = vrot.slane %v2686_v26, 4  ;;  %v7128_v4 = vld [vmem:[%s8388_s0 + $0x20] sm:$0xff]   ;;  %s5385_s9 = sshll.u32 %s7521_s15, 2 }
  0x2a   : > { %v2656_v39 = vsel %vm7069_vm3, %v2651_v28, %v2655_v1  ;;  %v2691_v40 = vrot.slane %v2689_v31, 5  ;;  %v2697_v41 = vrot.slane %v2695_v32, 5  ;;  %v2903_v43 = vrot.slane %v7094_v62, 5  ;;  %6229 = vmatprep.subr.bf16.mxu1 %v6802_v19  ;;  %v7148_v61 = vld [vmem:[%s7026_s27 + $0x38] sm:$0xf]  ;;  %s7577_s28 = scalar_lea.vmem %s8392_s4, %s5385_s9 }
  0x2b   : > { %v2670_v45 = vsel %vm7069_vm3, %v2665_v34, %v2669_v12  ;;  %v2678_v46 = vor.u32 %v2677_v35, %v2674_v29  ;;  %v2907_v47 = vrot.slane %v7103_v14, 5  ;;  %v424_v50 = vshrl.u32 %v7113_v33, 16  ;;  %v7159_v15 = vld [vmem:[%s7026_s27 + $0x3c] sm:$0x1]  ;;  %v5701_v25 = vld [vmem:[%s7060_s8 + $0x8] sm:$0xe] }
  0x2c   : > { %v5691_v51 = vcombine.low %v2656_v39, %v2670_v45  ;;  %v2692_v52 = vor.u32 %v2691_v40, %v2688_v37  ;;  %v427_v53 = vshll.u32 %v7113_v33, 16  ;;  %v433_v54 = vshll.u32 %v7117_v38, 16  ;;  %v5702_v26 = vld [vmem:[%s7060_s8 + $0x10] sm:$0xe]  ;;  %v5703_v34 = vld [vmem:[%s7060_s8 + $0x18] sm:$0xe] }
  0x2d   : > { %v2679_v57 = vrot.slane %v2678_v46, 4  ;;  %v426_v58 = vrot.slane %v424_v50, 4  ;;  %v438_v59 = vshrl.u32 %v7123_v44, 16  ;;  %v441_v60 = vshll.u32 %v7123_v44, 16  ;;  %6230 = vmatpush3.bf16.msra.mxu1 %v6802_v19  ;;  %v5707_v42 = vld [vmem:[%s7060_s8 + $0x38] sm:$0xe] }
  0x2e   : > { %6375 = vmatprep.mubr.msk.bf16.mxu0 %vm508_vm2, %v5691_v51  ;;  %v2693_v63 = vrot.slane %v2692_v52, 4  ;;  %v429_v0 = vrot.slane %v427_v53, 5  ;;  %v435_v1 = vrot.slane %v433_v54, 5  ;;  %v447_v2 = vshll.u32 %v7134_v49, 16  ;;  %6239 = vmatprep.subr.bf16.mxu1 %v7128_v4  ;;  %v7182_v51 = vld [vmem:[%s8388_s0 + $0xf0] sm:$0xff]  }
  0x2f   : > { %v2684_v3 = vsel %vm7069_vm3, %v2679_v57, %v2683_v36  ;;  %v440_v11 = vrot.slane %v438_v59, 4  ;;  %v443_v12 = vrot.slane %v441_v60, 5  ;;  %v452_v16 = vshrl.u32 %v7140_v55, 16  ;;  %v5704_v52 = vld [vmem:[%s7060_s8 + $0x20] sm:$0xe] }
  0x30   : > { %v2698_v18 = vsel %vm7069_vm3, %v2693_v63, %v2697_v41  ;;  %v430_v19 = vor.u32 %v429_v0, %v426_v58  ;;  %v449_v20 = vrot.slane %v447_v2, 5  ;;  %v455_v22 = vshll.u32 %v7140_v55, 16  ;;  %v5680_v59 = vld [vmem:[%s7060_s8 + $0x2c] sm:$0x1]  ;;  %v5682_v60 = vld [vmem:[%s7060_s8 + $0x34] sm:$0x1] }
  0x31   : > { %v5692_v28 = vcombine.low %v2684_v3, %v2698_v18  ;;  %v444_v29 = vor.u32 %v443_v12, %v440_v11  ;;  %v454_v31 = vrot.slane %v452_v16, 4  ;;  %v461_v32 = vshll.u32 %v7143_v56, 16  ;;  %v5705_v63 = vld [vmem:[%s7060_s8 + $0x28] sm:$0xe]  ;;  %v6027_v40 = vld [vmem:[%s8389_s1] ss:$0 sm:$0xff] }
  0x32   : > { %v431_v35 = vrot.slane %v430_v19, 4  ;;  %v457_v36 = vrot.slane %v455_v22, 5  ;;  %v466_v37 = vshrl.u32 %v7148_v61, 16  ;;  %v469_v39 = vshll.u32 %v7148_v61, 16 }
  0x33   : > { %6376 = vmatmul.mubr.msk.bf16.vlgmr.msra.gmra.mrb[0].mxu0 %vm508_vm2, %v5692_v28  ;;  %v445_v41 = vrot.slane %v444_v29, 4  ;;  %v463_v45 = vrot.slane %v461_v32, 5  ;;  %v475_v46 = vshll.u32 %v7159_v15, 16  ;;  %v5709_v50 = vrot.slane %v5701_v25, 9 }
  0x34   : > { %6384 = vmatpush3.bf16.msra.mxu0 %v7019_v5  ;;  %v436_v53 = vsel %vm7069_vm3, %v431_v35, %v435_v1  ;;  %v458_v54 = vor.u32 %v457_v36, %v454_v31  ;;  %v468_v57 = vrot.slane %v466_v37, 4  ;;  %v471_v58 = vrot.slane %v469_v39, 5  ;;  %v5706_v1 = vld [vmem:[%s7060_s8 + $0x30] sm:$0xe]  ;;  %v695_v37 = vld [vmem:[%s7026_s27] sm:$0xe] }
  0x35   : > { %6385 = vmatprep.subr.bf16.mxu0 %v6801_v10  ;;  %v450_v0 = vsel %vm7069_vm3, %v445_v41, %v449_v20  ;;  %v477_v2 = vrot.slane %v475_v46, 5  ;;  %v2896_v5 = vsel %vm7173_vm6, %v5709_v50, %v2895_v13  ;;  %v5710_v3 = vrot.slane %v5702_v26, 9  ;;  %v7203_v20 = vld [vmem:[%s7060_s8 + $0x3c] sm:$0x1]  ;;  %v696_v39 = vld [vmem:[%s7026_s27 + $0x8] sm:$0xe] }
  0x36   : > { %v5395_v11 = vcombine.low %v436_v53, %v450_v0  ;;  %v459_v12 = vrot.slane %v458_v54, 4  ;;  %v472_v16 = vor.u32 %v471_v58, %v468_v57  ;;  %v5711_v18 = vrot.slane %v5703_v34, 9  ;;  %v5708_v34 = vld [vmem:[%s7060_s8 + $0x40] sm:$0xe]  ;;  %v6807_v50 = vld [vmem:[%s8388_s0 + $0xf8] sm:$0xff]  }
  0x37   : > { %v2900_v19 = vsel %vm7173_vm6, %v5710_v3, %v2899_v17  ;;  %v5712_v22 = vrot.slane %v5704_v52, 9  ;;  %v5713_v25 = vrot.slane %v5705_v63, 9  ;;  %v5714_v29 = vrot.slane %v5706_v1, 9  ;;  %v697_v57 = vld [vmem:[%s7026_s27 + $0x10] sm:$0xe] }
  0x38   : > { %6223 = vmatprep.mubr.msk.bf16.mxu1 %vm508_vm2, %v5395_v11  ;;  %6386 = vmatpush3.bf16.msra.mxu0 %v6801_v10  ;;  %v464_v13 = vsel %vm7069_vm3, %v459_v12, %v463_v45  ;;  %v473_v26 = vrot.slane %v472_v16, 4  ;;  %v5721_v28 = vcombine.low %v2896_v5, %v2900_v19  ;;  %v2904_v48 = vsel %vm7173_vm6, %v5711_v18, %v2903_v43  ;;  %v7224_v43 = vld [vmem:[%s7060_s8 + $0x44] sm:$0x1]  ;;  %v698_v58 = vld [vmem:[%s7026_s27 + $0x18] sm:$0xe] }
  0x39   : > { %6395 = vmatprep.subr.bf16.mxu0 %v7182_v51  ;;  %v2908_v17 = vsel %vm7173_vm6, %v5712_v22, %v2907_v47  ;;  %v2911_v10 = vrot.slane %v5680_v59, 5  ;;  %v2915_v31 = vrot.slane %v5682_v60, 5  ;;  %v5403_v62 = vcombine.low %v7030_v6, %v7033_v7  ;;  %v699_v1 = vld [vmem:[%s7026_s27 + $0x20] sm:$0xe]  ;;  %v700_v11 = vld [vmem:[%s7026_s27 + $0x28] sm:$0xe] }
  0x3a   : > { %v478_v32 = vsel %vm7069_vm3, %v473_v26, %v477_v2  ;;  %6387 = vmatprep.mubr.msk.bf16.mxu0 %vm508_vm2, %v5721_v28  ;;  %v5722_v36 = vcombine.low %v2904_v48, %v2908_v17  ;;  %v724_v41 = vrot.slane %v7036_v8, 5  ;;  %v5715_v46 = vrot.slane %v5707_v42, 9  ;;  %v6811_v2 = vld [vmem:[%s7060_s8 + $0x10] ss:$8 sps:$4 sm:$0xff]   ;;  %v7312_v48 = vld [vmem:[%s7060_s8 + $0x1c] sm:$0x1] }
  0x3b   : > { %v5396_v35 = vcombine.low %v464_v13, %v478_v32  ;;  %v2912_v14 = vsel %vm7173_vm6, %v5713_v25, %v2911_v10  ;;  %v2916_v47 = vsel %vm7173_vm6, %v5714_v29, %v2915_v31  ;;  %v2919_v6 = vrot.slane %v7203_v20, 5  ;;  %v7280_v19 = vld [vmem:[%s7026_s27 + $0x30] sm:$0xe]  ;;  %v7283_v22 = vld [vmem:[%s7026_s27 + $0x38] sm:$0xe] }
  0x3c   : > { %v5723_v45 = vcombine.low %v2912_v14, %v2916_v47  ;;  %v728_v7 = vrot.slane %v7039_v9, 5  ;;  %v5716_v52 = vrot.slane %v5708_v34, 9  ;;  %v2923_v53 = vrot.slane %v7224_v43, 5  ;;  %v7298_v13 = vld [vmem:[%s7060_s8 + $0x14] sm:$0x1] }
  0x3d   : > { %6224 = vmatmul.mubr.msk.bf16.gmra.mrb[4].mxu1 %vm508_vm2, %v5396_v35  ;;  %v5413_v54 = vrot.slane %v695_v37, 9  ;;  %v5414_v8 = vrot.slane %v696_v39, 9  ;;  %v732_v9 = vrot.slane %v7055_v24, 5  ;;  %v736_v59 = vrot.slane %v7063_v27, 5  ;;  %v5755_v28 = vld [vmem:[%s7060_s8 + $0x18] sm:$0xf] }
  0x3e   : > { %6231 = vmatprep.mubr.msk.bf16.mxu1 %vm508_vm2, %v5403_v62  ;;  %v2920_v60 = vsel %vm7173_vm6, %v5715_v46, %v2919_v6  ;;  %v2924_v63 = vsel %vm7173_vm6, %v5716_v52, %v2923_v53  ;;  %v5404_v0 = vcombine.low %v7049_v21, %v7052_v23  ;;  %v2737_v24 = vshll.u32 %v7203_v20, 16  ;;  %v5757_v39 = vld [vmem:[%s7060_s8 + $0x20] sm:$0xf]  ;;  %v7339_v53 = vld [vmem:[%s7060_s8 + $0x2c] sm:$0x1] }
  0x3f   : > { %6388 = vmatmul.mubr.msk.bf16.vlgmr.msra.gmra.mrb[0].mxu0 %vm508_vm2, %v5722_v36  ;;  %v5405_v27 = vcombine.low %v7113_v33, %v7123_v44  ;;  %v7266_v5 = vsel %vm7173_vm6, %v5413_v54, %v724_v41  ;;  %v7270_v21 = vsel %vm7173_vm6, %v5414_v8, %v728_v7  ;;  %v5415_v23 = vrot.slane %v697_v57, 9  ;;  %v6810_v44 = vld [vmem:[%s8388_s0 + $0x28] sm:$0xff]   ;;  %v6815_v41 = vld [vmem:[%s7060_s8 + $0x30] ss:$8 sps:$4 sm:$0xff]  }
  0x40   : > { %6396 = vmatpush3.bf16.msra.mxu0 %v7182_v51  ;;  %6391 = vmatprep.mubr.msk.bf16.mxu0 %vm508_vm2, %v5723_v45  ;;  %v7261_v51 = vld [vmem:[%s8388_s0 + $0x100] sm:$0xff]   ;;  %v5416_v3 = vrot.slane %v698_v58, 9  ;;  %v5724_v33 = vcombine.low %v2920_v60, %v2924_v63  ;;  %v5417_v12 = vrot.slane %v699_v1, 9  ;;  %v740_v16 = vrot.slane %v7117_v38, 5  ;;  %v7294_v38 = vld [vmem:[%s8388_s0 + $0x30] sm:$0xff]   ;;  %v6816_v58 = vld [vmem:[%s8388_s0 + $0x108] sm:$0xff]  }
  0x41   : > { %6397 = vmatprep.subr.bf16.mxu0 %v6807_v50  ;;  %v744_v18 = vrot.slane %v7134_v49, 5  ;;  %v5406_v25 = vcombine.low %v7140_v55, %v7148_v61  ;;  %v5425_v42 = vcombine.low %v7266_v5, %v7270_v21  ;;  %v5753_v49 = vld [vmem:[%s7060_s8 + $0x10] sm:$0xf]  ;;  %v7304_v55 = vsel %vm7173_vm6, %v5415_v23, %v732_v9  ;;  %v6813_v36 = vld [vmem:[%s7060_s8 + $0x20] ss:$8 sps:$4 sm:$0xff]  }
  0x42   : > { %v7308_v61 = vsel %vm7173_vm6, %v5416_v3, %v736_v59  ;;  %v5418_v26 = vrot.slane %v700_v11, 9  ;;  %v3187_v17 = vshrl.u32 %v5753_v49, 16  ;;  %v3190_v10 = vshll.u32 %v5753_v49, 16  ;;  %v6818_v49 = vld [vmem:[%s8388_s0 + $0x38] sm:$0xff]  }
  0x43   : > { %v3196_v29 = vshll.u32 %v7298_v13, 16  ;;  %v3201_v31 = vshrl.u32 %v5755_v28, 16  ;;  %v5419_v32 = vrot.slane %v7280_v19, 9  ;;  %v5420_v62 = vrot.slane %v7283_v22, 9 }
  0x44   : > { %6398 = vmatpush3.bf16.msra.mxu0 %v6807_v50  ;;  %v3189_v34 = vrot.slane %v3187_v17, 4  ;;  %v3204_v35 = vshll.u32 %v5755_v28, 16  ;;  %v752_v14 = vrot.slane %v7159_v15, 5  ;;  %v3210_v37 = vshll.u32 %v7312_v48, 16  ;;  %v7334_v50 = vld [vmem:[%s7060_s8 + $0x24] sm:$0x1] }
  0x45   : > { %6232 = vmatmul.mubr.msk.bf16.vlgmr.msra.gmra.mrb[0].mxu1 %vm508_vm2, %v5404_v0  ;;  %6407 = vmatprep.subr.bf16.mxu0 %v7261_v51  ;;  %v3203_v47 = vrot.slane %v3201_v31, 4  ;;  %v7327_v45 = vsel %vm7173_vm6, %v5417_v12, %v740_v16  ;;  %v7331_v46 = vsel %vm7173_vm6, %v5418_v26, %v744_v18  ;;  %v3198_v6 = vrot.slane %v3196_v29, 5  ;;  %v5759_v15 = vld [vmem:[%s7060_s8 + $0x28] sm:$0xf]  ;;  %v7382_v26 = vld [vmem:[%s7060_s8 + $0x34] sm:$0x1] }
  0x46   : > { %6240 = vmatpush3.bf16.msra.mxu1 %v7128_v4  ;;  %6235 = vmatprep.mubr.msk.bf16.mxu1 %vm508_vm2, %v5405_v27  ;;  %v748_v4 = vrot.slane %v7143_v56, 5  ;;  %v3192_v56 = vrot.slane %v3190_v10, 5  ;;  %v3206_v7 = vrot.slane %v3204_v35, 5  ;;  %v3215_v54 = vshrl.u32 %v5757_v39, 16  ;;  %v5763_v28 = vld [vmem:[%s7060_s8 + $0x38] sm:$0xf] }
  0x47   : > { %6392 = vmatmul.mubr.msk.bf16.gmra.mrb[4].mxu0 %vm508_vm2, %v5724_v33  ;;  %6241 = vmatprep.subr.bf16.mxu1 %v6810_v44  ;;  %v3218_v8 = vshll.u32 %v5757_v39, 16  ;;  %v3224_v57 = vshll.u32 %v7334_v50, 16  ;;  %v3229_v59 = vshrl.u32 %v5759_v15, 16  ;;  %v3232_v60 = vshll.u32 %v5759_v15, 16  ;;  %v7386_v10 = vld [vmem:[%s7060_s8 + $0x3c] sm:$0x1] }
  0x48   : > { %6399 = vmatprep.mubr.msk.bf16.mxu0 %vm508_vm2, %v6811_v2  ;;  %v3193_v52 = vor.u32 %v3192_v56, %v3189_v34  ;;  %v3207_v9 = vor.u32 %v3206_v7, %v3203_v47  ;;  %v3238_v63 = vshll.u32 %v7339_v53, 16  ;;  %v3212_v27 = vrot.slane %v3210_v37, 5  ;;  %v7401_v7 = vld [vmem:[%s7060_s8 + $0x44] sm:$0x1] }
  0x49   : > { %v3217_v2 = vrot.slane %v3215_v54, 4  ;;  %v3220_v5 = vrot.slane %v3218_v8, 5  ;;  %v5426_v21 = vcombine.low %v7304_v55, %v7308_v61  ;;  %v3231_v3 = vrot.slane %v3229_v59, 4  ;;  %v5767_v54 = vld [vmem:[%s7060_s8 + $0x48] sm:$0xf] }
  0x4a   : > { %6242 = vmatpush3.bf16.msra.mxu1 %v6810_v44  ;;  %v3194_v0 = vrot.slane %v3193_v52, 4  ;;  %v3208_v23 = vrot.slane %v3207_v9, 4  ;;  %v3234_v1 = vrot.slane %v3232_v60, 5  ;;  %v5427_v33 = vcombine.low %v7327_v45, %v7331_v46  ;;  %v7356_v44 = vld [vmem:[%s8388_s0 + $0x110] sm:$0xff]   ;;  %v7410_v8 = vld [vmem:[%s7060_s8 + $0x4c] sm:$0x1] }
  0x4b   : > { %6251 = vmatprep.subr.bf16.mxu1 %v7294_v38  ;;  %v3221_v11 = vor.u32 %v3220_v5, %v3217_v2  ;;  %v7358_v12 = vrot.slane %v3224_v57, 5  ;;  %v7360_v16 = vrot.slane %v3238_v63, 5  ;;  %v7366_v18 = vsel %vm7173_vm6, %v5419_v32, %v748_v4 }
  0x4c   : > { %v7370_v19 = vsel %vm7173_vm6, %v5420_v62, %v752_v14  ;;  %v3235_v22 = vor.u32 %v3234_v1, %v3231_v3  ;;  %v3213_v55 = vsel %vm7069_vm3, %v3208_v23, %v3212_v27  ;;  %v3252_v31 = vshll.u32 %v7382_v26, 16 }
  0x4d   : > { %6236 = vmatmul.mubr.msk.bf16.gmra.mrb[4].mxu1 %vm508_vm2, %v5406_v25  ;;  %v5761_v25 = vld [vmem:[%s7060_s8 + $0x30] sm:$0xf]  ;;  %v3222_v61 = vrot.slane %v3221_v11, 4  ;;  %v3257_v32 = vshrl.u32 %v5763_v28, 16  ;;  %v3260_v34 = vshll.u32 %v5763_v28, 16  ;;  %v3266_v35 = vshll.u32 %v7386_v10, 16 }
  0x4e   : > { %6243 = vmatprep.mubr.msk.bf16.mxu1 %vm508_vm2, %v5425_v42  ;;  %v6817_v42 = vld [vmem:[%s7060_s8 + $0x40] ss:$8 sps:$4 sm:$0xff]   ;;  %v3243_v17 = vshrl.u32 %v5761_v25, 16  ;;  %v3236_v4 = vrot.slane %v3235_v22, 4  ;;  %v3246_v29 = vshll.u32 %v5761_v25, 16  ;;  %v3254_v47 = vrot.slane %v3252_v31, 5 }
  0x4f   : > { %6400 = vmatmul.mubr.msk.bf16.vlgmr.msra.gmra.mrb[0].mxu0 %vm508_vm2, %v6813_v36  ;;  %v3438_v36 = vrot.slane %v7298_v13, 5  ;;  %v3259_v37 = vrot.slane %v3257_v32, 4  ;;  %v5428_v39 = vcombine.low %v7366_v18, %v7370_v19  ;;  %v3262_v45 = vrot.slane %v3260_v34, 5  ;;  %v5785_v32 = vld [vmem:[%s7060_s8 + $0x20] sm:$0xe] }
  0x50   : > { %6408 = vmatpush3.bf16.msra.mxu0 %v7261_v51  ;;  %6403 = vmatprep.mubr.msk.bf16.mxu0 %vm508_vm2, %v6815_v41  ;;  %v3199_v51 = vsel %vm7069_vm3, %v3194_v0, %v3198_v6  ;;  %v3245_v62 = vrot.slane %v3243_v17, 4  ;;  %v3248_v56 = vrot.slane %v3246_v29, 5  ;;  %v3227_v41 = vsel %vm7069_vm3, %v3222_v61, %v7358_v12  ;;  %v5765_v6 = vld [vmem:[%s7060_s8 + $0x40] sm:$0xf]  ;;  %v5784_v61 = vld [vmem:[%s7060_s8 + $0x18] sm:$0xe] }
  0x51   : > { %6409 = vmatprep.subr.bf16.mxu0 %v6816_v58  ;;  %v5773_v14 = vcombine.low %v3199_v51, %v3213_v55  ;;  %v3268_v46 = vrot.slane %v3266_v35, 5  ;;  %v3241_v15 = vsel %vm7069_vm3, %v3236_v4, %v7360_v16  ;;  %v3271_v57 = vshrl.u32 %v5765_v6, 16  ;;  %v5783_v55 = vld [vmem:[%s7060_s8 + $0x10] sm:$0xe] }
  0x52   : > { %v3249_v52 = vor.u32 %v3248_v56, %v3245_v62  ;;  %v3263_v9 = vor.u32 %v3262_v45, %v3259_v37  ;;  %v3280_v59 = vshll.u32 %v7401_v7, 16  ;;  %v3285_v60 = vshrl.u32 %v5767_v54, 16  ;;  %v5786_v62 = vld [vmem:[%s7060_s8 + $0x28] sm:$0xe]  ;;  %v7466_v37 = vld [vmem:[%s7026_s27 + $0xc] sm:$0x1] }
  0x53   : > { %v3288_v63 = vshll.u32 %v5767_v54, 16  ;;  %v3273_v27 = vrot.slane %v3271_v57, 4  ;;  %v3294_v5 = vshll.u32 %v7410_v8, 16  ;;  %v5774_v11 = vcombine.low %v3227_v41, %v3241_v15  ;;  %v6824_v41 = vld [vmem:[%s7026_s27 + $0x28] ss:$8 sps:$4 sm:$0xff]   ;;  %v7478_v15 = vld [vmem:[%s8388_s0 + $0x120] sm:$0xff]  }
  0x54   : > { %6410 = vmatpush3.bf16.msra.mxu0 %v6816_v58  ;;  %v3274_v58 = vshll.u32 %v5765_v6, 16  ;;  %v3250_v0 = vrot.slane %v3249_v52, 4  ;;  %v3264_v23 = vrot.slane %v3263_v9, 4  ;;  %v3287_v3 = vrot.slane %v3285_v60, 4  ;;  %v7473_v6 = vld [vmem:[%s7026_s27 + $0x14] sm:$0x1] }
  0x55   : > { %6244 = vmatmul.mubr.msk.bf16.vlgmr.msra.gmra.mrb[0].mxu1 %vm508_vm2, %v5426_v21  ;;  %6419 = vmatprep.subr.bf16.mxu0 %v7356_v44  ;;  %v6820_v21 = vld [vmem:[%s7026_s27 + $0x8] ss:$8 sps:$4 sm:$0xff]   ;;  %v3290_v1 = vrot.slane %v3288_v63, 5  ;;  %v3282_v18 = vrot.slane %v3280_v59, 5  ;;  %v3296_v25 = vrot.slane %v3294_v5, 5  ;;  %v3450_v28 = vrot.slane %v7339_v53, 5 }
  0x56   : > { %6252 = vmatpush3.bf16.msra.mxu1 %v7294_v38  ;;  %6247 = vmatprep.mubr.msk.bf16.mxu1 %vm508_vm2, %v5427_v33  ;;  %v7416_v38 = vld [vmem:[%s8388_s0 + $0x40] sm:$0xff]   ;;  %v3276_v2 = vrot.slane %v3274_v58, 5  ;;  %v3442_v33 = vrot.slane %v7312_v48, 5  ;;  %v3255_v12 = vsel %vm7069_vm3, %v3250_v0, %v3254_v47  ;;  %v3269_v19 = vsel %vm7069_vm3, %v3264_v23, %v3268_v46  ;;  %v6823_v48 = vld [vmem:[%s8388_s0 + $0x118] sm:$0xff]   ;;  %v5457_v47 = vld [vmem:[%s7026_s27 + $0x8] sm:$0xf] }
  0x57   : > { %6404 = vmatmul.mubr.msk.bf16.gmra.mrb[4].mxu0 %vm508_vm2, %v6817_v42  ;;  %6253 = vmatprep.subr.bf16.mxu1 %v6818_v49  ;;  %v3291_v22 = vor.u32 %v3290_v1, %v3287_v3  ;;  %v3446_v42 = vrot.slane %v7334_v50, 5  ;;  %v5791_v4 = vrot.slane %v5783_v55, 9  ;;  %v5792_v29 = vrot.slane %v5784_v61, 9  ;;  %v6821_v53 = vld [vmem:[%s7026_s27 + $0x18] ss:$8 sps:$4 sm:$0xff]   ;;  %v7513_v55 = vld [vmem:[%s8388_s0 + $0x50] sm:$0xff]  }
  0x58   : > { %6411 = vmatprep.mubr.msk.bf16.mxu0 %vm508_vm2, %v5773_v14  ;;  %v3277_v16 = vor.u32 %v3276_v2, %v3273_v27  ;;  %v3454_v31 = vrot.slane %v7382_v26, 5  ;;  %v5793_v56 = vrot.slane %v5785_v32, 9  ;;  %v5794_v13 = vrot.slane %v5786_v62, 9  ;;  %v5459_v46 = vld [vmem:[%s7026_s27 + $0x10] sm:$0xf]  ;;  %v6826_v27 = vld [vmem:[%s8388_s0 + $0x48] sm:$0xff]  }
  0x59   : > { %v3292_v17 = vrot.slane %v3291_v22, 4  ;;  %v3439_v35 = vsel %vm7173_vm6, %v5791_v4, %v3438_v36  ;;  %v3443_v14 = vsel %vm7173_vm6, %v5792_v29, %v3442_v33  ;;  %v1016_v36 = vshrl.u32 %v5457_v47, 16  ;;  %v5461_v58 = vld [vmem:[%s7026_s27 + $0x18] sm:$0xf]  ;;  %v7492_v0 = vld [vmem:[%s7026_s27 + $0x1c] sm:$0x1] }
  0x5a   : > { %6254 = vmatpush3.bf16.msra.mxu1 %v6818_v49  ;;  %v5775_v49 = vcombine.low %v3255_v12, %v3269_v19  ;;  %v3278_v51 = vrot.slane %v3277_v16, 4  ;;  %v5803_v45 = vcombine.low %v3439_v35, %v3443_v14  ;;  %v1019_v52 = vshll.u32 %v5457_v47, 16  ;;  %v5463_v3 = vld [vmem:[%s7026_s27 + $0x20] sm:$0xf]  ;;  %v5787_v29 = vld [vmem:[%s7060_s8 + $0x30] sm:$0xe] }
  0x5b   : > { %6263 = vmatprep.subr.bf16.mxu1 %v7416_v38  ;;  %v3297_v34 = vsel %vm7069_vm3, %v3292_v17, %v3296_v25  ;;  %v1025_v54 = vshll.u32 %v7466_v37, 16  ;;  %v1030_v57 = vshrl.u32 %v5459_v46, 16  ;;  %v7488_v9 = vsel %vm7173_vm6, %v5794_v13, %v3450_v28  ;;  %v6825_v61 = vld [vmem:[%s7026_s27 + $0x38] ss:$8 sps:$4 sm:$0xff]   ;;  %v7540_v26 = vld [vmem:[%s7026_s27 + $0x2c] sm:$0x1] }
  0x5c   : > { %v3283_v50 = vsel %vm7069_vm3, %v3278_v51, %v3282_v18  ;;  %v1018_v59 = vrot.slane %v1016_v36, 4  ;;  %v1033_v60 = vshll.u32 %v5459_v46, 16  ;;  %v1039_v63 = vshll.u32 %v7473_v6, 16  ;;  %v5789_v13 = vld [vmem:[%s7060_s8 + $0x40] sm:$0xe] }
  0x5d   : > { %6248 = vmatmul.mubr.msk.bf16.gmra.mrb[4].mxu1 %vm508_vm2, %v5428_v39  ;;  %v5776_v39 = vcombine.low %v3283_v50, %v3297_v34  ;;  %v1021_v5 = vrot.slane %v1019_v52, 5  ;;  %v1032_v23 = vrot.slane %v1030_v57, 4  ;;  %v1044_v12 = vshrl.u32 %v5461_v58, 16  ;;  %v5790_v46 = vld [vmem:[%s7060_s8 + $0x48] sm:$0xe] }
  0x5e   : > { %6255 = vmatprep.mubr.msk.bf16.mxu1 %vm508_vm2, %v6820_v21  ;;  %v1027_v21 = vrot.slane %v1025_v54, 5  ;;  %v1035_v1 = vrot.slane %v1033_v60, 5  ;;  %v1041_v33 = vrot.slane %v1039_v63, 5  ;;  %v1047_v16 = vshll.u32 %v5461_v58, 16  ;;  %v5465_v58 = vld [vmem:[%s7026_s27 + $0x28] sm:$0xf] }
  0x5f   : > { %6412 = vmatmul.mubr.msk.bf16.vlgmr.msra.gmra.mrb[0].mxu0 %vm508_vm2, %v5774_v11  ;;  %v7501_v11 = vld [vmem:[%s7026_s27 + $0x24] sm:$0x1]  ;;  %v1022_v18 = vor.u32 %v1021_v5, %v1018_v59  ;;  %v1053_v19 = vshll.u32 %v7492_v0, 16  ;;  %v1058_v22 = vshrl.u32 %v5463_v3, 16  ;;  %v1061_v25 = vshll.u32 %v5463_v3, 16 }
  0x60   : > { %6420 = vmatpush3.bf16.msra.mxu0 %v7356_v44  ;;  %6415 = vmatprep.mubr.msk.bf16.mxu0 %vm508_vm2, %v5775_v49  ;;  %v7482_v44 = vsel %vm7173_vm6, %v5793_v56, %v3446_v42  ;;  %v1046_v42 = vrot.slane %v1044_v12, 4  ;;  %v1049_v49 = vrot.slane %v1047_v16, 5  ;;  %v1067_v51 = vshll.u32 %v7501_v11, 16 }
  0x61   : > { %6421 = vmatprep.subr.bf16.mxu0 %v6823_v48  ;;  %v5804_v2 = vcombine.low %v7482_v44, %v7488_v9  ;;  %v1023_v28 = vrot.slane %v1022_v18, 4  ;;  %v1060_v17 = vrot.slane %v1058_v22, 4  ;;  %v1063_v4 = vrot.slane %v1061_v25, 5  ;;  %v7562_v18 = vld [vmem:[%s7026_s27 + $0x3c] sm:$0x1] }
  0x62   : > { %v1050_v32 = vor.u32 %v1049_v49, %v1046_v42  ;;  %v1069_v62 = vrot.slane %v1067_v51, 5  ;;  %v5795_v34 = vrot.slane %v5787_v29, 9  ;;  %v3458_v47 = vrot.slane %v7386_v10, 5  ;;  %v7572_v49 = vld [vmem:[%s7026_s27 + $0x44] sm:$0x1] }
  0x63   : > { %v1028_v35 = vsel %vm7069_vm3, %v1023_v28, %v1027_v21  ;;  %v1064_v14 = vor.u32 %v1063_v4, %v1060_v17  ;;  %v3462_v36 = vrot.slane %v7401_v7, 5  ;;  %v5797_v57 = vrot.slane %v5789_v13, 9  ;;  %v6829_v7 = vld [vmem:[%s8388_s0 + $0x128] sm:$0xff]   ;;  %v7554_v21 = vld [vmem:[%s7026_s27 + $0x34] sm:$0x1] }
  0x64   : > { %6422 = vmatpush3.bf16.msra.mxu0 %v6823_v48  ;;  %v1036_v48 = vor.u32 %v1035_v1, %v1032_v23  ;;  %v5798_v60 = vrot.slane %v5790_v46, 9  ;;  %v3466_v63 = vrot.slane %v7410_v8, 5  ;;  %v1072_v23 = vshrl.u32 %v5465_v58, 16  ;;  %v5469_v1 = vld [vmem:[%s7026_s27 + $0x38] sm:$0xf]  ;;  %v7586_v4 = vld [vmem:[%s8388_s0 + $0x130] sm:$0xff]  }
  0x65   : > { %6256 = vmatmul.mubr.msk.bf16.vlgmr.msra.gmra.mrb[0].mxu1 %vm508_vm2, %v6821_v53  ;;  %6431 = vmatprep.subr.bf16.mxu0 %v7478_v15  ;;  %v5788_v53 = vld [vmem:[%s7060_s8 + $0x38] sm:$0xe]  ;;  %v1065_v54 = vrot.slane %v1064_v14, 4  ;;  %v1075_v3 = vshll.u32 %v5465_v58, 16  ;;  %v3463_v12 = vsel %vm7173_vm6, %v5797_v57, %v3462_v36  ;;  %v1081_v8 = vshll.u32 %v7540_v26, 16 }
  0x66   : > { %6264 = vmatpush3.bf16.msra.mxu1 %v7416_v38  ;;  %6259 = vmatprep.mubr.msk.bf16.mxu1 %vm508_vm2, %v6824_v41  ;;  %v1055_v38 = vrot.slane %v1053_v19, 5  ;;  %v1037_v50 = vrot.slane %v1036_v48, 4  ;;  %v5796_v56 = vrot.slane %v5788_v53, 9  ;;  %v1051_v41 = vrot.slane %v1050_v32, 4  ;;  %v5471_v19 = vld [vmem:[%s7026_s27 + $0x40] sm:$0xf] }
  0x67   : > { %6416 = vmatmul.mubr.msk.bf16.gmra.mrb[4].mxu0 %vm508_vm2, %v5776_v39  ;;  %6265 = vmatprep.subr.bf16.mxu1 %v6826_v27  ;;  %v1070_v5 = vsel %vm7069_vm3, %v1065_v54, %v1069_v62  ;;  %v3467_v22 = vsel %vm7173_vm6, %v5798_v60, %v3466_v63  ;;  %v1074_v25 = vrot.slane %v1072_v23, 4  ;;  %v1077_v48 = vrot.slane %v1075_v3, 5  ;;  %v6830_v14 = vld [vmem:[%s8388_s0 + $0x58] sm:$0xff]  }
  0x68   : > { %6423 = vmatprep.mubr.msk.bf16.mxu0 %vm508_vm2, %v5803_v45  ;;  %v1042_v39 = vsel %vm7069_vm3, %v1037_v50, %v1041_v33  ;;  %v3455_v45 = vsel %vm7173_vm6, %v5795_v34, %v3454_v31  ;;  %v3459_v10 = vsel %vm7173_vm6, %v5796_v56, %v3458_v47  ;;  %v1056_v31 = vsel %vm7069_vm3, %v1051_v41, %v1055_v38  ;;  %v6831_v56 = vld [vmem:[%s7577_s28] ss:$8 sps:$4 sm:$0xff]   ;;  %v6833_v3 = vld [vmem:[%s7577_s28 + $0x10] ss:$8 sps:$4 sm:$0xff]  }
  0x69   : > { %v5477_v52 = vcombine.low %v1028_v35, %v1042_v39  ;;  %v5805_v59 = vcombine.low %v3455_v45, %v3459_v10  ;;  %v5478_v33 = vcombine.low %v1056_v31, %v1070_v5  ;;  %v1083_v44 = vrot.slane %v1081_v8, 5  ;;  %v7604_v31 = vld [vmem:[%s8388_s0 + $0x60] sm:$0xff]   ;;  %v5489_v5 = vld [vmem:[%s7026_s27 + $0x18] sm:$0xe] }
  0x6a   : > { %6266 = vmatpush3.bf16.msra.mxu1 %v6826_v27  ;;  %v5467_v27 = vld [vmem:[%s7026_s27 + $0x30] sm:$0xf]  ;;  %v1100_v51 = vshrl.u32 %v5469_v1, 16  ;;  %v1103_v38 = vshll.u32 %v5469_v1, 16  ;;  %v1109_v17 = vshll.u32 %v7562_v18, 16  ;;  %v1114_v50 = vshrl.u32 %v5471_v19, 16 }
  0x6b   : > { %6275 = vmatprep.subr.bf16.mxu1 %v7513_v55  ;;  %v1086_v16 = vshrl.u32 %v5467_v27, 16  ;;  %v1089_v42 = vshll.u32 %v5467_v27, 16  ;;  %v1117_v32 = vshll.u32 %v5471_v19, 16  ;;  %v1123_v45 = vshll.u32 %v7572_v49, 16  ;;  %v5490_v1 = vld [vmem:[%s7026_s27 + $0x20] sm:$0xe] }
  0x6c   : > { %v1102_v29 = vrot.slane %v1100_v51, 4  ;;  %v1105_v35 = vrot.slane %v1103_v38, 5  ;;  %v1111_v47 = vrot.slane %v1109_v17, 5  ;;  %v1116_v39 = vrot.slane %v1114_v50, 4  ;;  %v5493_v17 = vld [vmem:[%s7026_s27 + $0x38] sm:$0xe] }
  0x6d   : > { %6260 = vmatmul.mubr.msk.bf16.gmra.mrb[4].mxu1 %vm508_vm2, %v6825_v61  ;;  %v1088_v9 = vrot.slane %v1086_v16, 4  ;;  %v1078_v61 = vor.u32 %v1077_v48, %v1074_v25  ;;  %v1091_v28 = vrot.slane %v1089_v42, 5  ;;  %v1119_v41 = vrot.slane %v1117_v32, 5  ;;  %v7648_v32 = vld [vmem:[%s8388_s0 + $0x140] sm:$0xff]  }
  0x6e   : > { %6267 = vmatprep.mubr.msk.bf16.mxu1 %vm508_vm2, %v5477_v52  ;;  %v1106_v36 = vor.u32 %v1105_v35, %v1102_v29  ;;  %v1267_v52 = vrot.slane %v7466_v37, 5  ;;  %v1125_v10 = vrot.slane %v1123_v45, 5  ;;  %v1271_v57 = vrot.slane %v7473_v6, 5  ;;  %v3712_v35 = vld [vmem:[%s7577_s28] sm:$0xf] }
  0x6f   : > { %6424 = vmatmul.mubr.msk.bf16.vlgmr.msra.gmra.mrb[0].mxu0 %vm508_vm2, %v5804_v2  ;;  %v1095_v2 = vshll.u32 %v7554_v21, 16  ;;  %v1079_v62 = vrot.slane %v1078_v61, 4  ;;  %v1092_v53 = vor.u32 %v1091_v28, %v1088_v9  ;;  %v1120_v54 = vor.u32 %v1119_v41, %v1116_v39  ;;  %v5491_v9 = vld [vmem:[%s7026_s27 + $0x28] sm:$0xe] }
  0x70   : > { %6432 = vmatpush3.bf16.msra.mxu0 %v7478_v15  ;;  %6427 = vmatprep.mubr.msk.bf16.mxu0 %vm508_vm2, %v5805_v59  ;;  %v5806_v15 = vcombine.low %v3463_v12, %v3467_v22  ;;  %v1275_v58 = vrot.slane %v7492_v0, 5  ;;  %v5487_v59 = vld [vmem:[%s7026_s27 + $0x8] sm:$0xe]  ;;  %v1279_v6 = vrot.slane %v7501_v11, 5  ;;  %v1283_v12 = vrot.slane %v7540_v26, 5 }
  0x71   : > { %6433 = vmatprep.subr.bf16.mxu0 %v6829_v7  ;;  %v1097_v34 = vrot.slane %v1095_v2, 5  ;;  %v1084_v13 = vsel %vm7069_vm3, %v1079_v62, %v1083_v44  ;;  %v1093_v46 = vrot.slane %v1092_v53, 4  ;;  %v1121_v0 = vrot.slane %v1120_v54, 4  ;;  %v6835_v26 = vld [vmem:[%s7577_s28 + $0x20] ss:$8 sps:$4 sm:$0xff]   ;;  %v6836_v44 = vld [vmem:[%s8388_s0 + $0x138] sm:$0xff]  }
  0x72   : > { %v5495_v63 = vrot.slane %v5487_v59, 9  ;;  %v5498_v19 = vrot.slane %v5490_v1, 9  ;;  %v2751_v48 = vshll.u32 %v7224_v43, 16  ;;  %v5492_v2 = vld [vmem:[%s7026_s27 + $0x30] sm:$0xe]  ;;  %v5499_v61 = vrot.slane %v5491_v9, 9 }
  0x73   : > { %v1098_v37 = vsel %vm7069_vm3, %v1093_v46, %v1097_v34  ;;  %v1126_v11 = vsel %vm7069_vm3, %v1121_v0, %v1125_v10  ;;  %v5500_v28 = vrot.slane %v5492_v2, 9  ;;  %v1287_v38 = vrot.slane %v7554_v21, 5 }
  0x74   : > { %6434 = vmatpush3.bf16.msra.mxu0 %v6829_v7  ;;  %v5488_v7 = vld [vmem:[%s7026_s27 + $0x10] sm:$0xe]  ;;  %v5479_v60 = vcombine.low %v1084_v13, %v1098_v37  ;;  %v1268_v8 = vsel %vm7173_vm6, %v5495_v63, %v1267_v52  ;;  %v1280_v51 = vsel %vm7173_vm6, %v5498_v19, %v1279_v6  ;;  %v5501_v29 = vrot.slane %v5493_v17, 9 }
  0x75   : > { %6268 = vmatmul.mubr.msk.bf16.vlgmr.msra.gmra.mrb[0].mxu1 %vm508_vm2, %v5478_v33  ;;  %6443 = vmatprep.subr.bf16.mxu0 %v7586_v4  ;;  %v5496_v27 = vrot.slane %v5488_v7, 9  ;;  %v5497_v33 = vrot.slane %v5489_v5, 9  ;;  %v1291_v50 = vrot.slane %v7562_v18, 5  ;;  %v1284_v21 = vsel %vm7173_vm6, %v5499_v61, %v1283_v12  ;;  %v7685_v5 = vld [vmem:[%s7577_s28 + $0x1c] sm:$0x1] }
  0x76   : > { %6276 = vmatpush3.bf16.msra.mxu1 %v7513_v55  ;;  %v1107_v55 = vrot.slane %v1106_v36, 4  ;;  %6271 = vmatprep.mubr.msk.bf16.mxu1 %vm508_vm2, %v5479_v60  ;;  %v1288_v62 = vsel %vm7173_vm6, %v5500_v28, %v1287_v38  ;;  %v1295_v34 = vrot.slane %v7572_v49, 5  ;;  %v3729_v41 = vshrl.u32 %v3712_v35, 16  ;;  %v6838_v49 = vld [vmem:[%s8388_s0 + $0x68] sm:$0xff]   ;;  %v7679_v60 = vld [vmem:[%s7577_s28 + $0x14] sm:$0x1] }
  0x77   : > { %6428 = vmatmul.mubr.msk.bf16.gmra.mrb[4].mxu0 %vm508_vm2, %v5806_v15  ;;  %6277 = vmatprep.subr.bf16.mxu1 %v6830_v14  ;;  %v1272_v16 = vsel %vm7173_vm6, %v5496_v27, %v1271_v57  ;;  %v1276_v42 = vsel %vm7173_vm6, %v5497_v33, %v1275_v58  ;;  %v5494_v15 = vld [vmem:[%s7026_s27 + $0x40] sm:$0xe]  ;;  %v5509_v39 = vcombine.low %v1284_v21, %v1288_v62  ;;  %v3732_v45 = vshll.u32 %v3712_v35, 16  ;;  %v3718_v27 = vld [vmem:[%s7577_s28 + $0x18] sm:$0xf] }
  0x78   : > { %6435 = vmatprep.mubr.msk.bf16.mxu0 %vm508_vm2, %v6831_v56  ;;  %v1112_v23 = vsel %vm7069_vm3, %v1107_v55, %v1111_v47  ;;  %v5507_v25 = vcombine.low %v1268_v8, %v1272_v16  ;;  %v5502_v53 = vrot.slane %v5494_v15, 9  ;;  %v5508_v18 = vcombine.low %v1276_v42, %v1280_v51  ;;  %v7660_v56 = vld [vmem:[%s7577_s28 + $0x4] sm:$0x1]  ;;  %v3714_v47 = vld [vmem:[%s7577_s28 + $0x8] sm:$0xf] }
  0x79   : > { %v5480_v22 = vcombine.low %v1112_v23, %v1126_v11  ;;  %v3738_v13 = vshll.u32 %v7660_v56, 16  ;;  %v1292_v46 = vsel %vm7173_vm6, %v5501_v29, %v1291_v50  ;;  %v3743_v36 = vshrl.u32 %v3714_v47, 16  ;;  %v3716_v55 = vld [vmem:[%s7577_s28 + $0x10] sm:$0xf]  ;;  %v3720_v50 = vld [vmem:[%s7577_s28 + $0x20] sm:$0xf] }
  0x7a   : > { %6278 = vmatpush3.bf16.msra.mxu1 %v6830_v14  ;;  %v6837_v14 = vld [vmem:[%s7577_s28 + $0x30] ss:$8 sps:$4 sm:$0xff]   ;;  %v3746_v52 = vshll.u32 %v3714_v47, 16  ;;  %v1296_v10 = vsel %vm7173_vm6, %v5502_v53, %v1295_v34  ;;  %v3731_v57 = vrot.slane %v3729_v41, 4  ;;  %v3734_v58 = vrot.slane %v3732_v45, 5 }
  0x7b   : > { %6287 = vmatprep.subr.bf16.mxu1 %v7604_v31  ;;  %v3740_v37 = vrot.slane %v3738_v13, 5  ;;  %v3745_v59 = vrot.slane %v3743_v36, 4  ;;  %v3757_v0 = vshrl.u32 %v3716_v55, 16  ;;  %v3760_v23 = vshll.u32 %v3716_v55, 16  ;;  %v6840_v51 = vld [vmem:[%s7026_s27 + $0x10] ss:$8 sps:$4 sm:$0xff]  }
  0x7c   : > { %v3748_v7 = vrot.slane %v3746_v52, 5  ;;  %v3735_v63 = vor.u32 %v3734_v58, %v3731_v57  ;;  %v3771_v12 = vshrl.u32 %v3718_v27, 16  ;;  %v3774_v11 = vshll.u32 %v3718_v27, 16  ;;  %v7704_v21 = vld [vmem:[%s7577_s28 + $0x24] sm:$0x1]  ;;  %v6843_v58 = vld [vmem:[%s8388_s0 + $0x148] sm:$0xff]  }
  0x7d   : > { %6272 = vmatmul.mubr.msk.bf16.gmra.mrb[4].mxu1 %vm508_vm2, %v5480_v22  ;;  %v3759_v33 = vrot.slane %v3757_v0, 4  ;;  %v5510_v8 = vcombine.low %v1292_v46, %v1296_v10  ;;  %v3762_v19 = vrot.slane %v3760_v23, 5  ;;  %v3780_v22 = vshll.u32 %v7685_v5, 16  ;;  %v3722_v34 = vld [vmem:[%s7577_s28 + $0x28] sm:$0xf] }
  0x7e   : > { %6279 = vmatprep.mubr.msk.bf16.mxu1 %vm508_vm2, %v5507_v25  ;;  %v3749_v1 = vor.u32 %v3748_v7, %v3745_v59  ;;  %v3736_v16 = vrot.slane %v3735_v63, 4  ;;  %v3773_v42 = vrot.slane %v3771_v12, 4  ;;  %v3980_v17 = vrot.slane %v7660_v56, 5  ;;  %v7710_v35 = vld [vmem:[%s7577_s28 + $0x2c] sm:$0x1] }
  0x7f   : > { %6436 = vmatmul.mubr.msk.bf16.vlgmr.msra.gmra.mrb[0].mxu0 %vm508_vm2, %v6833_v3  ;;  %v3766_v3 = vshll.u32 %v7679_v60, 16  ;;  %v3763_v2 = vor.u32 %v3762_v19, %v3759_v33  ;;  %v3782_v38 = vrot.slane %v3780_v22, 5  ;;  %v3788_v47 = vshll.u32 %v3720_v50, 16  ;;  %v6841_v13 = vld [vmem:[%s7026_s27 + $0x20] ss:$8 sps:$4 sm:$0xff]  }
  0x80   : > { %6444 = vmatpush3.bf16.msra.mxu0 %v7586_v4  ;;  %6439 = vmatprep.mubr.msk.bf16.mxu0 %vm508_vm2, %v6835_v26  ;;  %v7664_v4 = vld [vmem:[%s7577_s28 + $0xc] sm:$0x1]  ;;  %v3750_v25 = vrot.slane %v3749_v1, 4  ;;  %v3741_v9 = vsel %vm7069_vm3, %v3736_v16, %v3740_v37  ;;  %v3799_v41 = vshrl.u32 %v3722_v34, 16  ;;  %v3808_v36 = vshll.u32 %v7710_v35, 16  ;;  %v6846_v1 = vld [vmem:[%s8388_s0 + $0x78] sm:$0xff]  }
  0x81   : > { %6445 = vmatprep.subr.bf16.mxu0 %v6836_v44  ;;  %v3752_v54 = vshll.u32 %v7664_v4, 16  ;;  %v3768_v26 = vrot.slane %v3766_v3, 5  ;;  %v3764_v29 = vrot.slane %v3763_v2, 4  ;;  %v3984_v62 = vrot.slane %v7664_v4, 5  ;;  %v3724_v37 = vld [vmem:[%s7577_s28 + $0x30] sm:$0xf] }
  0x82   : > { %v3801_v57 = vrot.slane %v3799_v41, 4  ;;  %v3810_v59 = vrot.slane %v3808_v36, 5  ;;  %v7726_v7 = vld [vmem:[%s7577_s28 + $0x34] sm:$0x1]  ;;  %v7731_v63 = vld [vmem:[%s7577_s28 + $0x3c] sm:$0x1] }
  0x83   : > { %v3754_v6 = vrot.slane %v3752_v54, 5  ;;  %v3790_v54 = vrot.slane %v3788_v47, 5  ;;  %v3813_v27 = vshrl.u32 %v3724_v37, 16  ;;  %v3816_v23 = vshll.u32 %v3724_v37, 16  ;;  %v7742_v16 = vld [vmem:[%s8388_s0 + $0x150] sm:$0xff]  }
  0x84   : > { %6446 = vmatpush3.bf16.msra.mxu0 %v6836_v44  ;;  %v3776_v44 = vrot.slane %v3774_v11, 5  ;;  %v3822_v3 = vshll.u32 %v7726_v7, 16  ;;  %v3992_v2 = vrot.slane %v7685_v5, 5  ;;  %v6845_v5 = vld [vmem:[%s7026_s27 + $0x40] ss:$8 sps:$4 sm:$0xff]   ;;  %v3996_v36 = vrot.slane %v7704_v21, 5 }
  0x85   : > { %6280 = vmatmul.mubr.msk.bf16.vlgmr.msra.gmra.mrb[0].mxu1 %vm508_vm2, %v5508_v18  ;;  %6455 = vmatprep.subr.bf16.mxu0 %v7648_v32  ;;  %v3755_v61 = vsel %vm7069_vm3, %v3750_v25, %v3754_v6  ;;  %v3785_v18 = vshrl.u32 %v3720_v50, 16  ;;  %v3726_v6 = vld [vmem:[%s7577_s28 + $0x38] sm:$0xf]  ;;  %v3815_v22 = vrot.slane %v3813_v27, 4  ;;  %v3818_v25 = vrot.slane %v3816_v23, 5 }
  0x86   : > { %6288 = vmatpush3.bf16.msra.mxu1 %v7604_v31  ;;  %6283 = vmatprep.mubr.msk.bf16.mxu1 %vm508_vm2, %v5509_v39  ;;  %v7692_v31 = vld [vmem:[%s8388_s0 + $0x70] sm:$0xff]   ;;  %v3777_v28 = vor.u32 %v3776_v44, %v3773_v42  ;;  %v5831_v15 = vcombine.low %v3741_v9, %v3755_v61  ;;  %v3794_v39 = vshll.u32 %v7704_v21, 16  ;;  %v3827_v12 = vshrl.u32 %v3726_v6, 16  ;;  %v3954_v50 = vld [vmem:[%s7577_s28] sm:$0xe] }
  0x87   : > { %6440 = vmatmul.mubr.msk.bf16.gmra.mrb[4].mxu0 %vm508_vm2, %v6837_v14  ;;  %6289 = vmatprep.subr.bf16.mxu1 %v6838_v49  ;;  %v3769_v14 = vsel %vm7069_vm3, %v3764_v29, %v3768_v26  ;;  %v3787_v46 = vrot.slane %v3785_v18, 4  ;;  %v3830_v11 = vshll.u32 %v3726_v6, 16  ;;  %v3988_v26 = vrot.slane %v7679_v60, 5  ;;  %v6844_v9 = vld [vmem:[%s7026_s27 + $0x30] ss:$8 sps:$4 sm:$0xff]  }
  0x88   : > { %v3778_v53 = vrot.slane %v3777_v28, 4  ;;  %6447 = vmatprep.mubr.msk.bf16.mxu0 %vm508_vm2, %v5831_v15  ;;  %v3796_v10 = vrot.slane %v3794_v39, 5  ;;  %v3829_v42 = vrot.slane %v3827_v12, 4  ;;  %v3819_v61 = vor.u32 %v3818_v25, %v3815_v22  ;;  %v3956_v39 = vld [vmem:[%s7577_s28 + $0x10] sm:$0xe] }
  0x89   : > { %v3791_v0 = vor.u32 %v3790_v54, %v3787_v46  ;;  %v3832_v44 = vrot.slane %v3830_v11, 5  ;;  %v3824_v28 = vrot.slane %v3822_v3, 5  ;;  %v5841_v18 = vrot.slane %v3954_v50, 9  ;;  %v7781_v56 = vld [vmem:[%s7026_s27 + $0x14] sm:$0x1] }
  0x8a   : > { %6290 = vmatpush3.bf16.msra.mxu1 %v6838_v49  ;;  %v3783_v45 = vsel %vm7069_vm3, %v3778_v53, %v3782_v38  ;;  %v3802_v49 = vshll.u32 %v3722_v34, 16  ;;  %v3955_v34 = vld [vmem:[%s7577_s28 + $0x8] sm:$0xe]  ;;  %v5843_v46 = vrot.slane %v3956_v39, 9  ;;  %v7796_v23 = vld [vmem:[%s7026_s27 + $0x24] sm:$0x1] }
  0x8b   : > { %6299 = vmatprep.subr.bf16.mxu1 %v7692_v31  ;;  %v5832_v52 = vcombine.low %v3769_v14, %v3783_v45  ;;  %v3792_v19 = vrot.slane %v3791_v0, 4  ;;  %v3833_v29 = vor.u32 %v3832_v44, %v3829_v42  ;;  %v5842_v47 = vrot.slane %v3955_v34, 9  ;;  %v5545_v11 = vld [vmem:[%s7026_s27 + $0x28] sm:$0xf]  ;;  %v7803_v22 = vld [vmem:[%s7026_s27 + $0x2c] sm:$0x1] }
  0x8c   : > { %v3804_v55 = vrot.slane %v3802_v49, 5  ;;  %v3981_v45 = vsel %vm7173_vm6, %v5841_v18, %v3980_v17  ;;  %v5539_v49 = vld [vmem:[%s7026_s27 + $0x10] sm:$0xf]  ;;  %v3989_v21 = vsel %vm7173_vm6, %v5843_v46, %v3988_v26  ;;  %v1568_v0 = vshll.u32 %v7781_v56, 16  ;;  %v3958_v50 = vld [vmem:[%s7577_s28 + $0x20] sm:$0xe] }
  0x8d   : > { %6284 = vmatmul.mubr.msk.bf16.gmra.mrb[4].mxu1 %vm508_vm2, %v5510_v8  ;;  %v3836_v8 = vshll.u32 %v7731_v63, 16  ;;  %v3797_v60 = vsel %vm7069_vm3, %v3792_v19, %v3796_v10  ;;  %v3834_v14 = vrot.slane %v3833_v29, 4  ;;  %v3985_v54 = vsel %vm7173_vm6, %v5842_v47, %v3984_v62  ;;  %v3959_v18 = vld [vmem:[%s7577_s28 + $0x28] sm:$0xe] }
  0x8e   : > { %6291 = vmatprep.mubr.msk.bf16.mxu1 %vm508_vm2, %v6840_v51  ;;  %v3805_v33 = vor.u32 %v3804_v55, %v3801_v57  ;;  %v7751_v51 = vld [vmem:[%s8388_s0 + $0x80] sm:$0xff]   ;;  %v5541_v57 = vld [vmem:[%s7026_s27 + $0x18] sm:$0xf]  ;;  %v1559_v17 = vshrl.u32 %v5539_v49, 16  ;;  %v5853_v37 = vcombine.low %v3981_v45, %v3985_v54  ;;  %v7788_v55 = vld [vmem:[%s7026_s27 + $0x1c] sm:$0x1] }
  0x8f   : > { %6448 = vmatmul.mubr.msk.bf16.vlgmr.msra.gmra.mrb[0].mxu0 %vm508_vm2, %v5832_v52  ;;  %v3838_v38 = vrot.slane %v3836_v8, 5  ;;  %v1562_v4 = vshll.u32 %v5539_v49, 16  ;;  %v1573_v27 = vshrl.u32 %v5541_v57, 16  ;;  %v1582_v12 = vshll.u32 %v7788_v55, 16 }
  0x90   : > { %6456 = vmatpush3.bf16.msra.mxu0 %v7648_v32  ;;  %v3806_v32 = vrot.slane %v3805_v33, 4  ;;  %v1561_v6 = vrot.slane %v1559_v17, 4  ;;  %v1576_v33 = vshll.u32 %v5541_v57, 16  ;;  %v1570_v8 = vrot.slane %v1568_v0, 5  ;;  %v3961_v17 = vld [vmem:[%s7577_s28 + $0x38] sm:$0xe] }
  0x91   : > { %6457 = vmatprep.subr.bf16.mxu0 %v6843_v58  ;;  %v3839_v52 = vsel %vm7069_vm3, %v3834_v14, %v3838_v38  ;;  %v1575_v19 = vrot.slane %v1573_v27, 4  ;;  %v1584_v44 = vrot.slane %v1582_v12, 5  ;;  %v5845_v14 = vrot.slane %v3958_v50, 9  ;;  %v5549_v27 = vld [vmem:[%s7026_s27 + $0x38] sm:$0xf] }
  0x92   : > { %v3811_v15 = vsel %vm7069_vm3, %v3806_v32, %v3810_v59  ;;  %v5543_v59 = vld [vmem:[%s7026_s27 + $0x20] sm:$0xf]  ;;  %v1578_v42 = vrot.slane %v1576_v33, 5  ;;  %v5846_v45 = vrot.slane %v3959_v18, 9  ;;  %v4000_v54 = vrot.slane %v7710_v35, 5 }
  0x93   : > { %v5833_v53 = vcombine.low %v3797_v60, %v3811_v15  ;;  %v1587_v25 = vshrl.u32 %v5543_v59, 16  ;;  %v1590_v26 = vshll.u32 %v5543_v59, 16  ;;  %v5848_v0 = vrot.slane %v3961_v17, 9  ;;  %v6851_v17 = vld [vmem:[%s7577_s28 + $0x8] ss:$8 sps:$4 sm:$0xff]  }
  0x94   : > { %6458 = vmatpush3.bf16.msra.mxu0 %v6843_v58  ;;  %v1579_v15 = vor.u32 %v1578_v42, %v1575_v19  ;;  %v4001_v59 = vsel %vm7173_vm6, %v5846_v45, %v4000_v54  ;;  %v5551_v19 = vld [vmem:[%s7026_s27 + $0x40] sm:$0xf] }
  0x95   : > { %6292 = vmatmul.mubr.msk.bf16.vlgmr.msra.gmra.mrb[0].mxu1 %vm508_vm2, %v6841_v13  ;;  %6467 = vmatprep.subr.bf16.mxu0 %v7742_v16  ;;  %v3957_v13 = vld [vmem:[%s7577_s28 + $0x18] sm:$0xe]  ;;  %v1592_v60 = vrot.slane %v1590_v26, 5  ;;  %v1643_v50 = vshrl.u32 %v5551_v19, 16 }
  0x96   : > { %6300 = vmatpush3.bf16.msra.mxu1 %v7692_v31  ;;  %6295 = vmatprep.mubr.msk.bf16.mxu1 %vm508_vm2, %v6844_v9  ;;  %v3820_v31 = vrot.slane %v3819_v61, 4  ;;  %v5844_v10 = vrot.slane %v3957_v13, 9  ;;  %v1596_v9 = vshll.u32 %v7796_v23, 16  ;;  %v1601_v61 = vshrl.u32 %v5545_v11, 16  ;;  %v6849_v13 = vld [vmem:[%s8388_s0 + $0x158] sm:$0xff]  }
  0x97   : > { %6301 = vmatprep.subr.bf16.mxu1 %v6846_v1  ;;  %6451 = vmatprep.mubr.msk.bf16.mxu0 %vm508_vm2, %v5833_v53  ;;  %v1580_v39 = vrot.slane %v1579_v15, 4  ;;  %v7860_v15 = vld [vmem:[%s7026_s27 + $0x4c] sm:$0x1] }
  0x98   : > { %v3825_v41 = vsel %vm7069_vm3, %v3820_v31, %v3824_v28  ;;  %v3993_v62 = vsel %vm7173_vm6, %v5844_v10, %v3992_v2  ;;  %v1589_v2 = vrot.slane %v1587_v25, 4  ;;  %v1604_v28 = vshll.u32 %v5545_v11, 16  ;;  %v3960_v10 = vld [vmem:[%s7577_s28 + $0x30] sm:$0xe]  ;;  %v6850_v25 = vld [vmem:[%s8388_s0 + $0x88] sm:$0xff]  }
  0x99   : > { %v5834_v58 = vcombine.low %v3825_v41, %v3839_v52  ;;  %v5854_v3 = vcombine.low %v3989_v21, %v3993_v62  ;;  %v1598_v29 = vrot.slane %v1596_v9, 5  ;;  %v1603_v31 = vrot.slane %v1601_v61, 4  ;;  %v5547_v62 = vld [vmem:[%s7026_s27 + $0x30] sm:$0xf]  ;;  %v7856_v9 = vld [vmem:[%s7026_s27 + $0x44] sm:$0x1] }
  0x9a   : > { %6302 = vmatpush3.bf16.msra.mxu1 %v6846_v1  ;;  %v1564_v1 = vrot.slane %v1562_v4, 5  ;;  %v1593_v53 = vor.u32 %v1592_v60, %v1589_v2  ;;  %v1606_v34 = vrot.slane %v1604_v28, 5  ;;  %v3997_v52 = vsel %vm7173_vm6, %v5845_v14, %v3996_v36  ;;  %v5553_v2 = vld [vmem:[%s7026_s27 + $0x48] sm:$0xf] }
  0x9b   : > { %6311 = vmatprep.subr.bf16.mxu1 %v7751_v51  ;;  %6452 = vmatmul.mubr.msk.bf16.gmra.mrb[4].mxu0 %vm508_vm2, %v5834_v58  ;;  %v1585_v57 = vsel %vm7069_vm3, %v1580_v39, %v1584_v44  ;;  %v5847_v58 = vrot.slane %v3960_v10, 9  ;;  %v4008_v21 = vrot.slane %v7731_v63, 5  ;;  %v5855_v63 = vcombine.low %v3997_v52, %v4001_v59  ;;  %v5569_v59 = vld [vmem:[%s7026_s27 + $0x10] sm:$0xe] }
  0x9c   : > { %6459 = vmatprep.mubr.msk.bf16.mxu0 %vm508_vm2, %v5853_v37  ;;  %v1565_v32 = vor.u32 %v1564_v1, %v1561_v6  ;;  %v1594_v46 = vrot.slane %v1593_v53, 4  ;;  %v1607_v49 = vor.u32 %v1606_v34, %v1603_v31  ;;  %v4004_v37 = vrot.slane %v7726_v7, 5  ;;  %v7831_v6 = vld [vmem:[%s7026_s27 + $0x34] sm:$0x1]  ;;  %v7836_v7 = vld [vmem:[%s8388_s0 + $0x160] sm:$0xff]  }
  0x9d   : > { %6296 = vmatmul.mubr.msk.bf16.gmra.mrb[4].mxu1 %vm508_vm2, %v6845_v5  ;;  %v1610_v5 = vshll.u32 %v7803_v22, 16  ;;  %v1615_v1 = vshrl.u32 %v5547_v62, 16  ;;  %v1618_v12 = vshll.u32 %v5547_v62, 16  ;;  %v1624_v11 = vshll.u32 %v7831_v6, 16 }
  0x9e   : > { %v1566_v38 = vrot.slane %v1565_v32, 4  ;;  %v1599_v35 = vsel %vm7069_vm3, %v1594_v46, %v1598_v29  ;;  %v1608_v36 = vrot.slane %v1607_v49, 4  ;;  %v4009_v32 = vsel %vm7173_vm6, %v5848_v0, %v4008_v21 }
  0x9f   : > { %v1612_v41 = vrot.slane %v1610_v5, 5  ;;  %v1617_v42 = vrot.slane %v1615_v1, 4  ;;  %v1632_v44 = vshll.u32 %v5549_v27, 16  ;;  %v1620_v61 = vrot.slane %v1618_v12, 5  ;;  %v6856_v1 = vld [vmem:[%s8388_s0 + $0x168] sm:$0xff]  }
  0xa0   : > { %v1571_v47 = vsel %vm7069_vm3, %v1566_v38, %v1570_v8  ;;  %v1629_v8 = vshrl.u32 %v5549_v27, 16  ;;  %v1626_v28 = vrot.slane %v1624_v11, 5  ;;  %v1646_v53 = vshll.u32 %v5551_v19, 16  ;;  %v5572_v19 = vld [vmem:[%s7026_s27 + $0x28] sm:$0xe] }
  0xa1   : > { %v5559_v4 = vcombine.low %v1571_v47, %v1585_v57  ;;  %v1613_v33 = vsel %vm7069_vm3, %v1608_v36, %v1612_v41  ;;  %v1634_v29 = vrot.slane %v1632_v44, 5  ;;  %v1621_v31 = vor.u32 %v1620_v61, %v1617_v42  ;;  %v6853_v36 = vld [vmem:[%s7577_s28 + $0x18] ss:$8 sps:$4 sm:$0xff]   ;;  %v6855_v61 = vld [vmem:[%s7577_s28 + $0x28] ss:$8 sps:$4 sm:$0xff]  }
  0xa2   : > { %v5560_v26 = vcombine.low %v1599_v35, %v1613_v33  ;;  %v1631_v38 = vrot.slane %v1629_v8, 4  ;;  %v1652_v34 = vshll.u32 %v7856_v9, 16  ;;  %v1657_v18 = vshrl.u32 %v5553_v2, 16  ;;  %v5571_v8 = vld [vmem:[%s7026_s27 + $0x20] sm:$0xe] }
  0xa3   : > { %6460 = vmatmul.mubr.msk.bf16.vlgmr.msra.gmra.mrb[0].mxu0 %vm508_vm2, %v5854_v3  ;;  %v7842_v3 = vld [vmem:[%s7026_s27 + $0x3c] sm:$0x1]  ;;  %6303 = vmatprep.mubr.msk.bf16.mxu1 %vm508_vm2, %v5559_v4  ;;  %v1660_v14 = vshll.u32 %v5553_v2, 16  ;;  %v1645_v41 = vrot.slane %v1643_v50, 4  ;;  %v1648_v45 = vrot.slane %v1646_v53, 5  ;;  %v1666_v57 = vshll.u32 %v7860_v15, 16 }
  0xa4   : > { %6468 = vmatpush3.bf16.msra.mxu0 %v7742_v16  ;;  %v4005_v16 = vsel %vm7173_vm6, %v5847_v58, %v4004_v37  ;;  %6463 = vmatprep.mubr.msk.bf16.mxu0 %vm508_vm2, %v5855_v63  ;;  %v1638_v5 = vshll.u32 %v7842_v3, 16  ;;  %v1635_v47 = vor.u32 %v1634_v29, %v1631_v38  ;;  %v1654_v46 = vrot.slane %v1652_v34, 5  ;;  %v5573_v29 = vld [vmem:[%s7026_s27 + $0x30] sm:$0xe]  ;;  %v5575_v34 = vld [vmem:[%s7026_s27 + $0x40] sm:$0xe] }
  0xa5   : > { %6469 = vmatprep.subr.bf16.mxu0 %v6849_v13  ;;  %v5856_v60 = vcombine.low %v4005_v16, %v4009_v32  ;;  %6304 = vmatmul.mubr.msk.bf16.vlgmr.msra.gmra.mrb[0].mxu1 %vm508_vm2, %v5560_v26  ;;  %v1659_v49 = vrot.slane %v1657_v18, 4  ;;  %v1662_v52 = vrot.slane %v1660_v14, 5  ;;  %v1649_v10 = vor.u32 %v1648_v45, %v1645_v41  ;;  %v5570_v16 = vld [vmem:[%s7026_s27 + $0x18] sm:$0xe]  ;;  %v5576_v18 = vld [vmem:[%s7026_s27 + $0x48] sm:$0xe] }
  0xa6   : > { %6312 = vmatpush3.bf16.msra.mxu1 %v7751_v51  ;;  %v1640_v39 = vrot.slane %v1638_v5, 5  ;;  %v1622_v51 = vrot.slane %v1621_v31, 4  ;;  %v1636_v54 = vrot.slane %v1635_v47, 4  ;;  %v1668_v35 = vrot.slane %v1666_v57, 5  ;;  %v6858_v57 = vld [vmem:[%s8388_s0 + $0x98] sm:$0xff]  }
  0xa7   : > { %6313 = vmatprep.subr.bf16.mxu1 %v6850_v25  ;;  %v1663_v37 = vor.u32 %v1662_v52, %v1659_v49  ;;  %v1650_v4 = vrot.slane %v1649_v10, 4  ;;  %v5577_v0 = vrot.slane %v5569_v59, 9  ;;  %v1810_v27 = vrot.slane %v7781_v56, 5 }
  0xa8   : > { %6470 = vmatpush3.bf16.msra.mxu0 %v6849_v13  ;;  %v7871_v13 = vld [vmem:[%s8388_s0 + $0x90] sm:$0xff]   ;;  %v1627_v58 = vsel %vm7069_vm3, %v1622_v51, %v1626_v28  ;;  %v1641_v21 = vsel %vm7069_vm3, %v1636_v54, %v1640_v39  ;;  %v5578_v12 = vrot.slane %v5570_v16, 9  ;;  %v1814_v11 = vrot.slane %v7788_v55, 5  ;;  %v6857_v28 = vld [vmem:[%s7577_s28 + $0x38] ss:$8 sps:$4 sm:$0xff]  }
  0xa9   : > { %6479 = vmatprep.subr.bf16.mxu0 %v7836_v7  ;;  %v5561_v62 = vcombine.low %v1627_v58, %v1641_v21  ;;  %v1664_v63 = vrot.slane %v1663_v37, 4  ;;  %v1655_v33 = vsel %vm7069_vm3, %v1650_v4, %v1654_v46  ;;  %v1811_v56 = vsel %vm7173_vm6, %v5577_v0, %v1810_v27  ;;  %v7932_v46 = vld [vmem:[%s7577_s28 + $0xc] sm:$0x1]  ;;  %v7939_v54 = vld [vmem:[%s7577_s28 + $0x14] sm:$0x1] }
  0xaa   : > { %6314 = vmatpush3.bf16.msra.mxu1 %v6850_v25  ;;  %v5579_v26 = vrot.slane %v5571_v8, 9  ;;  %v1818_v32 = vrot.slane %v7796_v23, 5  ;;  %v1815_v55 = vsel %vm7173_vm6, %v5578_v12, %v1814_v11  ;;  %v5580_v44 = vrot.slane %v5572_v19, 9  ;;  %v5889_v0 = vld [vmem:[%s7577_s28 + $0x18] sm:$0xf] }
  0xab   : > { %6464 = vmatmul.mubr.msk.bf16.gmra.mrb[4].mxu0 %vm508_vm2, %v5856_v60  ;;  %6323 = vmatprep.subr.bf16.mxu1 %v7871_v13  ;;  %v1669_v25 = vsel %vm7069_vm3, %v1664_v63, %v1668_v35  ;;  %v1822_v2 = vrot.slane %v7803_v22, 5  ;;  %v7906_v60 = vld [vmem:[%s8388_s0 + $0x170] sm:$0xff]   ;;  %v5589_v23 = vcombine.low %v1811_v56, %v1815_v55  ;;  %v1826_v5 = vrot.slane %v7831_v6, 5 }
  0xac   : > { %6471 = vmatprep.mubr.msk.bf16.mxu0 %vm508_vm2, %v6851_v17  ;;  %6307 = vmatprep.mubr.msk.bf16.mxu1 %vm508_vm2, %v5561_v62  ;;  %v5562_v42 = vcombine.low %v1655_v33, %v1669_v25  ;;  %v1819_v22 = vsel %vm7173_vm6, %v5579_v26, %v1818_v32  ;;  %v1830_v50 = vrot.slane %v7842_v3, 5  ;;  %v5581_v53 = vrot.slane %v5573_v29, 9  ;;  %v5885_v3 = vld [vmem:[%s7577_s28 + $0x8] sm:$0xf]  ;;  %v5891_v33 = vld [vmem:[%s7577_s28 + $0x20] sm:$0xf] }
  0xad   : > { %v1823_v38 = vsel %vm7173_vm6, %v5580_v44, %v1822_v2  ;;  %v5583_v14 = vrot.slane %v5575_v34, 9  ;;  %v1834_v47 = vrot.slane %v7856_v9, 5  ;;  %v5584_v39 = vrot.slane %v5576_v18, 9  ;;  %v5887_v9 = vld [vmem:[%s7577_s28 + $0x10] sm:$0xf] }
  0xae   : > { %6308 = vmatmul.mubr.msk.bf16.gmra.mrb[4].mxu1 %vm508_vm2, %v5562_v42  ;;  %v1838_v41 = vrot.slane %v7860_v15, 5  ;;  %v5590_v45 = vcombine.low %v1819_v22, %v1823_v38  ;;  %v1827_v51 = vsel %vm7173_vm6, %v5581_v53, %v1826_v5  ;;  %v4272_v15 = vshrl.u32 %v5885_v3, 16 }
  0xaf   : > { %6315 = vmatprep.mubr.msk.bf16.mxu1 %vm508_vm2, %v5589_v23  ;;  %v1835_v52 = vsel %vm7173_vm6, %v5583_v14, %v1834_v47  ;;  %v4275_v17 = vshll.u32 %v5885_v3, 16  ;;  %v4281_v58 = vshll.u32 %v7932_v46, 16  ;;  %v4286_v37 = vshrl.u32 %v5887_v9, 16  ;;  %v7986_v14 = vld [vmem:[%s7577_s28 + $0x2c] sm:$0x1] }
  0xb0   : > { %v1839_v10 = vsel %vm7173_vm6, %v5584_v39, %v1838_v41  ;;  %v7950_v21 = vrot.slane %v2737_v24, 5  ;;  %v4274_v4 = vrot.slane %v4272_v15, 4  ;;  %v4289_v35 = vshll.u32 %v5887_v9, 16  ;;  %v5895_v47 = vld [vmem:[%s7577_s28 + $0x30] sm:$0xf] }
  0xb1   : > { %v7955_v59 = vrot.slane %v2751_v48, 5  ;;  %v4277_v62 = vrot.slane %v4275_v17, 5  ;;  %v4283_v63 = vrot.slane %v4281_v58, 5  ;;  %v4288_v16 = vrot.slane %v4286_v37, 4  ;;  %v7966_v48 = vld [vmem:[%s7577_s28 + $0x24] sm:$0x1] }
  0xb2   : > { %v5592_v20 = vcombine.low %v1835_v52, %v1839_v10  ;;  %v4291_v24 = vrot.slane %v4289_v35, 5  ;;  %v4300_v12 = vshrl.u32 %v5889_v0, 16  ;;  %v4303_v11 = vshll.u32 %v5889_v0, 16  ;;  %v6861_v52 = vld [vmem:[%s7060_s8 + $0x10] ss:$8 sps:$4 sm:$0xff]   ;;  %v6866_v0 = vld [vmem:[%s8388_s0 + $0xa8] sm:$0xff]  }
  0xb3   : > { %6472 = vmatmul.mubr.msk.bf16.vlgmr.msra.gmra.mrb[0].mxu0 %vm508_vm2, %v6853_v36  ;;  %v4295_v36 = vshll.u32 %v7939_v54, 16  ;;  %v4278_v43 = vor.u32 %v4277_v62, %v4274_v4  ;;  %v4314_v25 = vshrl.u32 %v5891_v33, 16  ;;  %v4317_v56 = vshll.u32 %v5891_v33, 16  ;;  %v6863_v4 = vld [vmem:[%s8388_s0 + $0x178] sm:$0xff]  }
  0xb4   : > { %6480 = vmatpush3.bf16.msra.mxu0 %v7836_v7  ;;  %6475 = vmatprep.mubr.msk.bf16.mxu0 %vm508_vm2, %v6855_v61  ;;  %v5574_v7 = vld [vmem:[%s7026_s27 + $0x38] sm:$0xe]  ;;  %v4292_v19 = vor.u32 %v4291_v24, %v4288_v16  ;;  %v4323_v26 = vshll.u32 %v7966_v48, 16  ;;  %v4302_v42 = vrot.slane %v4300_v12, 4  ;;  %v4305_v55 = vrot.slane %v4303_v11, 5 }
  0xb5   : > { %6481 = vmatprep.subr.bf16.mxu0 %v6856_v1  ;;  %v5582_v31 = vrot.slane %v5574_v7, 9  ;;  %v4297_v27 = vrot.slane %v4295_v36, 5  ;;  %v4279_v32 = vrot.slane %v4278_v43, 4  ;;  %v4523_v44 = vrot.slane %v7932_v46, 5  ;;  %v8006_v16 = vld [vmem:[%s7577_s28 + $0x3c] sm:$0x1] }
  0xb6   : > { %6316 = vmatmul.mubr.msk.bf16.vlgmr.msra.gmra.mrb[0].mxu1 %vm508_vm2, %v5590_v45  ;;  %v4293_v2 = vrot.slane %v4292_v19, 4  ;;  %v4316_v23 = vrot.slane %v4314_v25, 4  ;;  %v4319_v61 = vrot.slane %v4317_v56, 5  ;;  %v4527_v22 = vrot.slane %v7939_v54, 5  ;;  %v7991_v45 = vld [vmem:[%s7577_s28 + $0x34] sm:$0x1] }
  0xb7   : > { %v1831_v6 = vsel %vm7173_vm6, %v5582_v31, %v1830_v50  ;;  %6324 = vmatpush3.bf16.msra.mxu1 %v7871_v13  ;;  %v7972_v13 = vld [vmem:[%s8388_s0 + $0xa0] sm:$0xff]   ;;  %v4284_v38 = vsel %vm7069_vm3, %v4279_v32, %v4283_v63  ;;  %v4306_v29 = vor.u32 %v4305_v55, %v4302_v42  ;;  %v4325_v5 = vrot.slane %v4323_v26, 5  ;;  %v5893_v31 = vld [vmem:[%s7577_s28 + $0x28] sm:$0xf]  ;;  %v5897_v63 = vld [vmem:[%s7577_s28 + $0x38] sm:$0xf] }
  0xb8   : > { %6482 = vmatpush3.bf16.msra.mxu0 %v6856_v1  ;;  %v5591_v49 = vcombine.low %v1827_v51, %v1831_v6  ;;  %v7962_v1 = vld [vmem:[%s7577_s28 + $0x1c] sm:$0x1]  ;;  %6325 = vmatprep.subr.bf16.mxu1 %v6858_v57  ;;  %v4298_v50 = vsel %vm7069_vm3, %v4293_v2, %v4297_v27  ;;  %v4320_v53 = vor.u32 %v4319_v61, %v4316_v23  ;;  %v4328_v39 = vshrl.u32 %v5893_v31, 16  ;;  %v5899_v24 = vld [vmem:[%s7577_s28 + $0x40] sm:$0xf] }
  0xb9   : > { %6491 = vmatprep.subr.bf16.mxu0 %v7906_v60  ;;  %v4309_v8 = vshll.u32 %v7962_v1, 16  ;;  %v5905_v34 = vcombine.low %v4284_v38, %v4298_v50  ;;  %v4307_v18 = vrot.slane %v4306_v29, 4  ;;  %v4331_v51 = vshll.u32 %v5893_v31, 16  ;;  %v8013_v27 = vld [vmem:[%s7577_s28 + $0x44] sm:$0x1] }
  0xba   : > { %6319 = vmatprep.mubr.msk.bf16.mxu1 %vm508_vm2, %v5591_v49  ;;  %v4321_v41 = vrot.slane %v4320_v53, 4  ;;  %v4337_v6 = vshll.u32 %v7986_v14, 16  ;;  %v4342_v3 = vshrl.u32 %v5895_v47, 16  ;;  %v4330_v9 = vrot.slane %v4328_v39, 4  ;;  %v8020_v25 = vld [vmem:[%s8388_s0 + $0x180] sm:$0xff]  }
  0xbb   : > { %6476 = vmatmul.mubr.msk.bf16.gmra.mrb[4].mxu0 %vm508_vm2, %v6857_v28  ;;  %6326 = vmatpush3.bf16.msra.mxu1 %v6858_v57  ;;  %v6860_v28 = vld [vmem:[%s7060_s8] ss:$8 sps:$4 sm:$0xff]   ;;  %v4311_v7 = vrot.slane %v4309_v8, 5  ;;  %v4345_v15 = vshll.u32 %v5895_v47, 16  ;;  %v4351_v10 = vshll.u32 %v7991_v45, 16  ;;  %v4333_v17 = vrot.slane %v4331_v51, 5 }
  0xbc   : > { %6335 = vmatprep.subr.bf16.mxu1 %v7972_v13  ;;  %6483 = vmatprep.mubr.msk.bf16.mxu0 %vm508_vm2, %v5905_v34  ;;  %v4326_v57 = vsel %vm7069_vm3, %v4321_v41, %v4325_v5  ;;  %v4339_v58 = vrot.slane %v4337_v6, 5  ;;  %v4344_v37 = vrot.slane %v4342_v3, 4  ;;  %v4356_v33 = vshrl.u32 %v5897_v63, 16  ;;  %v6865_v31 = vld [vmem:[%s7060_s8 + $0x30] ss:$8 sps:$4 sm:$0xff]  }
  0xbd   : > { %v4312_v49 = vsel %vm7069_vm3, %v4307_v18, %v4311_v7  ;;  %v4347_v36 = vrot.slane %v4345_v15, 5  ;;  %v4353_v62 = vrot.slane %v4351_v10, 5  ;;  %v4359_v43 = vshll.u32 %v5897_v63, 16  ;;  %v5916_v47 = vld [vmem:[%s7577_s28 + $0x10] sm:$0xe] }
  0xbe   : > { %6320 = vmatmul.mubr.msk.bf16.gmra.mrb[4].mxu1 %vm508_vm2, %v5592_v20  ;;  %v5906_v35 = vcombine.low %v4312_v49, %v4326_v57  ;;  %v4334_v20 = vor.u32 %v4333_v17, %v4330_v9  ;;  %v4365_v11 = vshll.u32 %v8006_v16, 16  ;;  %v4370_v8 = vshrl.u32 %v5899_v24, 16  ;;  %v5917_v49 = vld [vmem:[%s7577_s28 + $0x18] sm:$0xe]  ;;  %v2084_v57 = vld [vmem:[%s7060_s8] sm:$0xf] }
  0xbf   : > { %6327 = vmatprep.mubr.msk.bf16.mxu1 %vm508_vm2, %v6860_v28  ;;  %v4348_v12 = vor.u32 %v4347_v36, %v4344_v37  ;;  %v4373_v19 = vshll.u32 %v5899_v24, 16  ;;  %v4358_v26 = vrot.slane %v4356_v33, 4  ;;  %v4361_v32 = vrot.slane %v4359_v43, 5  ;;  %v6864_v28 = vld [vmem:[%s7060_s8 + $0x20] ss:$8 sps:$4 sm:$0xff]  }
  0xc0   : > { %v4335_v56 = vrot.slane %v4334_v20, 4  ;;  %v4379_v42 = vshll.u32 %v8013_v27, 16  ;;  %v4367_v2 = vrot.slane %v4365_v11, 5  ;;  %v4372_v23 = vrot.slane %v4370_v8, 4  ;;  %v8061_v17 = vld [vmem:[%s7060_s8 + $0x4] sm:$0x1] }
  0xc1   : > { %v4349_v55 = vrot.slane %v4348_v12, 4  ;;  %v4375_v61 = vrot.slane %v4373_v19, 5  ;;  %v4362_v29 = vor.u32 %v4361_v32, %v4358_v26  ;;  %v4531_v5 = vrot.slane %v7962_v1, 5  ;;  %v2086_v46 = vld [vmem:[%s7060_s8 + $0x8] sm:$0xf] }
  0xc2   : > { %v4340_v38 = vsel %vm7069_vm3, %v4335_v56, %v4339_v58  ;;  %v4381_v7 = vrot.slane %v4379_v42, 5  ;;  %v4535_v39 = vrot.slane %v7966_v48, 5  ;;  %v5924_v51 = vrot.slane %v5916_v47, 9  ;;  %v2088_v63 = vld [vmem:[%s7060_s8 + $0x10] sm:$0xf] }
  0xc3   : > { %6484 = vmatmul.mubr.msk.bf16.vlgmr.msra.gmra.mrb[0].mxu0 %vm508_vm2, %v5906_v35  ;;  %v4354_v50 = vsel %vm7069_vm3, %v4349_v55, %v4353_v62  ;;  %v4376_v53 = vor.u32 %v4375_v61, %v4372_v23  ;;  %v4363_v18 = vrot.slane %v4362_v29, 4  ;;  %v4539_v6 = vrot.slane %v7986_v14, 5  ;;  %v8066_v35 = vld [vmem:[%s7060_s8 + $0xc] sm:$0x1]  ;;  %v8078_v43 = vld [vmem:[%s7060_s8 + $0x14] sm:$0x1] }
  0xc4   : > { %6492 = vmatpush3.bf16.msra.mxu0 %v7906_v60  ;;  %v8029_v60 = vld [vmem:[%s8388_s0 + $0xb0] sm:$0xff]   ;;  %v5907_v34 = vcombine.low %v4340_v38, %v4354_v50  ;;  %v4528_v15 = vsel %vm7173_vm6, %v5924_v51, %v4527_v22  ;;  %v5925_v10 = vrot.slane %v5917_v49, 9  ;;  %v2104_v22 = vshll.u32 %v2084_v57, 16  ;;  %v2090_v56 = vld [vmem:[%s7060_s8 + $0x18] sm:$0xf] }
  0xc5   : > { %6493 = vmatprep.subr.bf16.mxu0 %v6863_v4  ;;  %v4377_v1 = vrot.slane %v4376_v53, 4  ;;  %v4368_v3 = vsel %vm7069_vm3, %v4363_v18, %v4367_v2  ;;  %v2110_v36 = vshll.u32 %v8061_v17, 16  ;;  %v2115_v62 = vshrl.u32 %v2086_v46, 16  ;;  %v8083_v42 = vld [vmem:[%s7060_s8 + $0x1c] sm:$0x1] }
  0xc6   : > { %6328 = vmatmul.mubr.msk.bf16.vlgmr.msra.gmra.mrb[0].mxu1 %vm508_vm2, %v6861_v52  ;;  %6487 = vmatprep.mubr.msk.bf16.mxu0 %vm508_vm2, %v5907_v34  ;;  %v5918_v52 = vld [vmem:[%s7577_s28 + $0x20] sm:$0xe]  ;;  %v4532_v54 = vsel %vm7173_vm6, %v5925_v10, %v4531_v5  ;;  %v2118_v24 = vshll.u32 %v2086_v46, 16  ;;  %v2124_v33 = vshll.u32 %v8066_v35, 16  ;;  %v2106_v11 = vrot.slane %v2104_v22, 5 }
  0xc7   : > { %6336 = vmatpush3.bf16.msra.mxu1 %v7972_v13  ;;  %6331 = vmatprep.mubr.msk.bf16.mxu1 %vm508_vm2, %v6864_v28  ;;  %v5915_v13 = vld [vmem:[%s7577_s28 + $0x8] sm:$0xe]  ;;  %v4382_v48 = vsel %vm7069_vm3, %v4377_v1, %v4381_v7  ;;  %v2112_v8 = vrot.slane %v2110_v36, 5  ;;  %v2117_v19 = vrot.slane %v2115_v62, 4  ;;  %v2129_v55 = vshrl.u32 %v2088_v63, 16 }
  0xc8   : > { %6337 = vmatprep.subr.bf16.mxu1 %v6866_v0  ;;  %6494 = vmatpush3.bf16.msra.mxu0 %v6863_v4  ;;  %v5923_v41 = vrot.slane %v5915_v13, 9  ;;  %v5908_v58 = vcombine.low %v4368_v3, %v4382_v48  ;;  %v5926_v4 = vrot.slane %v5918_v52, 9  ;;  %v2120_v26 = vrot.slane %v2118_v24, 5  ;;  %v5919_v13 = vld [vmem:[%s7577_s28 + $0x28] sm:$0xe] }
  0xc9   : > { %6503 = vmatprep.subr.bf16.mxu0 %v8020_v25  ;;  %v2126_v32 = vrot.slane %v2124_v33, 5  ;;  %v2132_v2 = vshll.u32 %v2088_v63, 16  ;;  %v2138_v61 = vshll.u32 %v8078_v43, 16  ;;  %v2143_v28 = vshrl.u32 %v2090_v56, 16  ;;  %v6869_v3 = vld [vmem:[%s8388_s0 + $0x188] sm:$0xff]   ;;  %v6870_v63 = vld [vmem:[%s8388_s0 + $0xb8] sm:$0xff]  }
  0xca   : > { %v4524_v9 = vsel %vm7173_vm6, %v5923_v41, %v4523_v44  ;;  %v2101_v44 = vshrl.u32 %v2084_v57, 16  ;;  %v2146_v38 = vshll.u32 %v2090_v56, 16  ;;  %v2121_v29 = vor.u32 %v2120_v26, %v2117_v19  ;;  %v5920_v41 = vld [vmem:[%s7577_s28 + $0x30] sm:$0xe]  ;;  %v2092_v22 = vld [vmem:[%s7060_s8 + $0x20] sm:$0xf] }
  0xcb   : > { %6338 = vmatpush3.bf16.msra.mxu1 %v6866_v0  ;;  %v5935_v37 = vcombine.low %v4524_v9, %v4528_v15  ;;  %6488 = vmatmul.mubr.msk.bf16.gmra.mrb[4].mxu0 %vm508_vm2, %v5908_v58  ;;  %v4536_v0 = vsel %vm7173_vm6, %v5926_v4, %v4535_v39  ;;  %v2131_v7 = vrot.slane %v2129_v55, 4  ;;  %v2134_v5 = vrot.slane %v2132_v2, 5  ;;  %v5921_v58 = vld [vmem:[%s7577_s28 + $0x38] sm:$0xe]  ;;  %v8110_v14 = vld [vmem:[%s7060_s8 + $0x24] sm:$0x1] }
  0xcc   : > { %6347 = vmatprep.subr.bf16.mxu1 %v8029_v60  ;;  %v2103_v20 = vrot.slane %v2101_v44, 4  ;;  %v5936_v12 = vcombine.low %v4532_v54, %v4536_v0  ;;  %v2152_v50 = vshll.u32 %v8083_v42, 16  ;;  %v2145_v34 = vrot.slane %v2143_v28, 4  ;;  %v8122_v0 = vld [vmem:[%s8388_s0 + $0x190] sm:$0xff]   ;;  %v8130_v24 = vld [vmem:[%s7060_s8 + $0x2c] sm:$0x1] }
  0xcd   : > { %6495 = vmatprep.mubr.msk.bf16.mxu0 %vm508_vm2, %v5935_v37  ;;  %v2148_v18 = vrot.slane %v2146_v38, 5  ;;  %v2122_v47 = vrot.slane %v2121_v29, 4  ;;  %v2135_v39 = vor.u32 %v2134_v5, %v2131_v7  ;;  %v5927_v51 = vrot.slane %v5919_v13, 9  ;;  %v5922_v37 = vld [vmem:[%s7577_s28 + $0x40] sm:$0xe] }
  0xce   : > { %6332 = vmatmul.mubr.msk.bf16.gmra.mrb[4].mxu1 %vm508_vm2, %v6865_v31  ;;  %v2107_v23 = vor.u32 %v2106_v11, %v2103_v20  ;;  %v2140_v31 = vrot.slane %v2138_v61, 5  ;;  %v2154_v1 = vrot.slane %v2152_v50, 5  ;;  %v5928_v48 = vrot.slane %v5920_v41, 9  ;;  %v2096_v11 = vld [vmem:[%s7060_s8 + $0x30] sm:$0xf]  ;;  %v8152_v13 = vld [vmem:[%s8388_s0 + $0xc0] sm:$0xff]  }
  0xcf   : > { %v2149_v52 = vor.u32 %v2148_v18, %v2145_v34  ;;  %v4543_v9 = vrot.slane %v7991_v45, 5  ;;  %v2127_v15 = vsel %vm7069_vm3, %v2122_v47, %v2126_v32  ;;  %v2136_v10 = vrot.slane %v2135_v39, 4  ;;  %v8138_v32 = vld [vmem:[%s7060_s8 + $0x34] sm:$0x1]  ;;  %v2098_v55 = vld [vmem:[%s7060_s8 + $0x38] sm:$0xf] }
  0xd0   : > { %v2108_v53 = vrot.slane %v2107_v23, 4  ;;  %v4540_v57 = vsel %vm7173_vm6, %v5927_v51, %v4539_v6  ;;  %v4547_v4 = vrot.slane %v8006_v16, 5  ;;  %v5929_v54 = vrot.slane %v5921_v58, 9  ;;  %v8142_v38 = vld [vmem:[%s7060_s8 + $0x3c] sm:$0x1] }
  0xd1   : > { %v2150_v45 = vrot.slane %v2149_v52, 4  ;;  %v4544_v44 = vsel %vm7173_vm6, %v5928_v48, %v4543_v9  ;;  %v2141_v6 = vsel %vm7069_vm3, %v2136_v10, %v2140_v31  ;;  %v5930_v62 = vrot.slane %v5922_v37, 9  ;;  %v6871_v52 = vld [vmem:[%s7577_s28 + $0x10] ss:$8 sps:$4 sm:$0xff]  }
  0xd2   : > { %v2113_v49 = vsel %vm7069_vm3, %v2108_v53, %v2112_v8  ;;  %v5937_v36 = vcombine.low %v4540_v57, %v4544_v44  ;;  %v4551_v16 = vrot.slane %v8013_v27, 5  ;;  %v4548_v27 = vsel %vm7173_vm6, %v5929_v54, %v4547_v4  ;;  %v6873_v44 = vld [vmem:[%s7577_s28 + $0x20] ss:$8 sps:$4 sm:$0xff]  }
  0xd3   : > { %6496 = vmatmul.mubr.msk.bf16.vlgmr.msra.gmra.mrb[0].mxu0 %vm508_vm2, %v5936_v12  ;;  %v5617_v46 = vcombine.low %v2113_v49, %v2127_v15  ;;  %v2155_v20 = vsel %vm7069_vm3, %v2150_v45, %v2154_v1  ;;  %v2157_v33 = vshrl.u32 %v2092_v22, 16  ;;  %v2160_v12 = vshll.u32 %v2092_v22, 16 }
  0xd4   : > { %6504 = vmatpush3.bf16.msra.mxu0 %v8020_v25  ;;  %v2094_v25 = vld [vmem:[%s7060_s8 + $0x28] sm:$0xf]  ;;  %v5618_v8 = vcombine.low %v2141_v6, %v2155_v20  ;;  %6499 = vmatprep.mubr.msk.bf16.mxu0 %vm508_vm2, %v5937_v36  ;;  %v4552_v19 = vsel %vm7173_vm6, %v5930_v62, %v4551_v16  ;;  %v2166_v56 = vshll.u32 %v8110_v14, 16  ;;  %v2180_v5 = vshll.u32 %v8130_v24, 16  ;;  %v2326_v6 = vld [vmem:[%s7060_s8] sm:$0xe] }
  0xd5   : > { %6505 = vmatprep.subr.bf16.mxu0 %v6869_v3  ;;  %6339 = vmatprep.mubr.msk.bf16.mxu1 %vm508_vm2, %v5617_v46  ;;  %v2171_v26 = vshrl.u32 %v2094_v25, 16  ;;  %v5938_v2 = vcombine.low %v4548_v27, %v4552_v19  ;;  %v2159_v23 = vrot.slane %v2157_v33, 4  ;;  %v2162_v61 = vrot.slane %v2160_v12, 5  ;;  %v2327_v36 = vld [vmem:[%s7060_s8 + $0x8] sm:$0xe] }
  0xd6   : > { %v2174_v28 = vshll.u32 %v2094_v25, 16  ;;  %6340 = vmatmul.mubr.msk.bf16.vlgmr.msra.gmra.mrb[0].mxu1 %vm508_vm2, %v5618_v8  ;;  %v2168_v29 = vrot.slane %v2166_v56, 5  ;;  %v2185_v50 = vshrl.u32 %v2096_v11, 16  ;;  %v2188_v34 = vshll.u32 %v2096_v11, 16  ;;  %v2328_v20 = vld [vmem:[%s7060_s8 + $0x10] sm:$0xe] }
  0xd7   : > { %v2173_v7 = vrot.slane %v2171_v26, 4  ;;  %6348 = vmatpush3.bf16.msra.mxu1 %v8029_v60  ;;  %v2163_v53 = vor.u32 %v2162_v61, %v2159_v23  ;;  %v2194_v18 = vshll.u32 %v8138_v32, 16  ;;  %v2182_v47 = vrot.slane %v2180_v5, 5  ;;  %v2329_v33 = vld [vmem:[%s7060_s8 + $0x18] sm:$0xe] }
  0xd8   : > { %6506 = vmatpush3.bf16.msra.mxu0 %v6869_v3  ;;  %v2176_v31 = vrot.slane %v2174_v28, 5  ;;  %v2187_v39 = vrot.slane %v2185_v50, 4  ;;  %v2199_v1 = vshrl.u32 %v2098_v55, 16  ;;  %v2202_v41 = vshll.u32 %v2098_v55, 16  ;;  %6349 = vmatprep.subr.bf16.mxu1 %v6870_v63  ;;  %v6877_v28 = vld [vmem:[%s7577_s28 + $0x40] ss:$8 sps:$4 sm:$0xff]  }
  0xd9   : > { %6515 = vmatprep.subr.bf16.mxu0 %v8122_v0  ;;  %v2164_v51 = vrot.slane %v2163_v53, 4  ;;  %v2190_v3 = vrot.slane %v2188_v34, 5  ;;  %v2196_v49 = vrot.slane %v2194_v18, 5  ;;  %v2208_v15 = vshll.u32 %v8142_v38, 16  ;;  %v2332_v53 = vld [vmem:[%s7060_s8 + $0x30] sm:$0xe] }
  0xda   : > { %v2177_v60 = vor.u32 %v2176_v31, %v2173_v7  ;;  %v2201_v48 = vrot.slane %v2199_v1, 4  ;;  %v2204_v9 = vrot.slane %v2202_v41, 5  ;;  %v2352_v10 = vrot.slane %v8061_v17, 5  ;;  %v2331_v7 = vld [vmem:[%s7060_s8 + $0x28] sm:$0xe] }
  0xdb   : > { %6500 = vmatmul.mubr.msk.bf16.gmra.mrb[4].mxu0 %vm508_vm2, %v5938_v2  ;;  %v2169_v57 = vsel %vm7069_vm3, %v2164_v51, %v2168_v29  ;;  %v2191_v37 = vor.u32 %v2190_v3, %v2187_v39  ;;  %6350 = vmatpush3.bf16.msra.mxu1 %v6870_v63  ;;  %v2356_v4 = vrot.slane %v8066_v35, 5  ;;  %v2210_v45 = vrot.slane %v2208_v15, 5  ;;  %v6875_v2 = vld [vmem:[%s7577_s28 + $0x30] ss:$8 sps:$4 sm:$0xff]   ;;  %v2330_v29 = vld [vmem:[%s7060_s8 + $0x20] sm:$0xe] }
  0xdc   : > { %v2178_v58 = vrot.slane %v2177_v60, 4  ;;  %6507 = vmatprep.mubr.msk.bf16.mxu0 %vm508_vm2, %v6871_v52  ;;  %v2205_v46 = vor.u32 %v2204_v9, %v2201_v48  ;;  %v2360_v54 = vrot.slane %v8078_v43, 5  ;;  %6359 = vmatprep.subr.bf16.mxu1 %v8152_v13  ;;  %v2364_v62 = vrot.slane %v8083_v42, 5  ;;  %v6876_v43 = vld [vmem:[%s8388_s0 + $0x198] sm:$0xff]   ;;  %v5967_v51 = vld [vmem:[%s7577_s28 + $0x10] sm:$0xf] }
  0xdd   : > { %v2192_v22 = vrot.slane %v2191_v37, 4  ;;  %v5627_v63 = vrot.slane %v2326_v6, 9  ;;  %v5628_v35 = vrot.slane %v2327_v36, 9  ;;  %v5629_v12 = vrot.slane %v2328_v20, 9  ;;  %v2333_v34 = vld [vmem:[%s7060_s8 + $0x38] sm:$0xe] }
  0xde   : > { %v2183_v17 = vsel %vm7069_vm3, %v2178_v58, %v2182_v47  ;;  %v2206_v25 = vrot.slane %v2205_v46, 4  ;;  %v2368_v11 = vrot.slane %v8110_v14, 5  ;;  %v5630_v56 = vrot.slane %v2329_v33, 9  ;;  %v8189_v14 = vld [vmem:[%s8388_s0 + $0x1a0] sm:$0xff]   ;;  %v8219_v3 = vld [vmem:[%s7577_s28 + $0x14] sm:$0x1] }
  0xdf   : > { %v5619_v16 = vcombine.low %v2169_v57, %v2183_v17  ;;  %v2197_v27 = vsel %vm7069_vm3, %v2192_v22, %v2196_v49  ;;  %v2353_v8 = vsel %vm7173_vm6, %v5627_v63, %v2352_v10  ;;  %v2357_v19 = vsel %vm7173_vm6, %v5628_v35, %v2356_v4  ;;  %v5969_v49 = vld [vmem:[%s7577_s28 + $0x18] sm:$0xf]  ;;  %v6878_v57 = vld [vmem:[%s8388_s0 + $0xc8] sm:$0xff]   ;;  %v5971_v17 = vld [vmem:[%s7577_s28 + $0x20] sm:$0xf] }
  0xe0   : > { %v2211_v42 = vsel %vm7069_vm3, %v2206_v25, %v2210_v45  ;;  %v5639_v55 = vcombine.low %v2353_v8, %v2357_v19  ;;  %v2361_v23 = vsel %vm7173_vm6, %v5629_v12, %v2360_v54  ;;  %v2365_v61 = vsel %vm7173_vm6, %v5630_v56, %v2364_v62  ;;  %v8238_v62 = vld [vmem:[%s7577_s28 + $0x24] sm:$0x1]  ;;  %v5973_v63 = vld [vmem:[%s7577_s28 + $0x28] sm:$0xf]  ;;  %v8244_v35 = vld [vmem:[%s7577_s28 + $0x2c] sm:$0x1] }
  0xe1   : > { %6343 = vmatprep.mubr.msk.bf16.mxu1 %vm508_vm2, %v5619_v16  ;;  %v5620_v26 = vcombine.low %v2197_v27, %v2211_v42  ;;  %v5632_v5 = vrot.slane %v2331_v7, 9  ;;  %v2372_v50 = vrot.slane %v8130_v24, 5  ;;  %v2376_v31 = vrot.slane %v8138_v32, 5  ;;  %v8215_v24 = vld [vmem:[%s7060_s8 + $0x2c] sm:$0x1] }
  0xe2   : > { %v5633_v18 = vrot.slane %v2332_v53, 9  ;;  %v2380_v47 = vrot.slane %v8142_v38, 5  ;;  %v5634_v41 = vrot.slane %v2333_v34, 9  ;;  %v2709_v60 = vshll.u32 %v8215_v24, 16  ;;  %v8223_v38 = vld [vmem:[%s7577_s28 + $0x1c] sm:$0x1] }
  0xe3   : > { %6508 = vmatmul.mubr.msk.bf16.vlgmr.msra.gmra.mrb[0].mxu0 %vm508_vm2, %v6873_v44  ;;  %6344 = vmatmul.mubr.msk.bf16.gmra.mrb[4].mxu1 %vm508_vm2, %v5620_v26  ;;  %v2373_v1 = vsel %vm7173_vm6, %v5632_v5, %v2372_v50  ;;  %v5640_v32 = vcombine.low %v2361_v23, %v2365_v61  ;;  %v4815_v48 = vshrl.u32 %v5967_v51, 16  ;;  %v4818_v9 = vshll.u32 %v5967_v51, 16  ;;  %v6886_v5 = vld [vmem:[%s8388_s0 + $0xd0] sm:$0xff]  }
  0xe4   : > { %6516 = vmatpush3.bf16.msra.mxu0 %v8122_v0  ;;  %6511 = vmatprep.mubr.msk.bf16.mxu0 %vm508_vm2, %v6875_v2  ;;  %v5631_v0 = vrot.slane %v2330_v29, 9  ;;  %v4824_v15 = vshll.u32 %v8219_v3, 16  ;;  %v2377_v10 = vsel %vm7173_vm6, %v5633_v18, %v2376_v31  ;;  %v4829_v58 = vshrl.u32 %v5969_v49, 16  ;;  %v5975_v50 = vld [vmem:[%s7577_s28 + $0x30] sm:$0xf] }
  0xe5   : > { %6517 = vmatprep.subr.bf16.mxu0 %v6876_v43  ;;  %6351 = vmatprep.mubr.msk.bf16.mxu1 %vm508_vm2, %v5639_v55  ;;  %v4832_v37 = vshll.u32 %v5969_v49, 16  ;;  %v4838_v4 = vshll.u32 %v8223_v38, 16  ;;  %v2381_v46 = vsel %vm7173_vm6, %v5634_v41, %v2380_v47  ;;  %v4817_v45 = vrot.slane %v4815_v48, 4  ;;  %v8258_v53 = vld [vmem:[%s7577_s28 + $0x34] sm:$0x1] }
  0xe6   : > { %v2369_v39 = vsel %vm7173_vm6, %v5631_v0, %v2368_v11  ;;  %v4820_v44 = vrot.slane %v4818_v9, 5  ;;  %v4826_v54 = vrot.slane %v4824_v15, 5  ;;  %v4831_v22 = vrot.slane %v4829_v58, 4  ;;  %v5977_v47 = vld [vmem:[%s7577_s28 + $0x38] sm:$0xf] }
  0xe7   : > { %v5641_v52 = vcombine.low %v2369_v39, %v2373_v1  ;;  %v4834_v6 = vrot.slane %v4832_v37, 5  ;;  %v4840_v36 = vrot.slane %v4838_v4, 5  ;;  %v4843_v16 = vshrl.u32 %v5971_v17, 16  ;;  %v8263_v39 = vld [vmem:[%s7577_s28 + $0x3c] sm:$0x1] }
  0xe8   : > { %6518 = vmatpush3.bf16.msra.mxu0 %v6876_v43  ;;  %v4821_v25 = vor.u32 %v4820_v44, %v4817_v45  ;;  %v4846_v20 = vshll.u32 %v5971_v17, 16  ;;  %v4852_v43 = vshll.u32 %v8238_v62, 16  ;;  %v4857_v12 = vshrl.u32 %v5973_v63, 16  ;;  %v5979_v45 = vld [vmem:[%s7577_s28 + $0x40] sm:$0xf] }
  0xe9   : > { %6527 = vmatprep.subr.bf16.mxu0 %v8189_v14  ;;  %v4835_v27 = vor.u32 %v4834_v6, %v4831_v22  ;;  %v4845_v33 = vrot.slane %v4843_v16, 4  ;;  %v4860_v11 = vshll.u32 %v5973_v63, 16  ;;  %v5642_v42 = vcombine.low %v2377_v10, %v2381_v46  ;;  %v6882_v46 = vld [vmem:[%s8388_s0 + $0x1a8] sm:$0xff]   ;;  %v8280_v22 = vld [vmem:[%s7577_s28 + $0x44] sm:$0x1] }
  0xea   : > { %v4822_v8 = vrot.slane %v4821_v25, 4  ;;  %v4848_v19 = vrot.slane %v4846_v20, 5  ;;  %v4854_v26 = vrot.slane %v4852_v43, 5  ;;  %v4859_v55 = vrot.slane %v4857_v12, 4  ;;  %v5981_v6 = vld [vmem:[%s7577_s28 + $0x48] sm:$0xf] }
  0xeb   : > { %6512 = vmatmul.mubr.msk.bf16.gmra.mrb[4].mxu0 %vm508_vm2, %v6877_v28  ;;  %6352 = vmatmul.mubr.msk.bf16.vlgmr.msra.gmra.mrb[0].mxu1 %vm508_vm2, %v5640_v32  ;;  %v4836_v56 = vrot.slane %v4835_v27, 4  ;;  %v4862_v2 = vrot.slane %v4860_v11, 5  ;;  %v6880_v28 = vld [vmem:[%s7060_s8 + $0x8] ss:$8 sps:$4 sm:$0xff]   ;;  %v5066_v31 = vrot.slane %v8219_v3, 5  ;;  %v4871_v1 = vshrl.u32 %v5975_v50, 16 }
  0xec   : > { %6360 = vmatpush3.bf16.msra.mxu1 %v8152_v13  ;;  %6355 = vmatprep.mubr.msk.bf16.mxu1 %vm508_vm2, %v5641_v52  ;;  %v4866_v13 = vshll.u32 %v8244_v35, 16  ;;  %v4827_v23 = vsel %vm7069_vm3, %v4822_v8, %v4826_v54  ;;  %v4849_v61 = vor.u32 %v4848_v19, %v4845_v33  ;;  %v4874_v51 = vshll.u32 %v5975_v50, 16  ;;  %v8284_v16 = vld [vmem:[%s7577_s28 + $0x4c] sm:$0x1] }
  0xed   : > { %6361 = vmatprep.subr.bf16.mxu1 %v6878_v57  ;;  %v4841_v29 = vsel %vm7069_vm3, %v4836_v56, %v4840_v36  ;;  %v4863_v7 = vor.u32 %v4862_v2, %v4859_v55  ;;  %v4880_v32 = vshll.u32 %v8258_v53, 16  ;;  %v4885_v49 = vshrl.u32 %v5977_v47, 16  ;;  %v6883_v55 = vld [vmem:[%s7060_s8 + $0x28] ss:$8 sps:$4 sm:$0xff]  }
  0xee   : > { %v4868_v0 = vrot.slane %v4866_v13, 5  ;;  %v5987_v34 = vcombine.low %v4827_v23, %v4841_v29  ;;  %v4850_v18 = vrot.slane %v4849_v61, 4  ;;  %v4873_v48 = vrot.slane %v4871_v1, 4  ;;  %v6000_v1 = vld [vmem:[%s7577_s28 + $0x28] sm:$0xe] }
  0xef   : > { %v4864_v41 = vrot.slane %v4863_v7, 4  ;;  %v4888_v9 = vshll.u32 %v5977_v47, 16  ;;  %v4894_v15 = vshll.u32 %v8263_v39, 16  ;;  %v4876_v58 = vrot.slane %v4874_v51, 5  ;;  %v5997_v7 = vld [vmem:[%s7577_s28 + $0x10] sm:$0xe] }
  0xf0   : > { %6362 = vmatpush3.bf16.msra.mxu1 %v6878_v57  ;;  %6519 = vmatprep.mubr.msk.bf16.mxu0 %vm508_vm2, %v5987_v34  ;;  %v4855_v52 = vsel %vm7069_vm3, %v4850_v18, %v4854_v26  ;;  %v6881_v57 = vld [vmem:[%s7060_s8 + $0x18] ss:$8 sps:$4 sm:$0xff]   ;;  %v4882_v37 = vrot.slane %v4880_v32, 5  ;;  %v4887_v4 = vrot.slane %v4885_v49, 4  ;;  %v4899_v25 = vshrl.u32 %v5979_v45, 16 }
  0xf1   : > { %6539 = vmatprep.subr.bf16.mxu1 %v6886_v5  ;;  %v4869_v10 = vsel %vm7069_vm3, %v4864_v41, %v4868_v0  ;;  %v4890_v54 = vrot.slane %v4888_v9, 5  ;;  %v4896_v17 = vrot.slane %v4894_v15, 5  ;;  %v4877_v36 = vor.u32 %v4876_v58, %v4873_v48  ;;  %v5998_v0 = vld [vmem:[%s7577_s28 + $0x18] sm:$0xe] }
  0xf2   : > { %v5988_v44 = vcombine.low %v4855_v52, %v4869_v10  ;;  %v4902_v63 = vshll.u32 %v5979_v45, 16  ;;  %v4908_v20 = vshll.u32 %v8280_v22, 16  ;;  %v4913_v27 = vshrl.u32 %v5981_v6, 16  ;;  %v6887_v18 = vld [vmem:[%s8388_s0 + $0xd8] sm:$0xff]   ;;  %v5679_v52 = vld [vmem:[%s7060_s8 + $0x28] sm:$0xf] }
  0xf3   : > { %6356 = vmatmul.mubr.msk.bf16.gmra.mrb[4].mxu1 %vm508_vm2, %v5642_v42  ;;  %v4891_v43 = vor.u32 %v4890_v54, %v4887_v4  ;;  %v4916_v33 = vshll.u32 %v5981_v6, 16  ;;  %v4922_v12 = vshll.u32 %v8284_v16, 16  ;;  %v4878_v11 = vrot.slane %v4877_v36, 4  ;;  %v6884_v9 = vld [vmem:[%s7060_s8 + $0x38] ss:$8 sps:$4 sm:$0xff]  }
  0xf4   : > { %6363 = vmatprep.mubr.msk.bf16.mxu1 %vm508_vm2, %v6880_v28  ;;  %6520 = vmatmul.mubr.msk.bf16.vlgmr.msra.gmra.mrb[0].mxu0 %vm508_vm2, %v5988_v44  ;;  %v4901_v42 = vrot.slane %v4899_v25, 4  ;;  %v4904_v8 = vrot.slane %v4902_v63, 5  ;;  %v5070_v19 = vrot.slane %v8223_v38, 5  ;;  %v4915_v56 = vrot.slane %v4913_v27, 4  ;;  %v5685_v45 = vld [vmem:[%s7060_s8 + $0x40] sm:$0xf] }
  0xf5   : > { %6528 = vmatpush3.bf16.msra.mxu0 %v8189_v14  ;;  %v4892_v13 = vrot.slane %v4891_v43, 4  ;;  %v4918_v26 = vrot.slane %v4916_v33, 5  ;;  %v5074_v2 = vrot.slane %v8238_v62, 5  ;;  %v4883_v14 = vsel %vm7069_vm3, %v4878_v11, %v4882_v37  ;;  %v5999_v62 = vld [vmem:[%s7577_s28 + $0x20] sm:$0xe] }
  0xf6   : > { %6529 = vmatprep.subr.bf16.mxu0 %v6882_v46  ;;  %v4905_v23 = vor.u32 %v4904_v8, %v4901_v42  ;;  %v4910_v61 = vrot.slane %v4908_v20, 5  ;;  %v4924_v28 = vrot.slane %v4922_v12, 5  ;;  %v6006_v47 = vrot.slane %v5998_v0, 9  ;;  %v6888_v63 = vld [vmem:[%s7060_s8 + $0x34] sm:$0x1] }
  0xf7   : > { %v4897_v38 = vsel %vm7069_vm3, %v4892_v13, %v4896_v17  ;;  %v4919_v29 = vor.u32 %v4918_v26, %v4915_v56  ;;  %v6007_v51 = vrot.slane %v5999_v62, 9  ;;  %v6008_v32 = vrot.slane %v6000_v1, 9  ;;  %v6001_v11 = vld [vmem:[%s7577_s28 + $0x30] sm:$0xe]  ;;  %v6004_v62 = vld [vmem:[%s7577_s28 + $0x48] sm:$0xe] }
  0xf8   : > { %v5989_v50 = vcombine.low %v4883_v14, %v4897_v38  ;;  %v4906_v34 = vrot.slane %v4905_v23, 4  ;;  %v5078_v49 = vrot.slane %v8244_v35, 5  ;;  %v5071_v10 = vsel %vm7173_vm6, %v6006_v47, %v5070_v19  ;;  %v6002_v19 = vld [vmem:[%s7577_s28 + $0x38] sm:$0xe] }
  0xf9   : > { %6530 = vmatpush3.bf16.msra.mxu0 %v6882_v46  ;;  %v4920_v41 = vrot.slane %v4919_v29, 4  ;;  %v2700_v58 = vshrl.u32 %v5679_v52, 16  ;;  %v5075_v4 = vsel %vm7173_vm6, %v6007_v51, %v5074_v2  ;;  %v5683_v46 = vld [vmem:[%s7060_s8 + $0x38] sm:$0xf]  ;;  %v2703_v17 = vshll.u32 %v5679_v52, 16 }
  0xfa   : > { %6523 = vmatprep.mubr.msk.bf16.mxu0 %vm508_vm2, %v5989_v50  ;;  %v4911_v48 = vsel %vm7069_vm3, %v4906_v34, %v4910_v61  ;;  %v5079_v3 = vsel %vm7173_vm6, %v6008_v32, %v5078_v49  ;;  %v2711_v6 = vrot.slane %v2709_v60, 5  ;;  %v2723_v20 = vshll.u32 %v6888_v63, 16  ;;  %v6003_v2 = vld [vmem:[%s7577_s28 + $0x40] sm:$0xe]  ;;  %s5387_s28 = sshll.u32 %s8410_s19, 6 }
  0xfb   : > { %6364 = vmatmul.mubr.msk.bf16.vlgmr.msra.gmra.mrb[0].mxu1 %vm508_vm2, %v6881_v57  ;;  %v5681_v57 = vld [vmem:[%s7060_s8 + $0x30] sm:$0xf]  ;;  %v4925_v35 = vsel %vm7069_vm3, %v4920_v41, %v4924_v28  ;;  %v6018_v44 = vcombine.low %v5075_v4, %v5079_v3  ;;  %v2702_v54 = vrot.slane %v2700_v58, 4  ;;  %v2705_v43 = vrot.slane %v2703_v17, 5  ;;  %s5386_s8 = sshll.u32 %s8416_s18, 3 }
  0xfc   : > { %6541 = vmatpush3.bf16.msra.mxu1 %v6886_v5  ;;  %6367 = vmatprep.mubr.msk.bf16.mxu1 %vm508_vm2, %v6883_v55  ;;  %v6005_v5 = vrot.slane %v5997_v7, 9  ;;  %v2714_v36 = vshrl.u32 %v5681_v57, 16  ;;  %v2717_v25 = vshll.u32 %v5681_v57, 16  ;;  %v2728_v27 = vshrl.u32 %v5683_v46, 16  ;;  %s340_s27 = sadd.s32 %s5387_s28, %s5386_s8 }
  0xfd   : > { %6540 = vmatprep.subr.bf16.mxu1 %v6887_v18  ;;  %v2731_v33 = vshll.u32 %v5683_v46, 16  ;;  %v2742_v12 = vshrl.u32 %v5685_v45, 16  ;;  %v2725_v60 = vrot.slane %v2723_v20, 5  ;;  %v2745_v8 = vshll.u32 %v5685_v45, 16  ;;  %s5388_s12 = sshll.u32 %s340_s27, 2 }
  0xfe   : > { %v5067_v15 = vsel %vm7173_vm6, %v6005_v5, %v5066_v31  ;;  %v5990_v31 = vcombine.low %v4911_v48, %v4925_v35  ;;  %v2716_v42 = vrot.slane %v2714_v36, 4  ;;  %v2719_v24 = vrot.slane %v2717_v25, 5  ;;  %s342_s13 = scalar_lea.vmem %s8393_s5, %s5388_s12 }
  0xff   : > { %v6017_v37 = vcombine.low %v5067_v15, %v5071_v10  ;;  %v2706_v13 = vor.u32 %v2705_v43, %v2702_v54  ;;  %v2730_v56 = vrot.slane %v2728_v27, 4  ;;  %v2733_v26 = vrot.slane %v2731_v33, 5 }
 0x100   : > { %6542 = vmatpush3.bf16.msra.mxu1 %v6887_v18  ;;  %6524 = vmatmul.mubr.msk.bf16.gmra.mrb[4].mxu0 %vm508_vm2, %v5990_v31  ;;  %v2744_v55 = vrot.slane %v2742_v12, 4  ;;  %v2720_v14 = vor.u32 %v2719_v24, %v2716_v42  ;;  %v2747_v23 = vrot.slane %v2745_v8, 5  ;;  %v6009_v61 = vrot.slane %v6001_v11, 9 }
 0x101   : > { %6531 = vmatprep.mubr.msk.bf16.mxu0 %vm508_vm2, %v6017_v37  ;;  %v5082_v28 = vrot.slane %v8258_v53, 5  ;;  %v2707_v38 = vrot.slane %v2706_v13, 4  ;;  %v2734_v29 = vor.u32 %v2733_v26, %v2730_v56  ;;  %v6010_v7 = vrot.slane %v6002_v19, 9 }
 0x102   : > { %v5086_v0 = vrot.slane %v8263_v39, 5  ;;  %v2721_v50 = vrot.slane %v2720_v14, 4  ;;  %v2748_v34 = vor.u32 %v2747_v23, %v2744_v55  ;;  %v6011_v5 = vrot.slane %v6003_v2, 9 }
 0x103   : > { %6368 = vmatmul.mubr.msk.bf16.gmra.mrb[4].mxu1 %vm508_vm2, %v6884_v9  ;;  %v5083_v18 = vsel %vm7173_vm6, %v6009_v61, %v5082_v28  ;;  %v2712_v47 = vsel %vm7069_vm3, %v2707_v38, %v2711_v6  ;;  %v2735_v1 = vrot.slane %v2734_v29, 4  ;;  %v5090_v53 = vrot.slane %v8280_v22, 5 }
 0x104   : > { %v5087_v41 = vsel %vm7173_vm6, %v6010_v7, %v5086_v0  ;;  %v2726_v51 = vsel %vm7069_vm3, %v2721_v50, %v2725_v60  ;;  %v2749_v39 = vrot.slane %v2748_v34, 4  ;;  %v6012_v49 = vrot.slane %v6004_v62, 9 }
 0x105   : > { %v6019_v32 = vcombine.low %v5083_v18, %v5087_v41  ;;  %v5693_v52 = vcombine.low %v2712_v47, %v2726_v51  ;;  %v2740_v48 = vsel %vm7069_vm3, %v2735_v1, %v7950_v21  ;;  %v5094_v9 = vrot.slane %v8284_v16, 5 }
 0x106   : > { %v2754_v22 = vsel %vm7069_vm3, %v2749_v39, %v7955_v59  ;;  %v5091_v15 = vsel %vm7173_vm6, %v6011_v5, %v5090_v53 }
 0x107   : > { %6379 = vmatprep.mubr.msk.bf16.mxu1 %vm508_vm2, %v5693_v52  ;;  %v5694_v10 = vcombine.low %v2740_v48, %v2754_v22  ;;  %v5095_v57 = vsel %vm7173_vm6, %v6012_v49, %v5094_v9 }
 0x108   : > { %6532 = vmatmul.mubr.msk.bf16.vlgmr.msra.gmra.mrb[0].mxu0 %vm508_vm2, %v6018_v44  ;;  %v6020_v21 = vcombine.low %v5091_v15, %v5095_v57 }
 0x109   : > { %6535 = vmatprep.mubr.msk.bf16.mxu0 %vm508_vm2, %v6019_v32 }
 0x10f   : > { %6380 = vmatmul.mubr.msk.bf16.vlgmr.msra.gmra.mrb[4].mxu1 %vm508_vm2, %v5694_v10 }
 0x110   : > { %6536 = vmatmul.mubr.msk.bf16.gmra.mrb[4].mxu0 %vm508_vm2, %v6020_v21 }
 0x1ce   : > { %v6365_v16 = vpop.f32.mrb[0].mxu1 }
 0x1cf   : > { %v2588_v30 = vpop.f32.mrb[1].mxu1 }
 0x1d0   : > { %v6366_v59 = vpop.f32.mrb[2].mxu1 }
 0x1d1   : > { %v2591_v58 = vpop.f32.mrb[3].mxu1 }
 0x1db   : > { %v6533_v35 = vpop.f32.mrb[0].mxu0 }
 0x1dc   : > { %v6543_v37 = vadd.f32 %v6533_v35, %v6365_v16  ;;  %v5171_v4 = vpop.f32.mrb[1].mxu0 }
 0x1dd   : > { %v6544_v3 = vadd.f32 %v5171_v4, %v2588_v30  ;;  %v6534_v46 = vpop.f32.mrb[2].mxu0 }
 0x1de   : > { %v6545_v45 = vadd.f32 %v6534_v46, %v6366_v59  ;;  %v5174_v31 = vpop.f32.mrb[3].mxu0  ;;  %v5219_v17 = vadd.f32 %v6543_v37, %v6027_v40 }
 0x1df   : > { %v6546_v44 = vadd.f32 %v5174_v31, %v2591_v58  ;;  %v5217_v25 = vadd.f32 %v6544_v3, %v6027_v40 }
 0x1e0   : > { %v5220_v6 = vadd.f32 %v6545_v45, %v6027_v40 }
 0x1e1   : > { %v5218_v63 = vadd.f32 %v6546_v44, %v6027_v40 }
 0x1e2   : > { %v6381_v54 = vpop.f32.mrb[4].mxu1  ;;  %v6038_v43 = vpack.c.bf16 %v5220_v6, %v5219_v17 }
 0x1e3   : > { %v2846_v36 = vpop.f32.mrb[5].mxu1  ;;  %v6033_v33 = vpack.c.bf16 %v5218_v63, %v5217_v25  ;;  %v6537_v12 = vpop.f32.mrb[4].mxu0 }
 0x1e4   : > { %v6382_v20 = vpop.f32.mrb[6].mxu1  ;;  %6050 = vst [vmem:[%s342_s13 + $0x8] sm:$0xff] %v6038_v43   ;;  %v6547_v11 = vadd.f32 %v6537_v12, %v6381_v54  ;;  %v5187_v42 = vpop.f32.mrb[5].mxu0 }
 0x1e5   : > { %v2849_v27 = vpop.f32.mrb[7].mxu1  ;;  %6034 = vst [vmem:[%s342_s13] sm:$0xff] %v6033_v33   ;;  %v6548_v24 = vadd.f32 %v5187_v42, %v2846_v36  ;;  %v6538_v60 = vpop.f32.mrb[6].mxu0 }
 0x1e6   : > { %v6549_v8 = vadd.f32 %v6538_v60, %v6382_v20  ;;  %v5190_v19 = vpop.f32.mrb[7].mxu0  ;;  %v5223_v56 = vadd.f32 %v6547_v11, %v6027_v40 }
 0x1e7   : > { %v6550_v13 = vadd.f32 %v5190_v19, %v2849_v27  ;;  %v5221_v55 = vadd.f32 %v6548_v24, %v6027_v40 }
 0x1e8   : > { %v5224_v26 = vadd.f32 %v6549_v8, %v6027_v40 }
 0x1e9   : > { %v5222_v2 = vadd.f32 %v6550_v13, %v6027_v40 }
 0x1ea   : > { %v6048_v14 = vpack.c.bf16 %v5224_v26, %v5223_v56 }
 0x1eb   : > { %v6043_v23 = vpack.c.bf16 %v5222_v2, %v5221_v55 }
 0x1ec   : > { %6052 = vst [vmem:[%s342_s13 + $0x18] sm:$0xff] %v6048_v14  }
 0x1ed   : > { %6051 = vst [vmem:[%s342_s13 + $0x10] sm:$0xff] %v6043_v23  }
 0x1ee PF: > { %s15_s22 = sadd.s32 1, %s6927_s22   ;;  %s8399_s18 = smov %s6919_s20 }
 0x1ef   : > { %p12_p10 = scmp.ge.s32.totalorder %s15_s22, 18   ;;  %s8400_s19 = smov %s6923_s21 }
 0x1f0   : > { %s8401_s20 = smov %s8404_s23  ;;  %s8402_s21 = smov %s8408_s24 }
 0x1f1   :  { %14 = sbr.rel (!%p12_p10) target bundleno = 3 (0x3), region = 108 }

</bundles_post_ra>
